<compile_context>
chip_gen: v7x
topology: tpu7x:2x2x1
jax: 0.10.0
libtpu: 0.0.40
codegen_flags: <defaults>
</compile_context>

<pallas_src>
import jax
import jax.numpy as jnp
from jax import lax
from jax.experimental import pallas as pl
from jax.experimental.pallas import tpu as pltpu


# --------------------------------------------------------------------------- #
# Kernel
# --------------------------------------------------------------------------- #
def _basic_block_kernel(x_ref, tt_ref, w1_ref, s1_ref, b1_ref,
                        w2_ref, s2_ref, b2_ref, o_ref):
    # x_ref : (1, Cin_p, HW)    one image, all channels, spatial flattened (lanes)
    # tt_ref: (9, HW, HW)       0/1 shift matrices (transposed), resident
    # w*_ref: (9, Cout_p, Cin_p) per-tap channel-mix weights, resident
    # s*/b* : (C_p, 1)          folded BatchNorm scale / bias
    x = x_ref[0]                                   # (Cin_p, HW) f32
    hw = x.shape[-1]

    def conv3x3(inp, w_ref):
        c_out = w_ref.shape[1]
        acc = jnp.zeros((c_out, hw), jnp.float32)
        for s in range(9):                         # unrolled over the 9 taps
            v = jnp.dot(w_ref[s], inp, preferred_element_type=jnp.float32)
            acc = acc + jnp.dot(v, tt_ref[s], preferred_element_type=jnp.float32)
        return acc

    y = conv3x3(x, w1_ref)                         # conv1
    y = jnp.maximum(y * s1_ref[...] + b1_ref[...], 0.0)   # bn1 + act1
    y = conv3x3(y, w2_ref)                         # conv2
    y = y * s2_ref[...] + b2_ref[...]              # bn2
    o_ref[0] = jnp.maximum(y + x, 0.0).astype(o_ref.dtype)  # + shortcut, act2


# --------------------------------------------------------------------------- #
# Host-side helpers
# --------------------------------------------------------------------------- #
def _round_up(n, m):
    return ((n + m - 1) // m) * m


def _make_shift_matrices(H, W):
    """(9, H*W, H*W) f32. (x_flat @ mats[kh*3+kw])[c, p] = x[c, h+kh-1, w+kw-1]
    at p = h*W + w, with zeros outside the image (PyTorch padding=1)."""
    HW = H * W
    hh, ww = jnp.meshgrid(jnp.arange(H), jnp.arange(W), indexing="ij")
    hh = hh.reshape(-1)
    ww = ww.reshape(-1)
    rows = jnp.arange(HW)
    mats = []
    for kh in range(3):
        for kw in range(3):
            dh, dw = kh - 1, kw - 1
            hs, ws = hh + dh, ww + dw
            valid = (hs >= 0) & (hs < H) & (ws >= 0) & (ws < W)
            q = jnp.clip(hs, 0, H - 1) * W + jnp.clip(ws, 0, W - 1)
            t = jnp.zeros((HW, HW), jnp.float32)
            t = t.at[rows, q].set(valid.astype(jnp.float32))
            mats.append(t.T)
    return jnp.stack(mats)


def basic_block_forward(x, w1, bn1_scale, bn1_bias, w2, bn2_scale, bn2_bias):
    """x: (N, Cin, H, W). w1: (C1, Cin, 3, 3), w2: (C2, C1, 3, 3), C2 == Cin.
    bn*_scale = gamma / sqrt(var + eps), bn*_bias = beta - mean * scale."""
    N, Cin, H, W = x.shape
    C1 = w1.shape[0]
    C2 = w2.shape[0]
    assert w1.shape == (C1, Cin, 3, 3) and w2.shape == (C2, C1, 3, 3)
    assert C2 == Cin, "identity shortcut requires outplanes == inplanes"
    HW = H * W

    cin_p = _round_up(Cin, 8)
    c1_p = _round_up(C1, 8)
    c2_p = _round_up(C2, 8)
    assert c2_p == cin_p

    # -- pack inputs: channel padding, spatial flatten (done once, in XLA) ----
    xp = jnp.pad(x.astype(jnp.float32), ((0, 0), (0, cin_p - Cin), (0, 0), (0, 0)))
    x2 = xp.reshape(N, cin_p, HW)

    def pack_w(w, co_p, ci_p):
        co, ci = w.shape[0], w.shape[1]
        wp = jnp.pad(w.astype(jnp.float32),
                     ((0, co_p - co), (0, ci_p - ci), (0, 0), (0, 0)))
        return jnp.transpose(wp, (2, 3, 0, 1)).reshape(9, co_p, ci_p)

    def pack_vec(v, c_p):
        return jnp.pad(v.astype(jnp.float32), (0, c_p - v.shape[0])).reshape(c_p, 1)

    w1s = pack_w(w1, c1_p, cin_p)
    w2s = pack_w(w2, c2_p, c1_p)
    s1 = pack_vec(bn1_scale, c1_p)
    b1 = pack_vec(bn1_bias, c1_p)
    s2 = pack_vec(bn2_scale, c2_p)
    b2 = pack_vec(bn2_bias, c2_p)
    tt = _make_shift_matrices(H, W)                 # (9, HW, HW)

    out = pl.pallas_call(
        _basic_block_kernel,
        out_shape=jax.ShapeDtypeStruct((N, c2_p, HW), x.dtype),
        grid_spec=pltpu.PrefetchScalarGridSpec(
            num_scalar_prefetch=0,
            grid=(N,),
            in_specs=[
                pl.BlockSpec((1, cin_p, HW), lambda n: (n, 0, 0)),    # x (per image)
                pl.BlockSpec((9, HW, HW), lambda n: (0, 0, 0)),       # shift matrices
                pl.BlockSpec((9, c1_p, cin_p), lambda n: (0, 0, 0)),  # conv1 weights
                pl.BlockSpec((c1_p, 1), lambda n: (0, 0)),            # bn1 scale
                pl.BlockSpec((c1_p, 1), lambda n: (0, 0)),            # bn1 bias
                pl.BlockSpec((9, c2_p, c1_p), lambda n: (0, 0, 0)),   # conv2 weights
                pl.BlockSpec((c2_p, 1), lambda n: (0, 0)),            # bn2 scale
                pl.BlockSpec((c2_p, 1), lambda n: (0, 0)),            # bn2 bias
            ],
            out_specs=pl.BlockSpec((1, c2_p, HW), lambda n: (n, 0, 0)),
        ),
        compiler_params=pltpu.CompilerParams(
            dimension_semantics=("parallel",)),
    )(x2, tt, w1s, s1, b1, w2s, s2, b2)

    return out.reshape(N, c2_p, H, W)[:, :C2]


# --------------------------------------------------------------------------- #
# Pure-JAX reference (real convolution, validates the shift-matrix conv math)
# --------------------------------------------------------------------------- #
def _reference_forward(x, w1, s1, b1, w2, s2, b2):
    dn = ("NCHW", "OIHW", "NCHW")
    y = lax.conv_general_dilated(x, w1, (1, 1), ((1, 1), (1, 1)),
                                 dimension_numbers=dn,
                                 precision=lax.Precision.HIGHEST)
    y = y * s1[None, :, None, None] + b1[None, :, None, None]
    y = jnp.maximum(y, 0.0)
    y = lax.conv_general_dilated(y, w2, (1, 1), ((1, 1), (1, 1)),
                                 dimension_numbers=dn,
                                 precision=lax.Precision.HIGHEST)
    y = y * s2[None, :, None, None] + b2[None, :, None, None]
    return jnp.maximum(y + x, 0.0)


if __name__ == "__main__":
    key = jax.random.PRNGKey(0)
    keys = jax.random.split(key, 11)
    N, C, H, W = 2, 4, 16, 16                       # inplanes = planes = 4, stride=1

    x = jax.random.normal(keys[0], (N, C, H, W), jnp.float32)
    w1 = 0.2 * jax.random.normal(keys[1], (C, C, 3, 3), jnp.float32)
    w2 = 0.2 * jax.random.normal(keys[2], (C, C, 3, 3), jnp.float32)

    eps = 1e-5
    g1 = 1.0 + 0.1 * jax.random.normal(keys[3], (C,), jnp.float32)
    be1 = 0.1 * jax.random.normal(keys[4], (C,), jnp.float32)
    m1 = 0.1 * jax.random.normal(keys[5], (C,), jnp.float32)
    v1 = jax.random.uniform(keys[6], (C,), jnp.float32, 0.5, 1.5)
    g2 = 1.0 + 0.1 * jax.random.normal(keys[7], (C,), jnp.float32)
    be2 = 0.1 * jax.random.normal(keys[8], (C,), jnp.float32)
    m2 = 0.1 * jax.random.normal(keys[9], (C,), jnp.float32)
    v2 = jax.random.uniform(keys[10], (C,), jnp.float32, 0.5, 1.5)

    s1 = g1 / jnp.sqrt(v1 + eps)
    b1 = be1 - m1 * s1
    s2 = g2 / jnp.sqrt(v2 + eps)
    b2 = be2 - m2 * s2

    y = basic_block_forward(x, w1, s1, b1, w2, s2, b2)
    jax.block_until_ready(y)

    y_ref = _reference_forward(x, w1, s1, b1, w2, s2, b2)
    assert y.shape == (N, C, H, W)
    err = float(jnp.max(jnp.abs(y - y_ref)))
    # MXU f32 matmuls may use bf16 passes at default precision -> small mismatch
    assert err < 5e-2, f"max abs err {err}"
    print("KERNEL_OK")
</pallas_src>

<mosaic_0001>
module attributes {stable_mosaic.version = 11 : i64} {
  func.func @_basic_block_kernel(%arg0: i32, %arg1: memref<1x8x256xf32, #tpu.memory_space<vmem>>, %arg2: memref<9x256x256xf32, #tpu.memory_space<vmem>>, %arg3: memref<9x8x8xf32, #tpu.memory_space<vmem>>, %arg4: memref<8x1xf32, #tpu.memory_space<vmem>>, %arg5: memref<8x1xf32, #tpu.memory_space<vmem>>, %arg6: memref<9x8x8xf32, #tpu.memory_space<vmem>>, %arg7: memref<8x1xf32, #tpu.memory_space<vmem>>, %arg8: memref<8x1xf32, #tpu.memory_space<vmem>>, %arg9: memref<1x8x256xf32, #tpu.memory_space<vmem>>) attributes {dimension_semantics = [#tpu.dimension_semantics<parallel>], iteration_bounds = array<i64: 2>, scalar_prefetch = 0 : i64, scratch_operands = 0 : i64, tpu.core_type = #tpu.core_type<tc>, window_params = [{transform_indices = @transform_0, window_bounds = array<i64: 1, 8, 256>}, {pipeline_mode = #tpu.pipeline_mode<synchronous>, transform_indices = @transform_1, window_bounds = array<i64: 9, 256, 256>}, {pipeline_mode = #tpu.pipeline_mode<synchronous>, transform_indices = @transform_2, window_bounds = array<i64: 9, 8, 8>}, {pipeline_mode = #tpu.pipeline_mode<synchronous>, transform_indices = @transform_3, window_bounds = array<i64: 8, 1>}, {pipeline_mode = #tpu.pipeline_mode<synchronous>, transform_indices = @transform_4, window_bounds = array<i64: 8, 1>}, {pipeline_mode = #tpu.pipeline_mode<synchronous>, transform_indices = @transform_5, window_bounds = array<i64: 9, 8, 8>}, {pipeline_mode = #tpu.pipeline_mode<synchronous>, transform_indices = @transform_6, window_bounds = array<i64: 8, 1>}, {pipeline_mode = #tpu.pipeline_mode<synchronous>, transform_indices = @transform_7, window_bounds = array<i64: 8, 1>}, {transform_indices = @transform_8, window_bounds = array<i64: 1, 8, 256>}]} {
    %c0 = arith.constant 0 : index
    %c0_0 = arith.constant 0 : index
    %c0_1 = arith.constant 0 : index
    %0 = vector.load %arg1[%c0, %c0_0, %c0_1] : memref<1x8x256xf32, #tpu.memory_space<vmem>>, vector<1x8x256xf32>
    %1 = vector.shape_cast %0 : vector<1x8x256xf32> to vector<8x256xf32>
    %cst = arith.constant 0.000000e+00 : f32
    %2 = vector.broadcast %cst : f32 to vector<8x256xf32>
    %c0_2 = arith.constant 0 : index
    %c0_3 = arith.constant 0 : index
    %c0_4 = arith.constant 0 : index
    %3 = vector.load %arg3[%c0_2, %c0_3, %c0_4] : memref<9x8x8xf32, #tpu.memory_space<vmem>>, vector<1x8x8xf32>
    %4 = vector.shape_cast %3 : vector<1x8x8xf32> to vector<8x8xf32>
    %cst_5 = arith.constant dense<0.000000e+00> : vector<8x256xf32>
    %5 = tpu.matmul %4, %1, %cst_5 {dimension_numbers = #tpu.dot_dimension_numbers<[1], [0], [0], [1], [0, 0, 1, 1], [], []>} : vector<8x8xf32>, vector<8x256xf32>, vector<8x256xf32> -> vector<8x256xf32>
    %c0_6 = arith.constant 0 : index
    %c0_7 = arith.constant 0 : index
    %c0_8 = arith.constant 0 : index
    %6 = vector.load %arg2[%c0_6, %c0_7, %c0_8] : memref<9x256x256xf32, #tpu.memory_space<vmem>>, vector<1x256x256xf32>
    %7 = vector.shape_cast %6 : vector<1x256x256xf32> to vector<256x256xf32>
    %cst_9 = arith.constant dense<0.000000e+00> : vector<8x256xf32>
    %8 = tpu.matmul %5, %7, %cst_9 {dimension_numbers = #tpu.dot_dimension_numbers<[1], [0], [0], [1], [0, 0, 1, 1], [], []>} : vector<8x256xf32>, vector<256x256xf32>, vector<8x256xf32> -> vector<8x256xf32>
    %9 = arith.addf %2, %8 : vector<8x256xf32>
    %c1 = arith.constant 1 : index
    %c0_10 = arith.constant 0 : index
    %c0_11 = arith.constant 0 : index
    %10 = vector.load %arg3[%c1, %c0_10, %c0_11] : memref<9x8x8xf32, #tpu.memory_space<vmem>>, vector<1x8x8xf32>
    %11 = vector.shape_cast %10 : vector<1x8x8xf32> to vector<8x8xf32>
    %cst_12 = arith.constant dense<0.000000e+00> : vector<8x256xf32>
    %12 = tpu.matmul %11, %1, %cst_12 {dimension_numbers = #tpu.dot_dimension_numbers<[1], [0], [0], [1], [0, 0, 1, 1], [], []>} : vector<8x8xf32>, vector<8x256xf32>, vector<8x256xf32> -> vector<8x256xf32>
    %c1_13 = arith.constant 1 : index
    %c0_14 = arith.constant 0 : index
    %c0_15 = arith.constant 0 : index
    %13 = vector.load %arg2[%c1_13, %c0_14, %c0_15] : memref<9x256x256xf32, #tpu.memory_space<vmem>>, vector<1x256x256xf32>
    %14 = vector.shape_cast %13 : vector<1x256x256xf32> to vector<256x256xf32>
    %cst_16 = arith.constant dense<0.000000e+00> : vector<8x256xf32>
    %15 = tpu.matmul %12, %14, %cst_16 {dimension_numbers = #tpu.dot_dimension_numbers<[1], [0], [0], [1], [0, 0, 1, 1], [], []>} : vector<8x256xf32>, vector<256x256xf32>, vector<8x256xf32> -> vector<8x256xf32>
    %16 = arith.addf %9, %15 : vector<8x256xf32>
    %c2 = arith.constant 2 : index
    %c0_17 = arith.constant 0 : index
    %c0_18 = arith.constant 0 : index
    %17 = vector.load %arg3[%c2, %c0_17, %c0_18] : memref<9x8x8xf32, #tpu.memory_space<vmem>>, vector<1x8x8xf32>
    %18 = vector.shape_cast %17 : vector<1x8x8xf32> to vector<8x8xf32>
    %cst_19 = arith.constant dense<0.000000e+00> : vector<8x256xf32>
    %19 = tpu.matmul %18, %1, %cst_19 {dimension_numbers = #tpu.dot_dimension_numbers<[1], [0], [0], [1], [0, 0, 1, 1], [], []>} : vector<8x8xf32>, vector<8x256xf32>, vector<8x256xf32> -> vector<8x256xf32>
    %c2_20 = arith.constant 2 : index
    %c0_21 = arith.constant 0 : index
    %c0_22 = arith.constant 0 : index
    %20 = vector.load %arg2[%c2_20, %c0_21, %c0_22] : memref<9x256x256xf32, #tpu.memory_space<vmem>>, vector<1x256x256xf32>
    %21 = vector.shape_cast %20 : vector<1x256x256xf32> to vector<256x256xf32>
    %cst_23 = arith.constant dense<0.000000e+00> : vector<8x256xf32>
    %22 = tpu.matmul %19, %21, %cst_23 {dimension_numbers = #tpu.dot_dimension_numbers<[1], [0], [0], [1], [0, 0, 1, 1], [], []>} : vector<8x256xf32>, vector<256x256xf32>, vector<8x256xf32> -> vector<8x256xf32>
    %23 = arith.addf %16, %22 : vector<8x256xf32>
    %c3 = arith.constant 3 : index
    %c0_24 = arith.constant 0 : index
    %c0_25 = arith.constant 0 : index
    %24 = vector.load %arg3[%c3, %c0_24, %c0_25] : memref<9x8x8xf32, #tpu.memory_space<vmem>>, vector<1x8x8xf32>
    %25 = vector.shape_cast %24 : vector<1x8x8xf32> to vector<8x8xf32>
    %cst_26 = arith.constant dense<0.000000e+00> : vector<8x256xf32>
    %26 = tpu.matmul %25, %1, %cst_26 {dimension_numbers = #tpu.dot_dimension_numbers<[1], [0], [0], [1], [0, 0, 1, 1], [], []>} : vector<8x8xf32>, vector<8x256xf32>, vector<8x256xf32> -> vector<8x256xf32>
    %c3_27 = arith.constant 3 : index
    %c0_28 = arith.constant 0 : index
    %c0_29 = arith.constant 0 : index
    %27 = vector.load %arg2[%c3_27, %c0_28, %c0_29] : memref<9x256x256xf32, #tpu.memory_space<vmem>>, vector<1x256x256xf32>
    %28 = vector.shape_cast %27 : vector<1x256x256xf32> to vector<256x256xf32>
    %cst_30 = arith.constant dense<0.000000e+00> : vector<8x256xf32>
    %29 = tpu.matmul %26, %28, %cst_30 {dimension_numbers = #tpu.dot_dimension_numbers<[1], [0], [0], [1], [0, 0, 1, 1], [], []>} : vector<8x256xf32>, vector<256x256xf32>, vector<8x256xf32> -> vector<8x256xf32>
    %30 = arith.addf %23, %29 : vector<8x256xf32>
    %c4 = arith.constant 4 : index
    %c0_31 = arith.constant 0 : index
    %c0_32 = arith.constant 0 : index
    %31 = vector.load %arg3[%c4, %c0_31, %c0_32] : memref<9x8x8xf32, #tpu.memory_space<vmem>>, vector<1x8x8xf32>
    %32 = vector.shape_cast %31 : vector<1x8x8xf32> to vector<8x8xf32>
    %cst_33 = arith.constant dense<0.000000e+00> : vector<8x256xf32>
    %33 = tpu.matmul %32, %1, %cst_33 {dimension_numbers = #tpu.dot_dimension_numbers<[1], [0], [0], [1], [0, 0, 1, 1], [], []>} : vector<8x8xf32>, vector<8x256xf32>, vector<8x256xf32> -> vector<8x256xf32>
    %c4_34 = arith.constant 4 : index
    %c0_35 = arith.constant 0 : index
    %c0_36 = arith.constant 0 : index
    %34 = vector.load %arg2[%c4_34, %c0_35, %c0_36] : memref<9x256x256xf32, #tpu.memory_space<vmem>>, vector<1x256x256xf32>
    %35 = vector.shape_cast %34 : vector<1x256x256xf32> to vector<256x256xf32>
    %cst_37 = arith.constant dense<0.000000e+00> : vector<8x256xf32>
    %36 = tpu.matmul %33, %35, %cst_37 {dimension_numbers = #tpu.dot_dimension_numbers<[1], [0], [0], [1], [0, 0, 1, 1], [], []>} : vector<8x256xf32>, vector<256x256xf32>, vector<8x256xf32> -> vector<8x256xf32>
    %37 = arith.addf %30, %36 : vector<8x256xf32>
    %c5 = arith.constant 5 : index
    %c0_38 = arith.constant 0 : index
    %c0_39 = arith.constant 0 : index
    %38 = vector.load %arg3[%c5, %c0_38, %c0_39] : memref<9x8x8xf32, #tpu.memory_space<vmem>>, vector<1x8x8xf32>
    %39 = vector.shape_cast %38 : vector<1x8x8xf32> to vector<8x8xf32>
    %cst_40 = arith.constant dense<0.000000e+00> : vector<8x256xf32>
    %40 = tpu.matmul %39, %1, %cst_40 {dimension_numbers = #tpu.dot_dimension_numbers<[1], [0], [0], [1], [0, 0, 1, 1], [], []>} : vector<8x8xf32>, vector<8x256xf32>, vector<8x256xf32> -> vector<8x256xf32>
    %c5_41 = arith.constant 5 : index
    %c0_42 = arith.constant 0 : index
    %c0_43 = arith.constant 0 : index
    %41 = vector.load %arg2[%c5_41, %c0_42, %c0_43] : memref<9x256x256xf32, #tpu.memory_space<vmem>>, vector<1x256x256xf32>
    %42 = vector.shape_cast %41 : vector<1x256x256xf32> to vector<256x256xf32>
    %cst_44 = arith.constant dense<0.000000e+00> : vector<8x256xf32>
    %43 = tpu.matmul %40, %42, %cst_44 {dimension_numbers = #tpu.dot_dimension_numbers<[1], [0], [0], [1], [0, 0, 1, 1], [], []>} : vector<8x256xf32>, vector<256x256xf32>, vector<8x256xf32> -> vector<8x256xf32>
    %44 = arith.addf %37, %43 : vector<8x256xf32>
    %c6 = arith.constant 6 : index
    %c0_45 = arith.constant 0 : index
    %c0_46 = arith.constant 0 : index
    %45 = vector.load %arg3[%c6, %c0_45, %c0_46] : memref<9x8x8xf32, #tpu.memory_space<vmem>>, vector<1x8x8xf32>
    %46 = vector.shape_cast %45 : vector<1x8x8xf32> to vector<8x8xf32>
    %cst_47 = arith.constant dense<0.000000e+00> : vector<8x256xf32>
    %47 = tpu.matmul %46, %1, %cst_47 {dimension_numbers = #tpu.dot_dimension_numbers<[1], [0], [0], [1], [0, 0, 1, 1], [], []>} : vector<8x8xf32>, vector<8x256xf32>, vector<8x256xf32> -> vector<8x256xf32>
    %c6_48 = arith.constant 6 : index
    %c0_49 = arith.constant 0 : index
    %c0_50 = arith.constant 0 : index
    %48 = vector.load %arg2[%c6_48, %c0_49, %c0_50] : memref<9x256x256xf32, #tpu.memory_space<vmem>>, vector<1x256x256xf32>
    %49 = vector.shape_cast %48 : vector<1x256x256xf32> to vector<256x256xf32>
    %cst_51 = arith.constant dense<0.000000e+00> : vector<8x256xf32>
    %50 = tpu.matmul %47, %49, %cst_51 {dimension_numbers = #tpu.dot_dimension_numbers<[1], [0], [0], [1], [0, 0, 1, 1], [], []>} : vector<8x256xf32>, vector<256x256xf32>, vector<8x256xf32> -> vector<8x256xf32>
    %51 = arith.addf %44, %50 : vector<8x256xf32>
    %c7 = arith.constant 7 : index
    %c0_52 = arith.constant 0 : index
    %c0_53 = arith.constant 0 : index
    %52 = vector.load %arg3[%c7, %c0_52, %c0_53] : memref<9x8x8xf32, #tpu.memory_space<vmem>>, vector<1x8x8xf32>
    %53 = vector.shape_cast %52 : vector<1x8x8xf32> to vector<8x8xf32>
    %cst_54 = arith.constant dense<0.000000e+00> : vector<8x256xf32>
    %54 = tpu.matmul %53, %1, %cst_54 {dimension_numbers = #tpu.dot_dimension_numbers<[1], [0], [0], [1], [0, 0, 1, 1], [], []>} : vector<8x8xf32>, vector<8x256xf32>, vector<8x256xf32> -> vector<8x256xf32>
    %c7_55 = arith.constant 7 : index
    %c0_56 = arith.constant 0 : index
    %c0_57 = arith.constant 0 : index
    %55 = vector.load %arg2[%c7_55, %c0_56, %c0_57] : memref<9x256x256xf32, #tpu.memory_space<vmem>>, vector<1x256x256xf32>
    %56 = vector.shape_cast %55 : vector<1x256x256xf32> to vector<256x256xf32>
    %cst_58 = arith.constant dense<0.000000e+00> : vector<8x256xf32>
    %57 = tpu.matmul %54, %56, %cst_58 {dimension_numbers = #tpu.dot_dimension_numbers<[1], [0], [0], [1], [0, 0, 1, 1], [], []>} : vector<8x256xf32>, vector<256x256xf32>, vector<8x256xf32> -> vector<8x256xf32>
    %58 = arith.addf %51, %57 : vector<8x256xf32>
    %c8 = arith.constant 8 : index
    %c0_59 = arith.constant 0 : index
    %c0_60 = arith.constant 0 : index
    %59 = vector.load %arg3[%c8, %c0_59, %c0_60] : memref<9x8x8xf32, #tpu.memory_space<vmem>>, vector<1x8x8xf32>
    %60 = vector.shape_cast %59 : vector<1x8x8xf32> to vector<8x8xf32>
    %cst_61 = arith.constant dense<0.000000e+00> : vector<8x256xf32>
    %61 = tpu.matmul %60, %1, %cst_61 {dimension_numbers = #tpu.dot_dimension_numbers<[1], [0], [0], [1], [0, 0, 1, 1], [], []>} : vector<8x8xf32>, vector<8x256xf32>, vector<8x256xf32> -> vector<8x256xf32>
    %c8_62 = arith.constant 8 : index
    %c0_63 = arith.constant 0 : index
    %c0_64 = arith.constant 0 : index
    %62 = vector.load %arg2[%c8_62, %c0_63, %c0_64] : memref<9x256x256xf32, #tpu.memory_space<vmem>>, vector<1x256x256xf32>
    %63 = vector.shape_cast %62 : vector<1x256x256xf32> to vector<256x256xf32>
    %cst_65 = arith.constant dense<0.000000e+00> : vector<8x256xf32>
    %64 = tpu.matmul %61, %63, %cst_65 {dimension_numbers = #tpu.dot_dimension_numbers<[1], [0], [0], [1], [0, 0, 1, 1], [], []>} : vector<8x256xf32>, vector<256x256xf32>, vector<8x256xf32> -> vector<8x256xf32>
    %65 = arith.addf %58, %64 : vector<8x256xf32>
    %c0_66 = arith.constant 0 : index
    %c0_67 = arith.constant 0 : index
    %66 = vector.load %arg4[%c0_66, %c0_67] : memref<8x1xf32, #tpu.memory_space<vmem>>, vector<8x1xf32>
    %67 = vector.broadcast %66 : vector<8x1xf32> to vector<8x256xf32>
    %68 = arith.mulf %65, %67 : vector<8x256xf32>
    %c0_68 = arith.constant 0 : index
    %c0_69 = arith.constant 0 : index
    %69 = vector.load %arg5[%c0_68, %c0_69] : memref<8x1xf32, #tpu.memory_space<vmem>>, vector<8x1xf32>
    %70 = vector.broadcast %69 : vector<8x1xf32> to vector<8x256xf32>
    %71 = arith.addf %68, %70 : vector<8x256xf32>
    %cst_70 = arith.constant 0.000000e+00 : f32
    %72 = vector.broadcast %cst_70 : f32 to vector<8x256xf32>
    %73 = arith.maximumf %71, %72 : vector<8x256xf32>
    %cst_71 = arith.constant 0.000000e+00 : f32
    %74 = vector.broadcast %cst_71 : f32 to vector<8x256xf32>
    %c0_72 = arith.constant 0 : index
    %c0_73 = arith.constant 0 : index
    %c0_74 = arith.constant 0 : index
    %75 = vector.load %arg6[%c0_72, %c0_73, %c0_74] : memref<9x8x8xf32, #tpu.memory_space<vmem>>, vector<1x8x8xf32>
    %76 = vector.shape_cast %75 : vector<1x8x8xf32> to vector<8x8xf32>
    %cst_75 = arith.constant dense<0.000000e+00> : vector<8x256xf32>
    %77 = tpu.matmul %76, %73, %cst_75 {dimension_numbers = #tpu.dot_dimension_numbers<[1], [0], [0], [1], [0, 0, 1, 1], [], []>} : vector<8x8xf32>, vector<8x256xf32>, vector<8x256xf32> -> vector<8x256xf32>
    %c0_76 = arith.constant 0 : index
    %c0_77 = arith.constant 0 : index
    %c0_78 = arith.constant 0 : index
    %78 = vector.load %arg2[%c0_76, %c0_77, %c0_78] : memref<9x256x256xf32, #tpu.memory_space<vmem>>, vector<1x256x256xf32>
    %79 = vector.shape_cast %78 : vector<1x256x256xf32> to vector<256x256xf32>
    %cst_79 = arith.constant dense<0.000000e+00> : vector<8x256xf32>
    %80 = tpu.matmul %77, %79, %cst_79 {dimension_numbers = #tpu.dot_dimension_numbers<[1], [0], [0], [1], [0, 0, 1, 1], [], []>} : vector<8x256xf32>, vector<256x256xf32>, vector<8x256xf32> -> vector<8x256xf32>
    %81 = arith.addf %74, %80 : vector<8x256xf32>
    %c1_80 = arith.constant 1 : index
    %c0_81 = arith.constant 0 : index
    %c0_82 = arith.constant 0 : index
    %82 = vector.load %arg6[%c1_80, %c0_81, %c0_82] : memref<9x8x8xf32, #tpu.memory_space<vmem>>, vector<1x8x8xf32>
    %83 = vector.shape_cast %82 : vector<1x8x8xf32> to vector<8x8xf32>
    %cst_83 = arith.constant dense<0.000000e+00> : vector<8x256xf32>
    %84 = tpu.matmul %83, %73, %cst_83 {dimension_numbers = #tpu.dot_dimension_numbers<[1], [0], [0], [1], [0, 0, 1, 1], [], []>} : vector<8x8xf32>, vector<8x256xf32>, vector<8x256xf32> -> vector<8x256xf32>
    %c1_84 = arith.constant 1 : index
    %c0_85 = arith.constant 0 : index
    %c0_86 = arith.constant 0 : index
    %85 = vector.load %arg2[%c1_84, %c0_85, %c0_86] : memref<9x256x256xf32, #tpu.memory_space<vmem>>, vector<1x256x256xf32>
    %86 = vector.shape_cast %85 : vector<1x256x256xf32> to vector<256x256xf32>
    %cst_87 = arith.constant dense<0.000000e+00> : vector<8x256xf32>
    %87 = tpu.matmul %84, %86, %cst_87 {dimension_numbers = #tpu.dot_dimension_numbers<[1], [0], [0], [1], [0, 0, 1, 1], [], []>} : vector<8x256xf32>, vector<256x256xf32>, vector<8x256xf32> -> vector<8x256xf32>
    %88 = arith.addf %81, %87 : vector<8x256xf32>
    %c2_88 = arith.constant 2 : index
    %c0_89 = arith.constant 0 : index
    %c0_90 = arith.constant 0 : index
    %89 = vector.load %arg6[%c2_88, %c0_89, %c0_90] : memref<9x8x8xf32, #tpu.memory_space<vmem>>, vector<1x8x8xf32>
    %90 = vector.shape_cast %89 : vector<1x8x8xf32> to vector<8x8xf32>
    %cst_91 = arith.constant dense<0.000000e+00> : vector<8x256xf32>
    %91 = tpu.matmul %90, %73, %cst_91 {dimension_numbers = #tpu.dot_dimension_numbers<[1], [0], [0], [1], [0, 0, 1, 1], [], []>} : vector<8x8xf32>, vector<8x256xf32>, vector<8x256xf32> -> vector<8x256xf32>
    %c2_92 = arith.constant 2 : index
    %c0_93 = arith.constant 0 : index
    %c0_94 = arith.constant 0 : index
    %92 = vector.load %arg2[%c2_92, %c0_93, %c0_94] : memref<9x256x256xf32, #tpu.memory_space<vmem>>, vector<1x256x256xf32>
    %93 = vector.shape_cast %92 : vector<1x256x256xf32> to vector<256x256xf32>
    %cst_95 = arith.constant dense<0.000000e+00> : vector<8x256xf32>
    %94 = tpu.matmul %91, %93, %cst_95 {dimension_numbers = #tpu.dot_dimension_numbers<[1], [0], [0], [1], [0, 0, 1, 1], [], []>} : vector<8x256xf32>, vector<256x256xf32>, vector<8x256xf32> -> vector<8x256xf32>
    %95 = arith.addf %88, %94 : vector<8x256xf32>
    %c3_96 = arith.constant 3 : index
    %c0_97 = arith.constant 0 : index
    %c0_98 = arith.constant 0 : index
    %96 = vector.load %arg6[%c3_96, %c0_97, %c0_98] : memref<9x8x8xf32, #tpu.memory_space<vmem>>, vector<1x8x8xf32>
    %97 = vector.shape_cast %96 : vector<1x8x8xf32> to vector<8x8xf32>
    %cst_99 = arith.constant dense<0.000000e+00> : vector<8x256xf32>
    %98 = tpu.matmul %97, %73, %cst_99 {dimension_numbers = #tpu.dot_dimension_numbers<[1], [0], [0], [1], [0, 0, 1, 1], [], []>} : vector<8x8xf32>, vector<8x256xf32>, vector<8x256xf32> -> vector<8x256xf32>
    %c3_100 = arith.constant 3 : index
    %c0_101 = arith.constant 0 : index
    %c0_102 = arith.constant 0 : index
    %99 = vector.load %arg2[%c3_100, %c0_101, %c0_102] : memref<9x256x256xf32, #tpu.memory_space<vmem>>, vector<1x256x256xf32>
    %100 = vector.shape_cast %99 : vector<1x256x256xf32> to vector<256x256xf32>
    %cst_103 = arith.constant dense<0.000000e+00> : vector<8x256xf32>
    %101 = tpu.matmul %98, %100, %cst_103 {dimension_numbers = #tpu.dot_dimension_numbers<[1], [0], [0], [1], [0, 0, 1, 1], [], []>} : vector<8x256xf32>, vector<256x256xf32>, vector<8x256xf32> -> vector<8x256xf32>
    %102 = arith.addf %95, %101 : vector<8x256xf32>
    %c4_104 = arith.constant 4 : index
    %c0_105 = arith.constant 0 : index
    %c0_106 = arith.constant 0 : index
    %103 = vector.load %arg6[%c4_104, %c0_105, %c0_106] : memref<9x8x8xf32, #tpu.memory_space<vmem>>, vector<1x8x8xf32>
    %104 = vector.shape_cast %103 : vector<1x8x8xf32> to vector<8x8xf32>
    %cst_107 = arith.constant dense<0.000000e+00> : vector<8x256xf32>
    %105 = tpu.matmul %104, %73, %cst_107 {dimension_numbers = #tpu.dot_dimension_numbers<[1], [0], [0], [1], [0, 0, 1, 1], [], []>} : vector<8x8xf32>, vector<8x256xf32>, vector<8x256xf32> -> vector<8x256xf32>
    %c4_108 = arith.constant 4 : index
    %c0_109 = arith.constant 0 : index
    %c0_110 = arith.constant 0 : index
    %106 = vector.load %arg2[%c4_108, %c0_109, %c0_110] : memref<9x256x256xf32, #tpu.memory_space<vmem>>, vector<1x256x256xf32>
    %107 = vector.shape_cast %106 : vector<1x256x256xf32> to vector<256x256xf32>
    %cst_111 = arith.constant dense<0.000000e+00> : vector<8x256xf32>
    %108 = tpu.matmul %105, %107, %cst_111 {dimension_numbers = #tpu.dot_dimension_numbers<[1], [0], [0], [1], [0, 0, 1, 1], [], []>} : vector<8x256xf32>, vector<256x256xf32>, vector<8x256xf32> -> vector<8x256xf32>
    %109 = arith.addf %102, %108 : vector<8x256xf32>
    %c5_112 = arith.constant 5 : index
    %c0_113 = arith.constant 0 : index
    %c0_114 = arith.constant 0 : index
    %110 = vector.load %arg6[%c5_112, %c0_113, %c0_114] : memref<9x8x8xf32, #tpu.memory_space<vmem>>, vector<1x8x8xf32>
    %111 = vector.shape_cast %110 : vector<1x8x8xf32> to vector<8x8xf32>
    %cst_115 = arith.constant dense<0.000000e+00> : vector<8x256xf32>
    %112 = tpu.matmul %111, %73, %cst_115 {dimension_numbers = #tpu.dot_dimension_numbers<[1], [0], [0], [1], [0, 0, 1, 1], [], []>} : vector<8x8xf32>, vector<8x256xf32>, vector<8x256xf32> -> vector<8x256xf32>
    %c5_116 = arith.constant 5 : index
    %c0_117 = arith.constant 0 : index
    %c0_118 = arith.constant 0 : index
    %113 = vector.load %arg2[%c5_116, %c0_117, %c0_118] : memref<9x256x256xf32, #tpu.memory_space<vmem>>, vector<1x256x256xf32>
    %114 = vector.shape_cast %113 : vector<1x256x256xf32> to vector<256x256xf32>
    %cst_119 = arith.constant dense<0.000000e+00> : vector<8x256xf32>
    %115 = tpu.matmul %112, %114, %cst_119 {dimension_numbers = #tpu.dot_dimension_numbers<[1], [0], [0], [1], [0, 0, 1, 1], [], []>} : vector<8x256xf32>, vector<256x256xf32>, vector<8x256xf32> -> vector<8x256xf32>
    %116 = arith.addf %109, %115 : vector<8x256xf32>
    %c6_120 = arith.constant 6 : index
    %c0_121 = arith.constant 0 : index
    %c0_122 = arith.constant 0 : index
    %117 = vector.load %arg6[%c6_120, %c0_121, %c0_122] : memref<9x8x8xf32, #tpu.memory_space<vmem>>, vector<1x8x8xf32>
    %118 = vector.shape_cast %117 : vector<1x8x8xf32> to vector<8x8xf32>
    %cst_123 = arith.constant dense<0.000000e+00> : vector<8x256xf32>
    %119 = tpu.matmul %118, %73, %cst_123 {dimension_numbers = #tpu.dot_dimension_numbers<[1], [0], [0], [1], [0, 0, 1, 1], [], []>} : vector<8x8xf32>, vector<8x256xf32>, vector<8x256xf32> -> vector<8x256xf32>
    %c6_124 = arith.constant 6 : index
    %c0_125 = arith.constant 0 : index
    %c0_126 = arith.constant 0 : index
    %120 = vector.load %arg2[%c6_124, %c0_125, %c0_126] : memref<9x256x256xf32, #tpu.memory_space<vmem>>, vector<1x256x256xf32>
    %121 = vector.shape_cast %120 : vector<1x256x256xf32> to vector<256x256xf32>
    %cst_127 = arith.constant dense<0.000000e+00> : vector<8x256xf32>
    %122 = tpu.matmul %119, %121, %cst_127 {dimension_numbers = #tpu.dot_dimension_numbers<[1], [0], [0], [1], [0, 0, 1, 1], [], []>} : vector<8x256xf32>, vector<256x256xf32>, vector<8x256xf32> -> vector<8x256xf32>
    %123 = arith.addf %116, %122 : vector<8x256xf32>
    %c7_128 = arith.constant 7 : index
    %c0_129 = arith.constant 0 : index
    %c0_130 = arith.constant 0 : index
    %124 = vector.load %arg6[%c7_128, %c0_129, %c0_130] : memref<9x8x8xf32, #tpu.memory_space<vmem>>, vector<1x8x8xf32>
    %125 = vector.shape_cast %124 : vector<1x8x8xf32> to vector<8x8xf32>
    %cst_131 = arith.constant dense<0.000000e+00> : vector<8x256xf32>
    %126 = tpu.matmul %125, %73, %cst_131 {dimension_numbers = #tpu.dot_dimension_numbers<[1], [0], [0], [1], [0, 0, 1, 1], [], []>} : vector<8x8xf32>, vector<8x256xf32>, vector<8x256xf32> -> vector<8x256xf32>
    %c7_132 = arith.constant 7 : index
    %c0_133 = arith.constant 0 : index
    %c0_134 = arith.constant 0 : index
    %127 = vector.load %arg2[%c7_132, %c0_133, %c0_134] : memref<9x256x256xf32, #tpu.memory_space<vmem>>, vector<1x256x256xf32>
    %128 = vector.shape_cast %127 : vector<1x256x256xf32> to vector<256x256xf32>
    %cst_135 = arith.constant dense<0.000000e+00> : vector<8x256xf32>
    %129 = tpu.matmul %126, %128, %cst_135 {dimension_numbers = #tpu.dot_dimension_numbers<[1], [0], [0], [1], [0, 0, 1, 1], [], []>} : vector<8x256xf32>, vector<256x256xf32>, vector<8x256xf32> -> vector<8x256xf32>
    %130 = arith.addf %123, %129 : vector<8x256xf32>
    %c8_136 = arith.constant 8 : index
    %c0_137 = arith.constant 0 : index
    %c0_138 = arith.constant 0 : index
    %131 = vector.load %arg6[%c8_136, %c0_137, %c0_138] : memref<9x8x8xf32, #tpu.memory_space<vmem>>, vector<1x8x8xf32>
    %132 = vector.shape_cast %131 : vector<1x8x8xf32> to vector<8x8xf32>
    %cst_139 = arith.constant dense<0.000000e+00> : vector<8x256xf32>
    %133 = tpu.matmul %132, %73, %cst_139 {dimension_numbers = #tpu.dot_dimension_numbers<[1], [0], [0], [1], [0, 0, 1, 1], [], []>} : vector<8x8xf32>, vector<8x256xf32>, vector<8x256xf32> -> vector<8x256xf32>
    %c8_140 = arith.constant 8 : index
    %c0_141 = arith.constant 0 : index
    %c0_142 = arith.constant 0 : index
    %134 = vector.load %arg2[%c8_140, %c0_141, %c0_142] : memref<9x256x256xf32, #tpu.memory_space<vmem>>, vector<1x256x256xf32>
    %135 = vector.shape_cast %134 : vector<1x256x256xf32> to vector<256x256xf32>
    %cst_143 = arith.constant dense<0.000000e+00> : vector<8x256xf32>
    %136 = tpu.matmul %133, %135, %cst_143 {dimension_numbers = #tpu.dot_dimension_numbers<[1], [0], [0], [1], [0, 0, 1, 1], [], []>} : vector<8x256xf32>, vector<256x256xf32>, vector<8x256xf32> -> vector<8x256xf32>
    %137 = arith.addf %130, %136 : vector<8x256xf32>
    %c0_144 = arith.constant 0 : index
    %c0_145 = arith.constant 0 : index
    %138 = vector.load %arg7[%c0_144, %c0_145] : memref<8x1xf32, #tpu.memory_space<vmem>>, vector<8x1xf32>
    %139 = vector.broadcast %138 : vector<8x1xf32> to vector<8x256xf32>
    %140 = arith.mulf %137, %139 : vector<8x256xf32>
    %c0_146 = arith.constant 0 : index
    %c0_147 = arith.constant 0 : index
    %141 = vector.load %arg8[%c0_146, %c0_147] : memref<8x1xf32, #tpu.memory_space<vmem>>, vector<8x1xf32>
    %142 = vector.broadcast %141 : vector<8x1xf32> to vector<8x256xf32>
    %143 = arith.addf %140, %142 : vector<8x256xf32>
    %144 = arith.addf %143, %1 : vector<8x256xf32>
    %cst_148 = arith.constant 0.000000e+00 : f32
    %145 = vector.broadcast %cst_148 : f32 to vector<8x256xf32>
    %146 = arith.maximumf %144, %145 : vector<8x256xf32>
    %c0_149 = arith.constant 0 : index
    %c0_150 = arith.constant 0 : index
    %c0_151 = arith.constant 0 : index
    %147 = vector.load %arg9[%c0_149, %c0_150, %c0_151] : memref<1x8x256xf32, #tpu.memory_space<vmem>>, vector<1x8x256xf32>
    %148 = vector.shape_cast %147 : vector<1x8x256xf32> to vector<8x256xf32>
    %149 = vector.shape_cast %146 : vector<8x256xf32> to vector<1x8x256xf32>
    tpu.vector_store %arg9[%c0_149, %c0_150, %c0_151], %149 {strides = array<i32>} : memref<1x8x256xf32, #tpu.memory_space<vmem>>, vector<1x8x256xf32>,
    return
  }
  func.func @transform_0(%arg0: i32) -> (i32, i32, i32) {
    %c0_i32 = arith.constant 0 : i32
    %c0_i32_0 = arith.constant 0 : i32
    %c0_i32_1 = arith.constant 0 : i32
    return %arg0, %c0_i32, %c0_i32_0 : i32, i32, i32
  }
  func.func @transform_1(%arg0: i32) -> (i32, i32, i32) {
    %c0_i32 = arith.constant 0 : i32
    %c0_i32_0 = arith.constant 0 : i32
    %c0_i32_1 = arith.constant 0 : i32
    %c0_i32_2 = arith.constant 0 : i32
    return %c0_i32, %c0_i32_0, %c0_i32_1 : i32, i32, i32
  }
  func.func @transform_2(%arg0: i32) -> (i32, i32, i32) {
    %c0_i32 = arith.constant 0 : i32
    %c0_i32_0 = arith.constant 0 : i32
    %c0_i32_1 = arith.constant 0 : i32
    %c0_i32_2 = arith.constant 0 : i32
    return %c0_i32, %c0_i32_0, %c0_i32_1 : i32, i32, i32
  }
  func.func @transform_3(%arg0: i32) -> (i32, i32) {
    %c0_i32 = arith.constant 0 : i32
    %c0_i32_0 = arith.constant 0 : i32
    %c0_i32_1 = arith.constant 0 : i32
    return %c0_i32, %c0_i32_0 : i32, i32
  }
  func.func @transform_4(%arg0: i32) -> (i32, i32) {
    %c0_i32 = arith.constant 0 : i32
    %c0_i32_0 = arith.constant 0 : i32
    %c0_i32_1 = arith.constant 0 : i32
    return %c0_i32, %c0_i32_0 : i32, i32
  }
  func.func @transform_5(%arg0: i32) -> (i32, i32, i32) {
    %c0_i32 = arith.constant 0 : i32
    %c0_i32_0 = arith.constant 0 : i32
    %c0_i32_1 = arith.constant 0 : i32
    %c0_i32_2 = arith.constant 0 : i32
    return %c0_i32, %c0_i32_0, %c0_i32_1 : i32, i32, i32
  }
  func.func @transform_6(%arg0: i32) -> (i32, i32) {
    %c0_i32 = arith.constant 0 : i32
    %c0_i32_0 = arith.constant 0 : i32
    %c0_i32_1 = arith.constant 0 : i32
    return %c0_i32, %c0_i32_0 : i32, i32
  }
  func.func @transform_7(%arg0: i32) -> (i32, i32) {
    %c0_i32 = arith.constant 0 : i32
    %c0_i32_0 = arith.constant 0 : i32
    %c0_i32_1 = arith.constant 0 : i32
    return %c0_i32, %c0_i32_0 : i32, i32
  }
  func.func @transform_8(%arg0: i32) -> (i32, i32, i32) {
    %c0_i32 = arith.constant 0 : i32
    %c0_i32_0 = arith.constant 0 : i32
    %c0_i32_1 = arith.constant 0 : i32
    return %arg0, %c0_i32, %c0_i32_0 : i32, i32, i32
  }
}

</mosaic_0001>

<bundles_post_ra>
// kernel: tpu_custom_call.1
= control target key start
LH: loop header
LB: loop body
LE: loop exit
PB: predicated region body
PF: predicated region fallthrough
CT: control target
= control target key end

     0   :  { %13 = vsyncpa [#allocation3], 0  ;;  %s6731_s0 = inlined_call_operand.hbm [shape: f32[2,8,256], index: 0, kind: input, shape index: {}]   ;;  %s6732_s1 = inlined_call_operand.hbm [shape: f32[9,256,256], index: 1, kind: input, shape index: {}]   ;;  %s6733_s2 = inlined_call_operand.vmem [shape: f32[9,8,8], index: 2, kind: input, shape index: {}]   ;;  %s6734_s3 = inlined_call_operand.vmem [shape: f32[8,1], index: 3, kind: input, shape index: {}]   ;;  %s6735_s4 = inlined_call_operand.vmem [shape: f32[8,1], index: 4, kind: input, shape index: {}]   ;;  %s6736_s5 = inlined_call_operand.vmem [shape: f32[9,8,8], index: 5, kind: input, shape index: {}]   ;;  %s6737_s6 = inlined_call_operand.vmem [shape: f32[8,1], index: 6, kind: input, shape index: {}]   ;;  %s6738_s7 = inlined_call_operand.vmem [shape: f32[8,1], index: 7, kind: input, shape index: {}]   ;;  %s6739_s8 = inlined_call_operand.hbm [shape: f32[2,8,256], index: 8, kind: output, shape index: {}]  }
   0x1   :  { %15 = vsyncpa [#allocation3 + $0x1], 0 }
   0x2   :  { %16 = vsyncpa [#allocation6], 0 }
   0x3   :  { %17 = vsyncpa [#allocation4], 0 }
   0x4   :  { %19 = vsyncpa [#allocation4 + $0x1], 0  ;;  %s5218_s27 = smov 0   ;;  %s5220_s28 = smov 0  }
   0x5   :  { %s5222_s29 = smov 0   ;;  %s5224_s30 = smov 0  }
   0x6 LB: > { %s5239_s9 = sadd.s32 4294967295, %s5164_s30   ;;  %s3731_s10 = sadd.s32 4294967294, %s5164_s30   ;;  %s5164_s30 = sphi %s5224_s30, %s7479_s30   ;;  %s5160_s29 = sphi %s5222_s29, %s7482_s29   ;;  %s5156_s28 = sphi %s5220_s28, %s7481_s28   ;;  %s5152_s27 = sphi %s5218_s27, %s7480_s27  }
   0x7   : > { %p45_p0 = scmp.ne.s32.totalorder %s5156_s28, %s5152_s27  ;;  %p6740_p1 = scmp.eq.s32.totalorder %s5239_s9, 0 }
   0x8   : > { %p222_p3 = scmp.eq.s32.totalorder %s3731_s10, 1  ;;  %p3732_p5 = scmp.ge.s32.totalorder %s5164_s30, 1 }
   0x9   : > { %p5248_p4 = por %p6740_p1, %p45_p0  ;;  %p229_p7 = scmp.lt.s32.totalorder %s5164_s30, 3 }
   0xa   : > { %p5253_p6 = por %p222_p3, %p45_p0  ;;  %s5166_s14 = smov [#allocation5]  }
   0xb   : > { %s6986_s11 = scalar_select %p5248_p4, 1, 0 }
   0xc   : > { %s6987_s12 = scalar_select %p5253_p6, 1, 0 }
   0xd   : > { %p5258_p8 = pnand %p3732_p5, %p229_p7  ;;  %s241_s15 = sshll.u32 %s5166_s14, 4  ;;  %s5262_s15 = int_to_ptr.vmem [resolvable:$true] %s241_s15 }
   0xe   : > { %s5274_s17 = sadd.s32 1, %s5164_s30   ;;  %s32_s18 = sadd.s32 1, %s5160_s29 }
   0xf   : > { %s6988_s13 = scalar_select %p5258_p8, 1, 0 }
  0x10   : > { %p4975_p9 = pneg %p5258_p8  ;;  %6990 = sst [smem:[#allocation11_spill]] %s5274_s17 }
  0x11   : > { %s29_s19 = ssub.s32 %s5164_s30, %s5274_s17  ;;  %s5036_s22 = scalar_lea.hbm %s6732_s1, 73728 }
  0x12   : > { %p5269_p11 = pnand %p4975_p9, %p6740_p1  ;;  %p5037_p12 = scmp.ne.s32.totalorder %s6732_s1, %s5036_s22 }
  0x13   : > { %p5043_p5 = scmp.lt.u32.totalorder %s5036_s22, %s6732_s1 }
  0x14   : > { %p5038_p13 = pneg %p5269_p11 }
  0x16   : > { %p5039_p0 = pnand %p5038_p13, %p5037_p12 }
  0x18   : > { %p5040_p3 = pneg %p5039_p0 }
  0x1a   : > { %p5045_p7 = pnand %p5043_p5, %p5040_p3 }
  0x1c   : > { %5048 = shalt.err (!%p5045_p7)
}
  0x1d   : > { %s5049_s10 = scalar_lea.vmem %s5262_s15, 73728  ;;  %p5057_p2 = scmp.lt.s32.totalorder %s5262_s15, %s5262_s15 }
  0x1e   : > { %p5050_p9 = scmp.ne.s32.totalorder %s5262_s15, %s5049_s10  ;;  %p5058_p6 = scmp.lt.s32.totalorder %s5049_s10, %s5049_s10 }
  0x20   : > { %p5052_p10 = pnand %p5050_p9, %p5038_p13  ;;  %p5059_p4 = por %p5058_p6, %p5057_p2 }
  0x22   : > { %p5053_p1 = pneg %p5052_p10 }
  0x24   : > { %p5060_p8 = pnand %p5059_p4, %p5053_p1 }
  0x26   : > { %5063 = shalt.err (!%p5060_p8)
}
  0x27   : > { %s5167_s14 = smov 256   ;;  %s5168_s20 = smov 16  }
  0x28   : > { %4978 = dma.hbm_to_vmem [thread:$0]  (!%p5269_p11), %s6732_s1, 73728, %s5262_s15, [#allocation6], %s5167_s14, %s5167_s14, %s5168_s20  }
  0x29   : > { %p30_p2 = scmp.eq.s32.totalorder %s29_s19, 0  ;;  %p39_p1 = scmp.ne.s32.totalorder %s5160_s29, %s5156_s28 }
  0x2a   : > { %p40_p4 = scmp.eq.s32.totalorder %s5164_s30, 0  ;;  %p4988_p6 = scmp.lt.s32.totalorder %s5164_s30, 2 }
  0x2b   : > { %s5305_s23 = scalar_select %p30_p2, %s5160_s29, %s32_s18  }
  0x2c   : > { %p41_p8 = por %p40_p4, %p39_p1  ;;  %p6991_p10 = scmp.eq.s32.totalorder %s5239_s9, 1 }
  0x2d   : > { %s273_s25 = sand.u32 1, %s5160_s29   ;;  %s3781_s26 = sshll.u32 %s5164_s30, 8 }
  0x2e   : > { %p5309_p12 = por %p6991_p10, %p39_p1  ;;  %s3735_s10 = sshll.u32 %s273_s25, 4 }
  0x2f   : > { %s5318_s21 = scalar_lea.hbm %s6731_s0, %s3781_s26  ;;  %s277_s15 = scalar_lea.vmem [#allocation2], %s3735_s10 }
  0x30   : > { %s285_s18 = sshll.u32 %s277_s15, 4  ;;  %p5320_p11 = pnand %p4988_p6, %p41_p8  ;;  %s5324_s18 = int_to_ptr.vmem [resolvable:$true] %s285_s18 }
  0x31   : > { %s274_s14 = scalar_lea.sflag [#allocation3], %s273_s25  ;;  %s5064_s20 = scalar_lea.hbm %s5318_s21, 256 }
  0x32   : > { %p5065_p13 = scmp.ne.s32.totalorder %s5318_s21, %s5064_s20  ;;  %p5066_p0 = pneg %p5320_p11 }
  0x33   : > { %s5069_s26 = scalar_lea.hbm %s6731_s0, 512  ;;  %p5070_p7 = scmp.lt.u32.totalorder %s5318_s21, %s6731_s0 }
  0x34   : > { %p5067_p3 = pnand %p5066_p0, %p5065_p13  ;;  %p5071_p9 = scmp.lt.u32.totalorder %s5069_s26, %s5064_s20 }
  0x35   : > { %p5073_p1 = scmp.lt.u32.totalorder %s5064_s20, %s5318_s21 }
  0x36   : > { %p5068_p5 = pneg %p5067_p3  ;;  %p5072_p2 = por %p5071_p9, %p5070_p7 }
  0x38   : > { %p5074_p4 = por %p5073_p1, %p5072_p2 }
  0x3a   : > { %p5075_p6 = pnand %p5074_p4, %p5068_p5 }
  0x3c   : > { %5078 = shalt.err (!%p5075_p6)
}
  0x3d   : > { %s5079_s25 = scalar_lea.vmem %s5324_s18, 256  ;;  %s5169_s15 = smov [#allocation2]  }
  0x3e   : > { %p5080_p8 = scmp.ne.s32.totalorder %s5324_s18, %s5079_s25  ;;  %s5084_s17 = sshll.u32 %s5169_s15, 4  ;;  %s5085_s17 = int_to_ptr.vmem [resolvable:$false] %s5084_s17 }
  0x3f   : > { %s5086_s22 = scalar_lea.vmem %s5085_s17, 512  ;;  %p5087_p3 = scmp.lt.s32.totalorder %s5324_s18, %s5085_s17 }
  0x40   : > { %p5082_p10 = pnand %p5080_p8, %p5066_p0  ;;  %p5088_p7 = scmp.lt.s32.totalorder %s5086_s22, %s5079_s25 }
  0x42   : > { %p5083_p13 = pneg %p5082_p10  ;;  %p5089_p9 = por %p5088_p7, %p5087_p3 }
  0x44   : > { %p5090_p2 = pnand %p5089_p9, %p5083_p13 }
  0x46   : > { %5093 = shalt.err (!%p5090_p2)
}
  0x47   : > { %4982 = dma.hbm_to_vmem [thread:$0]  (!%p5320_p11), %s5318_s21, 256, %s5324_s18, %s274_s14  }
  0x48   : > { %p6994_p5 = scmp.ne.s32.totalorder %s6988_s13, 0 }
  0x4a   : > { %294 = sbr.rel (%p6994_p5) target bundleno = 4164 (0x1044), region = 52 }
  0x51   : > { %s5354_s20 = sand.u32 1, %s5156_s28   ;;  %p6995_p0 = scmp.ne.s32.totalorder %s6986_s11, 0 }
  0x52   : > { %s3739_s26 = sshll.u32 %s5354_s20, 4  ;;  %s297_s10 = scalar_lea.sflag [#allocation3], %s5354_s20 }
  0x53   : > { %s5360_s16 = scalar_lea.vmem [#allocation2], %s3739_s26 }
  0x54   : > { %5139 = dma.done.wait (%p6995_p0), %s297_s10, 256  }
  0x55   : > { %5141 = vsyncadd (%p6995_p0), %s297_s10, 4294967040  ;;  %p6996_p11 = scmp.eq.s32.totalorder %s5239_s9, 0 }
  0x57   : > { %5143 = dma.done.wait (%p6996_p11), [#allocation6], 73728   ;;  %p6997_p1 = pmov %p6996_p11 }
  0x58   : > { %v6745_v0 = vmov 0.0   ;;  %v5373_v1 = vld [vmem:[%s5360_s16 + $0x8] sm:$0xff]  ;;  %v5376_v2 = vld [vmem:[%s5360_s16] sm:$0xff]  ;;  %vm340_vm0 = vcmask 64512   ;;  %s3782_s13 = sshll.u32 %s5239_s9, 8  ;;  %s336_s11 = scalar_lea.vmem [#allocation7], %s3739_s26 }
  0x59   : > { %5145 = vsyncadd (%p6997_p1), [#allocation6], 4294893568  ;;  %408 = vmatprep.mubr.f32.mxu0 %v6745_v0  ;;  %2346 = vmatprep.mubr.f32.mxu1 %v6745_v0  ;;  %v339_v3 = vld [vmem:[%s6733_s2] sm:$0xff]  ;;  %v557_v4 = vld [vmem:[#allocation5 + $0x208] sm:$0xff]  ;;  %s3651_s21 = sshll.u32 %s336_s11, 4  ;;  %s6687_s14 = scalar_lea.hbm %s6739_s8, %s3782_s13  ;;  %s6689_s21 = int_to_ptr.vmem [resolvable:$true] %s3651_s21 }
  0x5a   : > { %344 = vmatprep.subr.mxu0 %v5373_v1  ;;  %v559_v5 = vld [vmem:[#allocation5 + $0x218] sm:$0xff]  ;;  %v556_v7 = vld [vmem:[#allocation5 + $0x200] sm:$0xff]  ;;  %v558_v8 = vld [vmem:[#allocation5 + $0x210] sm:$0xff]  ;;  %s3637_s9 = scalar_lea.sflag [#allocation4], %s5354_s20  ;;  %s5094_s25 = scalar_lea.vmem %s6689_s21, 256 }
  0x5b   : > { %345 = vmatpush1.msra.mxu0 %v5376_v2  ;;  %v5383_v6 = vpack.c.bf16 %v559_v5, %v557_v4  ;;  %v561_v9 = vld [vmem:[#allocation5 + $0x228] sm:$0xff]  ;;  %v563_v10 = vld [vmem:[#allocation5 + $0x238] sm:$0xff]  ;;  %v5392_v12 = vpack.c.bf16 %v558_v8, %v556_v7  ;;  %v560_v14 = vld [vmem:[#allocation5 + $0x220] sm:$0xff]  ;;  %p5095_p4 = scmp.ne.s32.totalorder %s6689_s21, %s5094_s25  ;;  %s5172_s26 = smov [#allocation7]  }
  0x5c   : > { %3742 = vmatmul.mubr.msk.f32.vlgmr.msra.gmra.mrb[0].mxu0 %vm340_vm0, %v339_v3  ;;  %484 = vmatprep.subr.mxu0 %v5373_v1  ;;  %v3743_v11 = vld [vmem:[%s6733_s2 + $0x8] sm:$0xff]  ;;  %v5395_v13 = vpack.c.bf16 %v563_v10, %v561_v9  ;;  %v562_v15 = vld [vmem:[#allocation5 + $0x230] sm:$0xff]  ;;  %v567_v17 = vld [vmem:[#allocation5 + $0x258] sm:$0xff] }
  0x5d   : > { %485 = vmatpush1.msra.mxu0 %v5376_v2  ;;  %548 = vmatprep.mubr.f32.mxu0 %v6745_v0  ;;  %v565_v16 = vld [vmem:[#allocation5 + $0x248] sm:$0xff]  ;;  %v5399_v18 = vpack.c.bf16 %v562_v15, %v560_v14  ;;  %v564_v20 = vld [vmem:[#allocation5 + $0x240] sm:$0xff]  ;;  %v566_v21 = vld [vmem:[#allocation5 + $0x250] sm:$0xff]  ;;  %p5096_p6 = pnand %p5095_p4, %p5309_p12 }
  0x5e   : > { %3784 = vmatprep.subr.bf16.mxu0 %v5383_v6  ;;  %v5402_v19 = vpack.c.bf16 %v567_v17, %v565_v16  ;;  %v569_v22 = vld [vmem:[#allocation5 + $0x268] sm:$0xff]  ;;  %v571_v23 = vld [vmem:[#allocation5 + $0x278] sm:$0xff]  ;;  %v5405_v24 = vpack.c.bf16 %v566_v21, %v564_v20  ;;  %v568_v26 = vld [vmem:[#allocation5 + $0x260] sm:$0xff] }
  0x5f   : > { %v5408_v25 = vpack.c.bf16 %v571_v23, %v569_v22  ;;  %v570_v27 = vld [vmem:[#allocation5 + $0x270] sm:$0xff]  ;;  %v573_v28 = vld [vmem:[#allocation5 + $0x288] sm:$0xff]  ;;  %v575_v29 = vld [vmem:[#allocation5 + $0x298] sm:$0xff]  ;;  %p5097_p8 = pneg %p5096_p6 }
  0x60   : > { %3744 = vmatmul.mubr.msk.f32.vlgmr.msra.gmra.mrb[2].mxu0 %vm340_vm0, %v3743_v11  ;;  %v5411_v30 = vpack.c.bf16 %v570_v27, %v568_v26  ;;  %v5414_v31 = vpack.c.bf16 %v575_v29, %v573_v28  ;;  %v572_v32 = vld [vmem:[#allocation5 + $0x280] sm:$0xff]  ;;  %v574_v33 = vld [vmem:[#allocation5 + $0x290] sm:$0xff]  ;;  %v577_v34 = vld [vmem:[#allocation5 + $0x2a8] sm:$0xff] }
  0x61   : > { %3786 = vmatpush1.bf16.msra.mxu0 %v5392_v12  ;;  %v579_v35 = vld [vmem:[#allocation5 + $0x2b8] sm:$0xff]  ;;  %v5417_v36 = vpack.c.bf16 %v574_v33, %v572_v32  ;;  %v576_v38 = vld [vmem:[#allocation5 + $0x2a0] sm:$0xff]  ;;  %v578_v39 = vld [vmem:[#allocation5 + $0x2b0] sm:$0xff] }
  0x62   : > { %3788 = vmatprep.subr.bf16.mxu0 %v5395_v13  ;;  %v5420_v37 = vpack.c.bf16 %v579_v35, %v577_v34  ;;  %v581_v40 = vld [vmem:[#allocation5 + $0x2c8] sm:$0xff]  ;;  %v583_v41 = vld [vmem:[#allocation5 + $0x2d8] sm:$0xff]  ;;  %v5423_v42 = vpack.c.bf16 %v578_v39, %v576_v38  ;;  %v580_v44 = vld [vmem:[#allocation5 + $0x2c0] sm:$0xff] }
  0x63   : > { %v5426_v43 = vpack.c.bf16 %v583_v41, %v581_v40  ;;  %v582_v45 = vld [vmem:[#allocation5 + $0x2d0] sm:$0xff]  ;;  %v585_v46 = vld [vmem:[#allocation5 + $0x2e8] sm:$0xff]  ;;  %v587_v47 = vld [vmem:[#allocation5 + $0x2f8] sm:$0xff] }
  0x64   : > { %v5429_v48 = vpack.c.bf16 %v582_v45, %v580_v44  ;;  %v5432_v49 = vpack.c.bf16 %v587_v47, %v585_v46  ;;  %v584_v50 = vld [vmem:[#allocation5 + $0x2e0] sm:$0xff]  ;;  %v586_v51 = vld [vmem:[#allocation5 + $0x2f0] sm:$0xff]  ;;  %v589_v52 = vld [vmem:[#allocation5 + $0x308] sm:$0xff] }
  0x65   : > { %3790 = vmatpush1.bf16.msra.mxu0 %v5399_v18  ;;  %v591_v53 = vld [vmem:[#allocation5 + $0x318] sm:$0xff]  ;;  %v5435_v54 = vpack.c.bf16 %v586_v51, %v584_v50  ;;  %v588_v56 = vld [vmem:[#allocation5 + $0x300] sm:$0xff]  ;;  %v590_v57 = vld [vmem:[#allocation5 + $0x310] sm:$0xff] }
  0x66   : > { %3792 = vmatprep.subr.bf16.mxu0 %v5402_v19  ;;  %v5438_v55 = vpack.c.bf16 %v591_v53, %v589_v52  ;;  %v593_v58 = vld [vmem:[#allocation5 + $0x328] sm:$0xff]  ;;  %v595_v59 = vld [vmem:[#allocation5 + $0x338] sm:$0xff]  ;;  %v5441_v60 = vpack.c.bf16 %v590_v57, %v588_v56  ;;  %v592_v62 = vld [vmem:[#allocation5 + $0x320] sm:$0xff] }
  0x67   : > { %v5444_v61 = vpack.c.bf16 %v595_v59, %v593_v58  ;;  %v594_v63 = vld [vmem:[#allocation5 + $0x330] sm:$0xff]  ;;  %v597_v3 = vld [vmem:[#allocation5 + $0x348] sm:$0xff]  ;;  %v599_v4 = vld [vmem:[#allocation5 + $0x358] sm:$0xff] }
  0x68   : > { %v5447_v5 = vpack.c.bf16 %v594_v63, %v592_v62  ;;  %v5450_v7 = vpack.c.bf16 %v599_v4, %v597_v3  ;;  %v596_v8 = vld [vmem:[#allocation5 + $0x340] sm:$0xff]  ;;  %v598_v9 = vld [vmem:[#allocation5 + $0x350] sm:$0xff]  ;;  %v601_v10 = vld [vmem:[#allocation5 + $0x368] sm:$0xff] }
  0x69   : > { %3794 = vmatpush1.bf16.msra.mxu0 %v5405_v24  ;;  %v603_v11 = vld [vmem:[#allocation5 + $0x378] sm:$0xff]  ;;  %v5453_v14 = vpack.c.bf16 %v598_v9, %v596_v8  ;;  %v600_v16 = vld [vmem:[#allocation5 + $0x360] sm:$0xff]  ;;  %v602_v17 = vld [vmem:[#allocation5 + $0x370] sm:$0xff] }
  0x6a   : > { %3796 = vmatprep.subr.bf16.mxu0 %v5408_v25  ;;  %v5456_v15 = vpack.c.bf16 %v603_v11, %v601_v10  ;;  %v605_v20 = vld [vmem:[#allocation5 + $0x388] sm:$0xff]  ;;  %v607_v21 = vld [vmem:[#allocation5 + $0x398] sm:$0xff]  ;;  %v5459_v22 = vpack.c.bf16 %v602_v17, %v600_v16  ;;  %v604_v26 = vld [vmem:[#allocation5 + $0x380] sm:$0xff] }
  0x6b   : > { %v5462_v23 = vpack.c.bf16 %v607_v21, %v605_v20  ;;  %v606_v27 = vld [vmem:[#allocation5 + $0x390] sm:$0xff]  ;;  %v609_v28 = vld [vmem:[#allocation5 + $0x3a8] sm:$0xff]  ;;  %v611_v29 = vld [vmem:[#allocation5 + $0x3b8] sm:$0xff] }
  0x6c   : > { %v5465_v32 = vpack.c.bf16 %v606_v27, %v604_v26  ;;  %v5468_v33 = vpack.c.bf16 %v611_v29, %v609_v28  ;;  %v608_v34 = vld [vmem:[#allocation5 + $0x3a0] sm:$0xff]  ;;  %v610_v35 = vld [vmem:[#allocation5 + $0x3b0] sm:$0xff]  ;;  %v613_v38 = vld [vmem:[#allocation5 + $0x3c8] sm:$0xff] }
  0x6d   : > { %3798 = vmatpush1.bf16.msra.mxu0 %v5411_v30  ;;  %v615_v39 = vld [vmem:[#allocation5 + $0x3d8] sm:$0xff]  ;;  %v5471_v40 = vpack.c.bf16 %v610_v35, %v608_v34  ;;  %v612_v44 = vld [vmem:[#allocation5 + $0x3c0] sm:$0xff]  ;;  %v614_v45 = vld [vmem:[#allocation5 + $0x3d0] sm:$0xff] }
  0x6e   : > { %3800 = vmatprep.subr.bf16.mxu0 %v5414_v31  ;;  %v5474_v41 = vpack.c.bf16 %v615_v39, %v613_v38  ;;  %v5477_v46 = vpack.c.bf16 %v614_v45, %v612_v44  ;;  %v617_v47 = vld [vmem:[#allocation5 + $0x3e8] sm:$0xff]  ;;  %v619_v50 = vld [vmem:[#allocation5 + $0x3f8] sm:$0xff]  ;;  %v616_v52 = vld [vmem:[#allocation5 + $0x3e0] sm:$0xff] }
  0x6f   : > { %v5481_v51 = vpack.c.bf16 %v619_v50, %v617_v47  ;;  %v618_v53 = vld [vmem:[#allocation5 + $0x3f0] sm:$0xff]  ;;  %v416_v57 = vld [vmem:[#allocation5 + $0x8] sm:$0xff]  ;;  %v418_v58 = vld [vmem:[#allocation5 + $0x18] sm:$0xff] }
  0x70   : > { %v5483_v56 = vpack.c.bf16 %v618_v53, %v616_v52  ;;  %v5487_v59 = vpack.c.bf16 %v418_v58, %v416_v57  ;;  %v415_v3 = vld [vmem:[#allocation5] sm:$0xff]  ;;  %v417_v4 = vld [vmem:[#allocation5 + $0x10] sm:$0xff]  ;;  %v420_v8 = vld [vmem:[#allocation5 + $0x28] sm:$0xff] }
  0x71   : > { %3802 = vmatpush1.bf16.msra.mxu0 %v5417_v36  ;;  %v422_v9 = vld [vmem:[#allocation5 + $0x38] sm:$0xff]  ;;  %v5492_v11 = vpack.c.bf16 %v417_v4, %v415_v3  ;;  %v419_v20 = vld [vmem:[#allocation5 + $0x20] sm:$0xff]  ;;  %v421_v21 = vld [vmem:[#allocation5 + $0x30] sm:$0xff] }
  0x72   : > { %3804 = vmatprep.subr.bf16.mxu0 %v5420_v37  ;;  %v5494_v17 = vpack.c.bf16 %v422_v9, %v420_v8  ;;  %v424_v26 = vld [vmem:[#allocation5 + $0x48] sm:$0xff]  ;;  %v426_v27 = vld [vmem:[#allocation5 + $0x58] sm:$0xff]  ;;  %v5497_v28 = vpack.c.bf16 %v421_v21, %v419_v20  ;;  %v423_v34 = vld [vmem:[#allocation5 + $0x40] sm:$0xff] }
  0x73   : > { %v5500_v29 = vpack.c.bf16 %v426_v27, %v424_v26  ;;  %v425_v35 = vld [vmem:[#allocation5 + $0x50] sm:$0xff]  ;;  %v428_v38 = vld [vmem:[#allocation5 + $0x68] sm:$0xff]  ;;  %v430_v39 = vld [vmem:[#allocation5 + $0x78] sm:$0xff] }
  0x74   : > { %v5503_v44 = vpack.c.bf16 %v425_v35, %v423_v34  ;;  %v5506_v45 = vpack.c.bf16 %v430_v39, %v428_v38  ;;  %v427_v47 = vld [vmem:[#allocation5 + $0x60] sm:$0xff]  ;;  %v429_v50 = vld [vmem:[#allocation5 + $0x70] sm:$0xff]  ;;  %v432_v52 = vld [vmem:[#allocation5 + $0x88] sm:$0xff] }
  0x75   : > { %3806 = vmatpush1.bf16.msra.mxu0 %v5423_v42  ;;  %v434_v53 = vld [vmem:[#allocation5 + $0x98] sm:$0xff]  ;;  %v5509_v57 = vpack.c.bf16 %v429_v50, %v427_v47  ;;  %v433_v3 = vld [vmem:[#allocation5 + $0x90] sm:$0xff]  ;;  %v436_v4 = vld [vmem:[#allocation5 + $0xa8] sm:$0xff] }
  0x76   : > { %3808 = vmatprep.subr.bf16.mxu0 %v5426_v43  ;;  %v5512_v58 = vpack.c.bf16 %v434_v53, %v432_v52  ;;  %v438_v8 = vld [vmem:[#allocation5 + $0xb8] sm:$0xff]  ;;  %v437_v20 = vld [vmem:[#allocation5 + $0xb0] sm:$0xff]  ;;  %v440_v21 = vld [vmem:[#allocation5 + $0xc8] sm:$0xff] }
  0x77   : > { %v442_v26 = vld [vmem:[#allocation5 + $0xd8] sm:$0xff]  ;;  %v439_v35 = vld [vmem:[#allocation5 + $0xc0] sm:$0xff]  ;;  %v441_v38 = vld [vmem:[#allocation5 + $0xd0] sm:$0xff] }
  0x78   : > { %v5524_v34 = vpack.c.bf16 %v442_v26, %v440_v21  ;;  %v444_v39 = vld [vmem:[#allocation5 + $0xe8] sm:$0xff]  ;;  %v446_v47 = vld [vmem:[#allocation5 + $0xf8] sm:$0xff]  ;;  %v5527_v50 = vpack.c.bf16 %v441_v38, %v439_v35  ;;  %v443_v53 = vld [vmem:[#allocation5 + $0xe0] sm:$0xff] }
  0x79   : > { %3810 = vmatpush1.bf16.msra.mxu0 %v5429_v48  ;;  %v5530_v52 = vpack.c.bf16 %v446_v47, %v444_v39  ;;  %v449_v21 = vld [vmem:[#allocation5 + $0x110] sm:$0xff]  ;;  %v452_v26 = vld [vmem:[#allocation5 + $0x128] sm:$0xff]  ;;  %v454_v35 = vld [vmem:[#allocation5 + $0x138] sm:$0xff] }
  0x7a   : > { %3812 = vmatprep.subr.bf16.mxu0 %v5432_v49  ;;  %v5542_v39 = vpack.c.bf16 %v454_v35, %v452_v26  ;;  %v451_v47 = vld [vmem:[#allocation5 + $0x120] sm:$0xff]  ;;  %v453_v0 = vld [vmem:[#allocation5 + $0x130] sm:$0xff] }
  0x7b   : > { %6998 = vst [vmem:[#allocation12_spill] sm:$0xff] %v5530_v52 }
  0x7c   : > { %7002 = vst [vmem:[#allocation16_spill] sm:$0xff] %v5542_v39 }
  0x7d   : > { %3814 = vmatpush1.bf16.msra.mxu0 %v5435_v54 }
  0x7e   : > { %3816 = vmatprep.subr.bf16.mxu0 %v5438_v55 }
  0x81   : > { %3818 = vmatpush1.bf16.msra.mxu0 %v5441_v60 }
  0x82   : > { %3820 = vmatprep.subr.bf16.mxu0 %v5444_v61 }
  0x85   : > { %3822 = vmatpush1.bf16.msra.mxu0 %v5447_v5 }
  0x86   : > { %3824 = vmatprep.subr.bf16.mxu0 %v5450_v7 }
  0x89   : > { %3826 = vmatpush1.bf16.msra.mxu0 %v5453_v14 }
  0x8a   : > { %3828 = vmatprep.subr.bf16.mxu0 %v5456_v15 }
  0x8d   : > { %3830 = vmatpush1.bf16.msra.mxu0 %v5459_v22 }
  0x8e   : > { %3832 = vmatprep.subr.bf16.mxu0 %v5462_v23 }
  0x91   : > { %3834 = vmatpush1.bf16.msra.mxu0 %v5465_v32 }
  0x92   : > { %3836 = vmatprep.subr.bf16.mxu0 %v5468_v33 }
  0x95   : > { %3838 = vmatpush1.bf16.msra.mxu0 %v5471_v40 }
  0x96   : > { %3840 = vmatprep.subr.bf16.mxu0 %v5474_v41 }
  0x99   : > { %3842 = vmatpush1.bf16.msra.mxu0 %v5477_v46 }
  0x9a   : > { %3844 = vmatprep.subr.bf16.mxu0 %v5481_v51 }
  0x9d   : > { %3846 = vmatpush1.bf16.msra.mxu0 %v5483_v56 }
  0x9e   : > { %3848 = vmatprep.subr.bf16.mxu0 %v5487_v59 }
 0x12f   : > { %v5490_v62 = vpop.f32.mrb[0].mxu0 }
 0x130   : > { %v412_v63 = vpop.f32.mrb[1].mxu0 }
 0x133   : > { %v550_v10 = vpop.f32.mrb[2].mxu0 }
 0x134   : > { %v552_v16 = vpop.f32.mrb[3].mxu0 }
 0x135   : > { %684 = vmatprep.mubr.f32.mxu0 %v552_v16  ;;  %v435_v16 = vld [vmem:[#allocation5 + $0xa0] sm:$0xff] }
 0x136   : > { %685 = vmatmul.mubr.f32.vlgmr.msra.gmra.mrb[4].mxu0 %v550_v10  ;;  %v5518_v10 = vpack.c.bf16 %v438_v8, %v436_v4  ;;  %v5521_v27 = vpack.c.bf16 %v437_v20, %v435_v16  ;;  %v450_v4 = vld [vmem:[#allocation5 + $0x118] sm:$0xff]  ;;  %v447_v20 = vld [vmem:[#allocation5 + $0x100] sm:$0xff] }
 0x137   : > { %3850 = vmatpush1.bf16.msra.mxu0 %v5492_v11  ;;  %755 = vmatprep.mubr.f32.mxu0 %v412_v63  ;;  %v431_v63 = vld [vmem:[#allocation5 + $0x80] sm:$0xff]  ;;  %v5539_v38 = vpack.c.bf16 %v449_v21, %v447_v20  ;;  %v460_v20 = vld [vmem:[#allocation5 + $0x168] sm:$0xff]  ;;  %v462_v21 = vld [vmem:[#allocation5 + $0x178] sm:$0xff] }
 0x138   : > { %3852 = vmatprep.subr.bf16.mxu0 %v5494_v17  ;;  %v5515_v9 = vpack.c.bf16 %v433_v3, %v431_v63  ;;  %v445_v63 = vld [vmem:[#allocation5 + $0xf0] sm:$0xff]  ;;  %v448_v3 = vld [vmem:[#allocation5 + $0x108] sm:$0xff]  ;;  %v5554_v35 = vpack.c.bf16 %v462_v21, %v460_v20 }
 0x139   : > { %v5533_v8 = vpack.c.bf16 %v445_v63, %v443_v53  ;;  %v5536_v16 = vpack.c.bf16 %v450_v4, %v448_v3  ;;  %7001 = vst [vmem:[#allocation15_spill] sm:$0xff] %v5539_v38  ;;  %v456_v53 = vld [vmem:[#allocation5 + $0x148] sm:$0xff]  ;;  %v458_v63 = vld [vmem:[#allocation5 + $0x158] sm:$0xff]  ;;  %v5545_v3 = vpack.c.bf16 %v453_v0, %v451_v47 }
 0x13a   : > { %v5548_v4 = vpack.c.bf16 %v458_v63, %v456_v53  ;;  %7006 = vst [vmem:[#allocation20_spill] sm:$0xff] %v5554_v35  ;;  %v464_v0 = vld [vmem:[#allocation5 + $0x188] sm:$0xff]  ;;  %v466_v47 = vld [vmem:[#allocation5 + $0x198] sm:$0xff] }
 0x13b   : > { %3854 = vmatpush1.bf16.msra.mxu0 %v5497_v28  ;;  %6999 = vst [vmem:[#allocation13_spill] sm:$0xff] %v5533_v8  ;;  %7000 = vst [vmem:[#allocation14_spill] sm:$0xff] %v5536_v16  ;;  %v5560_v63 = vpack.c.bf16 %v466_v47, %v464_v0 }
 0x13c   : > { %3856 = vmatprep.subr.bf16.mxu0 %v5500_v29  ;;  %7003 = vst [vmem:[#allocation17_spill] sm:$0xff] %v5545_v3  ;;  %7004 = vst [vmem:[#allocation18_spill] sm:$0xff] %v5548_v4 }
 0x13d   : > { %7008 = vst [vmem:[#allocation22_spill] sm:$0xff] %v5560_v63 }
 0x13f   : > { %3858 = vmatpush1.bf16.msra.mxu0 %v5503_v44 }
 0x140   : > { %3860 = vmatprep.subr.bf16.mxu0 %v5506_v45 }
 0x143   : > { %3862 = vmatpush1.bf16.msra.mxu0 %v5509_v57 }
 0x144   : > { %3864 = vmatprep.subr.bf16.mxu0 %v5512_v58 }
 0x147   : > { %3866 = vmatpush1.bf16.msra.mxu0 %v5515_v9 }
 0x148   : > { %3868 = vmatprep.subr.bf16.mxu0 %v5518_v10 }
 0x14b   : > { %3870 = vmatpush1.bf16.msra.mxu0 %v5521_v27 }
 0x14c   : > { %3872 = vmatprep.subr.bf16.mxu0 %v5524_v34 }
 0x14f   : > { %3874 = vmatpush1.bf16.msra.mxu0 %v5527_v50 }
 0x150   : > { %3876 = vmatprep.subr.bf16.mxu0 %v5530_v52  ;;  %v455_v52 = vld [vmem:[#allocation5 + $0x140] sm:$0xff] }
 0x153   : > { %3878 = vmatpush1.bf16.msra.mxu0 %v5533_v8  ;;  %v457_v8 = vld [vmem:[#allocation5 + $0x150] sm:$0xff] }
 0x154   : > { %3880 = vmatprep.subr.bf16.mxu0 %v5536_v16  ;;  %v5551_v26 = vpack.c.bf16 %v457_v8, %v455_v52  ;;  %v459_v16 = vld [vmem:[#allocation5 + $0x160] sm:$0xff]  ;;  %v468_v52 = vld [vmem:[#allocation5 + $0x1a8] sm:$0xff]  ;;  %v470_v8 = vld [vmem:[#allocation5 + $0x1b8] sm:$0xff] }
 0x155   : > { %v5566_v21 = vpack.c.bf16 %v470_v8, %v468_v52 }
 0x156   : > { %7005 = vst [vmem:[#allocation19_spill] sm:$0xff] %v5551_v26 }
 0x157   : > { %3882 = vmatpush1.bf16.msra.mxu0 %v5539_v38  ;;  %v461_v38 = vld [vmem:[#allocation5 + $0x170] sm:$0xff]  ;;  %7010 = vst [vmem:[#allocation24_spill] sm:$0xff] %v5566_v21 }
 0x158   : > { %3884 = vmatprep.subr.bf16.mxu0 %v5542_v39  ;;  %v5557_v53 = vpack.c.bf16 %v461_v38, %v459_v16  ;;  %v463_v39 = vld [vmem:[#allocation5 + $0x180] sm:$0xff]  ;;  %v472_v16 = vld [vmem:[#allocation5 + $0x1c8] sm:$0xff]  ;;  %v474_v38 = vld [vmem:[#allocation5 + $0x1d8] sm:$0xff] }
 0x159   : > { %v5572_v47 = vpack.c.bf16 %v474_v38, %v472_v16  ;;  %v842_v16 = vld [vmem:[#allocation5 + $0x418] sm:$0xff]  ;;  %v841_v38 = vld [vmem:[#allocation5 + $0x410] sm:$0xff] }
 0x15a   : > { %7007 = vst [vmem:[#allocation21_spill] sm:$0xff] %v5557_v53 }
 0x15b   : > { %3886 = vmatpush1.bf16.msra.mxu0 %v5545_v3  ;;  %v465_v3 = vld [vmem:[#allocation5 + $0x190] sm:$0xff]  ;;  %7012 = vst [vmem:[#allocation26_spill] sm:$0xff] %v5572_v47 }
 0x15c   : > { %3888 = vmatprep.subr.bf16.mxu0 %v5548_v4  ;;  %v5563_v20 = vpack.c.bf16 %v465_v3, %v463_v39  ;;  %v467_v4 = vld [vmem:[#allocation5 + $0x1a0] sm:$0xff]  ;;  %v476_v39 = vld [vmem:[#allocation5 + $0x1e8] sm:$0xff]  ;;  %v478_v3 = vld [vmem:[#allocation5 + $0x1f8] sm:$0xff] }
 0x15d   : > { %v5578_v8 = vpack.c.bf16 %v478_v3, %v476_v39  ;;  %v844_v39 = vld [vmem:[#allocation5 + $0x428] sm:$0xff]  ;;  %v846_v3 = vld [vmem:[#allocation5 + $0x438] sm:$0xff] }
 0x15e   : > { %7009 = vst [vmem:[#allocation23_spill] sm:$0xff] %v5563_v20 }
 0x15f   : > { %3890 = vmatpush1.bf16.msra.mxu0 %v5551_v26  ;;  %v469_v26 = vld [vmem:[#allocation5 + $0x1b0] sm:$0xff]  ;;  %7014 = vst [vmem:[#allocation28_spill] sm:$0xff] %v5578_v8 }
 0x160   : > { %3892 = vmatprep.subr.bf16.mxu0 %v5554_v35  ;;  %v5569_v0 = vpack.c.bf16 %v469_v26, %v467_v4  ;;  %v471_v35 = vld [vmem:[#allocation5 + $0x1c0] sm:$0xff]  ;;  %v840_v26 = vld [vmem:[#allocation5 + $0x408] sm:$0xff] }
 0x162   : > { %7011 = vst [vmem:[#allocation25_spill] sm:$0xff] %v5569_v0 }
 0x163   : > { %3894 = vmatpush1.bf16.msra.mxu0 %v5557_v53  ;;  %v473_v53 = vld [vmem:[#allocation5 + $0x1d0] sm:$0xff] }
 0x164   : > { %3896 = vmatprep.subr.bf16.mxu0 %v5560_v63  ;;  %v5575_v52 = vpack.c.bf16 %v473_v53, %v471_v35  ;;  %v475_v63 = vld [vmem:[#allocation5 + $0x1e0] sm:$0xff]  ;;  %v5586_v35 = vpack.c.bf16 %v842_v16, %v840_v26  ;;  %v5597_v26 = vpack.c.bf16 %v846_v3, %v844_v39 }
 0x165   : > { %v839_v53 = vld [vmem:[#allocation5 + $0x400] sm:$0xff] }
 0x166   : > { %7013 = vst [vmem:[#allocation27_spill] sm:$0xff] %v5575_v52  ;;  %7016 = vst [vmem:[#allocation30_spill] sm:$0xff] %v5586_v35  ;;  %v843_v16 = vld [vmem:[#allocation5 + $0x420] sm:$0xff] }
 0x167   : > { %3898 = vmatpush1.bf16.msra.mxu0 %v5563_v20  ;;  %v477_v20 = vld [vmem:[#allocation5 + $0x1f0] sm:$0xff]  ;;  %7019 = vst [vmem:[#allocation32_spill] sm:$0xff] %v5597_v26 }
 0x168   : > { %3900 = vmatprep.subr.bf16.mxu0 %v5566_v21  ;;  %v5581_v4 = vpack.c.bf16 %v477_v20, %v475_v63  ;;  %v7017_v63 = vmov 0.0   ;;  %v3745_v20 = vld [vmem:[%s6733_s2 + $0x10] sm:$0xff]  ;;  %v852_v21 = vld [vmem:[#allocation5 + $0x468] sm:$0xff] }
 0x16a   : > { %7015 = vst [vmem:[#allocation29_spill] sm:$0xff] %v5581_v4 }
 0x16b   : > { %3902 = vmatpush1.bf16.msra.mxu0 %v5569_v0 }
 0x16c   : > { %3904 = vmatprep.subr.bf16.mxu0 %v5572_v47  ;;  %v850_v47 = vld [vmem:[#allocation5 + $0x458] sm:$0xff] }
 0x16f   : > { %3906 = vmatpush1.bf16.msra.mxu0 %v5575_v52  ;;  %v848_v52 = vld [vmem:[#allocation5 + $0x448] sm:$0xff] }
 0x170   : > { %3908 = vmatprep.subr.bf16.mxu0 %v5578_v8  ;;  %v5594_v8 = vpack.c.bf16 %v841_v38, %v839_v53  ;;  %v5604_v0 = vpack.c.bf16 %v850_v47, %v848_v52  ;;  %v847_v53 = vld [vmem:[#allocation5 + $0x440] sm:$0xff]  ;;  %v849_v38 = vld [vmem:[#allocation5 + $0x450] sm:$0xff] }
 0x171   : > { %v5607_v39 = vpack.c.bf16 %v849_v38, %v847_v53  ;;  %v860_v53 = vld [vmem:[#allocation5 + $0x4a8] sm:$0xff]  ;;  %v862_v38 = vld [vmem:[#allocation5 + $0x4b8] sm:$0xff] }
 0x172   : > { %7018 = vst [vmem:[#allocation31_spill] sm:$0xff] %v5594_v8  ;;  %7021 = vst [vmem:[#allocation34_spill] sm:$0xff] %v5604_v0 }
 0x173   : > { %3910 = vmatpush1.bf16.msra.mxu0 %v5581_v4  ;;  %v845_v4 = vld [vmem:[#allocation5 + $0x430] sm:$0xff]  ;;  %7022 = vst [vmem:[#allocation35_spill] sm:$0xff] %v5607_v39 }
 0x174   : > { %767 = vmatprep.subr.mxu0 %v5373_v1 }
 0x176   : > { %756 = vmatmul.mubr.f32.vlgmr.msra.gmra.mrb[4].mxu0 %v5490_v62  ;;  %v5601_v62 = vpack.c.bf16 %v845_v4, %v843_v16  ;;  %v856_v4 = vld [vmem:[#allocation5 + $0x488] sm:$0xff]  ;;  %v858_v16 = vld [vmem:[#allocation5 + $0x498] sm:$0xff] }
 0x177   : > { %768 = vmatpush1.msra.mxu0 %v5376_v2  ;;  %831 = vmatprep.mubr.f32.mxu0 %v7017_v63  ;;  %v5616_v52 = vpack.c.bf16 %v858_v16, %v856_v4 }
 0x178   : > { %3912 = vmatprep.subr.bf16.mxu0 %v5586_v35  ;;  %7020 = vst [vmem:[#allocation33_spill] sm:$0xff] %v5601_v62  ;;  %v854_v35 = vld [vmem:[#allocation5 + $0x478] sm:$0xff] }
 0x179   : > { %v5610_v3 = vpack.c.bf16 %v854_v35, %v852_v21  ;;  %7025 = vst [vmem:[#allocation38_spill] sm:$0xff] %v5616_v52  ;;  %v5622_v35 = vpack.c.bf16 %v862_v38, %v860_v53 }
 0x17a   : > { %3746 = vmatmul.mubr.msk.f32.vlgmr.msra.gmra.mrb[6].mxu0 %vm340_vm0, %v3745_v20  ;;  %v851_v20 = vld [vmem:[#allocation5 + $0x460] sm:$0xff] }
 0x17b   : > { %3914 = vmatpush1.bf16.msra.mxu0 %v5594_v8  ;;  %7023 = vst [vmem:[#allocation36_spill] sm:$0xff] %v5610_v3  ;;  %v853_v8 = vld [vmem:[#allocation5 + $0x470] sm:$0xff]  ;;  %7027 = vst [vmem:[#allocation40_spill] sm:$0xff] %v5622_v35 }
 0x17c   : > { %3916 = vmatprep.subr.bf16.mxu0 %v5597_v26  ;;  %v5613_v47 = vpack.c.bf16 %v853_v8, %v851_v20  ;;  %v855_v26 = vld [vmem:[#allocation5 + $0x480] sm:$0xff]  ;;  %v864_v8 = vld [vmem:[#allocation5 + $0x4c8] sm:$0xff]  ;;  %v866_v20 = vld [vmem:[#allocation5 + $0x4d8] sm:$0xff] }
 0x17d   : > { %v5628_v16 = vpack.c.bf16 %v866_v20, %v864_v8 }
 0x17e   : > { %7024 = vst [vmem:[#allocation37_spill] sm:$0xff] %v5613_v47 }
 0x17f   : > { %3918 = vmatpush1.bf16.msra.mxu0 %v5601_v62  ;;  %v857_v62 = vld [vmem:[#allocation5 + $0x490] sm:$0xff]  ;;  %7029 = vst [vmem:[#allocation42_spill] sm:$0xff] %v5628_v16 }
 0x180   : > { %3920 = vmatprep.subr.bf16.mxu0 %v5604_v0  ;;  %v5619_v21 = vpack.c.bf16 %v857_v62, %v855_v26  ;;  %v859_v0 = vld [vmem:[#allocation5 + $0x4a0] sm:$0xff]  ;;  %v868_v26 = vld [vmem:[#allocation5 + $0x4e8] sm:$0xff]  ;;  %v870_v62 = vld [vmem:[#allocation5 + $0x4f8] sm:$0xff] }
 0x181   : > { %v5634_v38 = vpack.c.bf16 %v870_v62, %v868_v26 }
 0x182   : > { %7026 = vst [vmem:[#allocation39_spill] sm:$0xff] %v5619_v21 }
 0x183   : > { %3922 = vmatpush1.bf16.msra.mxu0 %v5607_v39  ;;  %v861_v39 = vld [vmem:[#allocation5 + $0x4b0] sm:$0xff]  ;;  %7031 = vst [vmem:[#allocation44_spill] sm:$0xff] %v5634_v38 }
 0x184   : > { %3924 = vmatprep.subr.bf16.mxu0 %v5610_v3  ;;  %v5625_v4 = vpack.c.bf16 %v861_v39, %v859_v0  ;;  %v863_v3 = vld [vmem:[#allocation5 + $0x4c0] sm:$0xff]  ;;  %v872_v0 = vld [vmem:[#allocation5 + $0x508] sm:$0xff]  ;;  %v874_v39 = vld [vmem:[#allocation5 + $0x518] sm:$0xff] }
 0x185   : > { %v5640_v20 = vpack.c.bf16 %v874_v39, %v872_v0 }
 0x186   : > { %7028 = vst [vmem:[#allocation41_spill] sm:$0xff] %v5625_v4 }
 0x187   : > { %3926 = vmatpush1.bf16.msra.mxu0 %v5613_v47  ;;  %v865_v47 = vld [vmem:[#allocation5 + $0x4d0] sm:$0xff]  ;;  %7033 = vst [vmem:[#allocation46_spill] sm:$0xff] %v5640_v20 }
 0x188   : > { %3928 = vmatprep.subr.bf16.mxu0 %v5616_v52  ;;  %v5631_v53 = vpack.c.bf16 %v865_v47, %v863_v3  ;;  %v867_v52 = vld [vmem:[#allocation5 + $0x4e0] sm:$0xff]  ;;  %v876_v3 = vld [vmem:[#allocation5 + $0x528] sm:$0xff]  ;;  %v878_v47 = vld [vmem:[#allocation5 + $0x538] sm:$0xff] }
 0x189   : > { %v5646_v62 = vpack.c.bf16 %v878_v47, %v876_v3 }
 0x18a   : > { %7030 = vst [vmem:[#allocation43_spill] sm:$0xff] %v5631_v53 }
 0x18b   : > { %3930 = vmatpush1.bf16.msra.mxu0 %v5619_v21  ;;  %v869_v21 = vld [vmem:[#allocation5 + $0x4f0] sm:$0xff]  ;;  %7035 = vst [vmem:[#allocation48_spill] sm:$0xff] %v5646_v62 }
 0x18c   : > { %3932 = vmatprep.subr.bf16.mxu0 %v5622_v35  ;;  %v5637_v8 = vpack.c.bf16 %v869_v21, %v867_v52  ;;  %v871_v35 = vld [vmem:[#allocation5 + $0x500] sm:$0xff]  ;;  %v880_v52 = vld [vmem:[#allocation5 + $0x548] sm:$0xff]  ;;  %v882_v21 = vld [vmem:[#allocation5 + $0x558] sm:$0xff] }
 0x18d   : > { %v5652_v39 = vpack.c.bf16 %v882_v21, %v880_v52 }
 0x18e   : > { %7032 = vst [vmem:[#allocation45_spill] sm:$0xff] %v5637_v8 }
 0x18f   : > { %3934 = vmatpush1.bf16.msra.mxu0 %v5625_v4  ;;  %v873_v4 = vld [vmem:[#allocation5 + $0x510] sm:$0xff]  ;;  %7037 = vst [vmem:[#allocation50_spill] sm:$0xff] %v5652_v39 }
 0x190   : > { %3936 = vmatprep.subr.bf16.mxu0 %v5628_v16  ;;  %v5643_v26 = vpack.c.bf16 %v873_v4, %v871_v35  ;;  %v875_v16 = vld [vmem:[#allocation5 + $0x520] sm:$0xff]  ;;  %v884_v35 = vld [vmem:[#allocation5 + $0x568] sm:$0xff]  ;;  %v886_v4 = vld [vmem:[#allocation5 + $0x578] sm:$0xff] }
 0x191   : > { %v5658_v47 = vpack.c.bf16 %v886_v4, %v884_v35 }
 0x192   : > { %7034 = vst [vmem:[#allocation47_spill] sm:$0xff] %v5643_v26 }
 0x193   : > { %3938 = vmatpush1.bf16.msra.mxu0 %v5631_v53  ;;  %v877_v53 = vld [vmem:[#allocation5 + $0x530] sm:$0xff]  ;;  %7039 = vst [vmem:[#allocation52_spill] sm:$0xff] %v5658_v47 }
 0x194   : > { %3940 = vmatprep.subr.bf16.mxu0 %v5634_v38  ;;  %v5649_v0 = vpack.c.bf16 %v877_v53, %v875_v16  ;;  %v879_v38 = vld [vmem:[#allocation5 + $0x540] sm:$0xff]  ;;  %v888_v16 = vld [vmem:[#allocation5 + $0x588] sm:$0xff]  ;;  %v890_v53 = vld [vmem:[#allocation5 + $0x598] sm:$0xff] }
 0x195   : > { %v5664_v21 = vpack.c.bf16 %v890_v53, %v888_v16 }
 0x196   : > { %7036 = vst [vmem:[#allocation49_spill] sm:$0xff] %v5649_v0 }
 0x197   : > { %3942 = vmatpush1.bf16.msra.mxu0 %v5637_v8  ;;  %v881_v8 = vld [vmem:[#allocation5 + $0x550] sm:$0xff]  ;;  %7041 = vst [vmem:[#allocation54_spill] sm:$0xff] %v5664_v21 }
 0x198   : > { %3944 = vmatprep.subr.bf16.mxu0 %v5640_v20  ;;  %v5655_v3 = vpack.c.bf16 %v881_v8, %v879_v38  ;;  %v883_v20 = vld [vmem:[#allocation5 + $0x560] sm:$0xff]  ;;  %v892_v38 = vld [vmem:[#allocation5 + $0x5a8] sm:$0xff]  ;;  %v894_v8 = vld [vmem:[#allocation5 + $0x5b8] sm:$0xff] }
 0x199   : > { %v5670_v4 = vpack.c.bf16 %v894_v8, %v892_v38 }
 0x19a   : > { %7038 = vst [vmem:[#allocation51_spill] sm:$0xff] %v5655_v3 }
 0x19b   : > { %3946 = vmatpush1.bf16.msra.mxu0 %v5643_v26  ;;  %v885_v26 = vld [vmem:[#allocation5 + $0x570] sm:$0xff]  ;;  %7043 = vst [vmem:[#allocation56_spill] sm:$0xff] %v5670_v4 }
 0x19c   : > { %3948 = vmatprep.subr.bf16.mxu0 %v5646_v62  ;;  %v5661_v52 = vpack.c.bf16 %v885_v26, %v883_v20  ;;  %v887_v62 = vld [vmem:[#allocation5 + $0x580] sm:$0xff]  ;;  %v896_v20 = vld [vmem:[#allocation5 + $0x5c8] sm:$0xff]  ;;  %v898_v26 = vld [vmem:[#allocation5 + $0x5d8] sm:$0xff] }
 0x19d   : > { %v5676_v53 = vpack.c.bf16 %v898_v26, %v896_v20  ;;  %v1054_v26 = vld [vmem:[#allocation5 + $0x608] sm:$0xff] }
 0x19e   : > { %7040 = vst [vmem:[#allocation53_spill] sm:$0xff] %v5661_v52 }
 0x19f   : > { %3950 = vmatpush1.bf16.msra.mxu0 %v5649_v0  ;;  %v889_v0 = vld [vmem:[#allocation5 + $0x590] sm:$0xff]  ;;  %7045 = vst [vmem:[#allocation58_spill] sm:$0xff] %v5676_v53 }
 0x1a0   : > { %3952 = vmatprep.subr.bf16.mxu0 %v5652_v39  ;;  %v5667_v35 = vpack.c.bf16 %v889_v0, %v887_v62  ;;  %v891_v39 = vld [vmem:[#allocation5 + $0x5a0] sm:$0xff]  ;;  %v900_v62 = vld [vmem:[#allocation5 + $0x5e8] sm:$0xff]  ;;  %v902_v0 = vld [vmem:[#allocation5 + $0x5f8] sm:$0xff] }
 0x1a1   : > { %v5682_v8 = vpack.c.bf16 %v902_v0, %v900_v62  ;;  %v1053_v62 = vld [vmem:[#allocation5 + $0x600] sm:$0xff]  ;;  %v1055_v0 = vld [vmem:[#allocation5 + $0x610] sm:$0xff] }
 0x1a2   : > { %7042 = vst [vmem:[#allocation55_spill] sm:$0xff] %v5667_v35 }
 0x1a3   : > { %3954 = vmatpush1.bf16.msra.mxu0 %v5655_v3  ;;  %v893_v3 = vld [vmem:[#allocation5 + $0x5b0] sm:$0xff]  ;;  %7047 = vst [vmem:[#allocation60_spill] sm:$0xff] %v5682_v8 }
 0x1a4   : > { %3956 = vmatprep.subr.bf16.mxu0 %v5658_v47  ;;  %v5673_v16 = vpack.c.bf16 %v893_v3, %v891_v39  ;;  %v895_v47 = vld [vmem:[#allocation5 + $0x5c0] sm:$0xff]  ;;  %v901_v3 = vld [vmem:[#allocation5 + $0x5f0] sm:$0xff] }
 0x1a5   : > { %v899_v39 = vld [vmem:[#allocation5 + $0x5e0] sm:$0xff] }
 0x1a6   : > { %7044 = vst [vmem:[#allocation57_spill] sm:$0xff] %v5673_v16  ;;  %v5686_v20 = vpack.c.bf16 %v901_v3, %v899_v39  ;;  %v5697_v39 = vpack.c.bf16 %v1055_v0, %v1053_v62  ;;  %v1057_v3 = vld [vmem:[#allocation5 + $0x620] sm:$0xff]  ;;  %v1063_v0 = vld [vmem:[#allocation5 + $0x650] sm:$0xff] }
 0x1a7   : > { %3958 = vmatpush1.bf16.msra.mxu0 %v5661_v52  ;;  %v897_v52 = vld [vmem:[#allocation5 + $0x5d0] sm:$0xff]  ;;  %v1061_v62 = vld [vmem:[#allocation5 + $0x640] sm:$0xff] }
 0x1a8   : > { %3960 = vmatprep.subr.bf16.mxu0 %v5664_v21  ;;  %v5679_v38 = vpack.c.bf16 %v897_v52, %v895_v47  ;;  %7048 = vst [vmem:[#allocation61_spill] sm:$0xff] %v5686_v20  ;;  %7050 = vst [vmem:[#allocation63_spill] sm:$0xff] %v5697_v39  ;;  %v1280_v21 = vld [vmem:[#allocation5 + $0x868] sm:$0xff] }
 0x1aa   : > { %7046 = vst [vmem:[#allocation59_spill] sm:$0xff] %v5679_v38 }
 0x1ab   : > { %3962 = vmatpush1.bf16.msra.mxu0 %v5667_v35 }
 0x1ac   : > { %3964 = vmatprep.subr.bf16.mxu0 %v5670_v4 }
 0x1af   : > { %3966 = vmatpush1.bf16.msra.mxu0 %v5673_v16  ;;  %v1056_v16 = vld [vmem:[#allocation5 + $0x618] sm:$0xff] }
 0x1b0   : > { %3968 = vmatprep.subr.bf16.mxu0 %v5676_v53  ;;  %v5690_v4 = vpack.c.bf16 %v1056_v16, %v1054_v26  ;;  %v1060_v53 = vld [vmem:[#allocation5 + $0x638] sm:$0xff]  ;;  %v1059_v26 = vld [vmem:[#allocation5 + $0x630] sm:$0xff] }
 0x1b2   : > { %7049 = vst [vmem:[#allocation62_spill] sm:$0xff] %v5690_v4 }
 0x1b3   : > { %3970 = vmatpush1.bf16.msra.mxu0 %v5679_v38  ;;  %v1058_v38 = vld [vmem:[#allocation5 + $0x628] sm:$0xff] }
 0x1b4   : > { %3972 = vmatprep.subr.bf16.mxu0 %v5682_v8  ;;  %v5700_v16 = vpack.c.bf16 %v1060_v53, %v1058_v38  ;;  %v1066_v8 = vld [vmem:[#allocation5 + $0x668] sm:$0xff]  ;;  %v5710_v53 = vpack.c.bf16 %v1063_v0, %v1061_v62  ;;  %v1076_v0 = vld [vmem:[#allocation5 + $0x6b8] sm:$0xff] }
 0x1b5   : > { %v1074_v62 = vld [vmem:[#allocation5 + $0x6a8] sm:$0xff] }
 0x1b6   : > { %7051 = vst [vmem:[#allocation64_spill] sm:$0xff] %v5700_v16  ;;  %7054 = vst [vmem:[#allocation67_spill] sm:$0xff] %v5710_v53 }
 0x1b7   : > { %3974 = vmatpush1.bf16.msra.mxu0 %v5686_v20  ;;  %v1064_v20 = vld [vmem:[#allocation5 + $0x658] sm:$0xff] }
 0x1b8   : > { %981 = vmatprep.subr.mxu0 %v5373_v1  ;;  %v3747_v1 = vld [vmem:[%s6733_s2 + $0x18] sm:$0xff] }
 0x24d   : > { %v833_v47 = vpop.f32.mrb[6].mxu0 }
 0x24e   : > { %v835_v52 = vpop.f32.mrb[7].mxu0 }
 0x24f   : > { %967 = vmatprep.mubr.f32.mxu0 %v835_v52  ;;  %v1062_v52 = vld [vmem:[#allocation5 + $0x648] sm:$0xff] }
 0x250   : > { %968 = vmatmul.mubr.f32.vlgmr.msra.gmra.mrb[4].mxu0 %v833_v47  ;;  %v5707_v47 = vpack.c.bf16 %v1064_v20, %v1062_v52 }
 0x251   : > { %982 = vmatpush1.msra.mxu0 %v5376_v2  ;;  %1045 = vmatprep.mubr.f32.mxu0 %v7017_v63  ;;  %v5704_v2 = vpack.c.bf16 %v1059_v26, %v1057_v3  ;;  %v1070_v3 = vld [vmem:[#allocation5 + $0x688] sm:$0xff]  ;;  %v1072_v26 = vld [vmem:[#allocation5 + $0x698] sm:$0xff] }
 0x252   : > { %3976 = vmatprep.subr.bf16.mxu0 %v5690_v4  ;;  %7053 = vst [vmem:[#allocation66_spill] sm:$0xff] %v5707_v47  ;;  %v1068_v4 = vld [vmem:[#allocation5 + $0x678] sm:$0xff]  ;;  %v5719_v52 = vpack.c.bf16 %v1072_v26, %v1070_v3 }
 0x253   : > { %7052 = vst [vmem:[#allocation65_spill] sm:$0xff] %v5704_v2  ;;  %v5713_v38 = vpack.c.bf16 %v1068_v4, %v1066_v8  ;;  %v5725_v8 = vpack.c.bf16 %v1076_v0, %v1074_v62 }
 0x254   : > { %3748 = vmatmul.mubr.msk.f32.vlgmr.msra.gmra.mrb[8].mxu0 %vm340_vm0, %v3747_v1  ;;  %v1065_v1 = vld [vmem:[#allocation5 + $0x660] sm:$0xff]  ;;  %7057 = vst [vmem:[#allocation70_spill] sm:$0xff] %v5719_v52 }
 0x255   : > { %3978 = vmatpush1.bf16.msra.mxu0 %v5697_v39  ;;  %7055 = vst [vmem:[#allocation68_spill] sm:$0xff] %v5713_v38  ;;  %v1067_v39 = vld [vmem:[#allocation5 + $0x670] sm:$0xff]  ;;  %7059 = vst [vmem:[#allocation72_spill] sm:$0xff] %v5725_v8 }
 0x256   : > { %3980 = vmatprep.subr.bf16.mxu0 %v5700_v16  ;;  %v5716_v20 = vpack.c.bf16 %v1067_v39, %v1065_v1  ;;  %v1069_v16 = vld [vmem:[#allocation5 + $0x680] sm:$0xff]  ;;  %v1078_v39 = vld [vmem:[#allocation5 + $0x6c8] sm:$0xff]  ;;  %v1080_v1 = vld [vmem:[#allocation5 + $0x6d8] sm:$0xff] }
 0x257   : > { %v5731_v26 = vpack.c.bf16 %v1080_v1, %v1078_v39 }
 0x258   : > { %7056 = vst [vmem:[#allocation69_spill] sm:$0xff] %v5716_v20 }
 0x259   : > { %3982 = vmatpush1.bf16.msra.mxu0 %v5704_v2  ;;  %v1071_v2 = vld [vmem:[#allocation5 + $0x690] sm:$0xff]  ;;  %7061 = vst [vmem:[#allocation74_spill] sm:$0xff] %v5731_v26 }
 0x25a   : > { %3984 = vmatprep.subr.bf16.mxu0 %v5707_v47  ;;  %v5722_v4 = vpack.c.bf16 %v1071_v2, %v1069_v16  ;;  %v1073_v47 = vld [vmem:[#allocation5 + $0x6a0] sm:$0xff]  ;;  %v1082_v16 = vld [vmem:[#allocation5 + $0x6e8] sm:$0xff]  ;;  %v1084_v2 = vld [vmem:[#allocation5 + $0x6f8] sm:$0xff] }
 0x25b   : > { %v5737_v0 = vpack.c.bf16 %v1084_v2, %v1082_v16 }
 0x25c   : > { %7058 = vst [vmem:[#allocation71_spill] sm:$0xff] %v5722_v4 }
 0x25d   : > { %3986 = vmatpush1.bf16.msra.mxu0 %v5710_v53  ;;  %v1075_v53 = vld [vmem:[#allocation5 + $0x6b0] sm:$0xff]  ;;  %7063 = vst [vmem:[#allocation76_spill] sm:$0xff] %v5737_v0 }
 0x25e   : > { %3988 = vmatprep.subr.bf16.mxu0 %v5713_v38  ;;  %v5728_v3 = vpack.c.bf16 %v1075_v53, %v1073_v47  ;;  %v1077_v38 = vld [vmem:[#allocation5 + $0x6c0] sm:$0xff]  ;;  %v1086_v47 = vld [vmem:[#allocation5 + $0x708] sm:$0xff]  ;;  %v1088_v53 = vld [vmem:[#allocation5 + $0x718] sm:$0xff] }
 0x25f   : > { %v5743_v1 = vpack.c.bf16 %v1088_v53, %v1086_v47 }
 0x260   : > { %7060 = vst [vmem:[#allocation73_spill] sm:$0xff] %v5728_v3 }
 0x261   : > { %3990 = vmatpush1.bf16.msra.mxu0 %v5716_v20  ;;  %v1079_v20 = vld [vmem:[#allocation5 + $0x6d0] sm:$0xff]  ;;  %7065 = vst [vmem:[#allocation78_spill] sm:$0xff] %v5743_v1 }
 0x262   : > { %3992 = vmatprep.subr.bf16.mxu0 %v5719_v52  ;;  %v5734_v62 = vpack.c.bf16 %v1079_v20, %v1077_v38  ;;  %v1081_v52 = vld [vmem:[#allocation5 + $0x6e0] sm:$0xff]  ;;  %v1090_v38 = vld [vmem:[#allocation5 + $0x728] sm:$0xff]  ;;  %v1092_v20 = vld [vmem:[#allocation5 + $0x738] sm:$0xff] }
 0x263   : > { %v5749_v2 = vpack.c.bf16 %v1092_v20, %v1090_v38 }
 0x264   : > { %7062 = vst [vmem:[#allocation75_spill] sm:$0xff] %v5734_v62 }
 0x265   : > { %3994 = vmatpush1.bf16.msra.mxu0 %v5722_v4  ;;  %v1083_v4 = vld [vmem:[#allocation5 + $0x6f0] sm:$0xff]  ;;  %7067 = vst [vmem:[#allocation80_spill] sm:$0xff] %v5749_v2 }
 0x266   : > { %3996 = vmatprep.subr.bf16.mxu0 %v5725_v8  ;;  %v5740_v39 = vpack.c.bf16 %v1083_v4, %v1081_v52  ;;  %v1085_v8 = vld [vmem:[#allocation5 + $0x700] sm:$0xff]  ;;  %v1094_v52 = vld [vmem:[#allocation5 + $0x748] sm:$0xff]  ;;  %v1096_v4 = vld [vmem:[#allocation5 + $0x758] sm:$0xff] }
 0x267   : > { %v5755_v53 = vpack.c.bf16 %v1096_v4, %v1094_v52 }
 0x268   : > { %7064 = vst [vmem:[#allocation77_spill] sm:$0xff] %v5740_v39 }
 0x269   : > { %3998 = vmatpush1.bf16.msra.mxu0 %v5728_v3  ;;  %v1087_v3 = vld [vmem:[#allocation5 + $0x710] sm:$0xff]  ;;  %7069 = vst [vmem:[#allocation82_spill] sm:$0xff] %v5755_v53 }
 0x26a   : > { %4000 = vmatprep.subr.bf16.mxu0 %v5731_v26  ;;  %v5746_v16 = vpack.c.bf16 %v1087_v3, %v1085_v8  ;;  %v1089_v26 = vld [vmem:[#allocation5 + $0x720] sm:$0xff]  ;;  %v1098_v8 = vld [vmem:[#allocation5 + $0x768] sm:$0xff]  ;;  %v1100_v3 = vld [vmem:[#allocation5 + $0x778] sm:$0xff] }
 0x26b   : > { %v5761_v20 = vpack.c.bf16 %v1100_v3, %v1098_v8 }
 0x26c   : > { %7066 = vst [vmem:[#allocation79_spill] sm:$0xff] %v5746_v16 }
 0x26d   : > { %4002 = vmatpush1.bf16.msra.mxu0 %v5734_v62  ;;  %v1091_v62 = vld [vmem:[#allocation5 + $0x730] sm:$0xff]  ;;  %7071 = vst [vmem:[#allocation84_spill] sm:$0xff] %v5761_v20 }
 0x26e   : > { %4004 = vmatprep.subr.bf16.mxu0 %v5737_v0  ;;  %v5752_v47 = vpack.c.bf16 %v1091_v62, %v1089_v26  ;;  %v1093_v0 = vld [vmem:[#allocation5 + $0x740] sm:$0xff]  ;;  %v1102_v26 = vld [vmem:[#allocation5 + $0x788] sm:$0xff]  ;;  %v1104_v62 = vld [vmem:[#allocation5 + $0x798] sm:$0xff] }
 0x26f   : > { %v5767_v4 = vpack.c.bf16 %v1104_v62, %v1102_v26 }
 0x270   : > { %7068 = vst [vmem:[#allocation81_spill] sm:$0xff] %v5752_v47 }
 0x271   : > { %4006 = vmatpush1.bf16.msra.mxu0 %v5740_v39  ;;  %v1095_v39 = vld [vmem:[#allocation5 + $0x750] sm:$0xff]  ;;  %7073 = vst [vmem:[#allocation86_spill] sm:$0xff] %v5767_v4 }
 0x272   : > { %4008 = vmatprep.subr.bf16.mxu0 %v5743_v1  ;;  %v5758_v38 = vpack.c.bf16 %v1095_v39, %v1093_v0  ;;  %v1097_v1 = vld [vmem:[#allocation5 + $0x760] sm:$0xff]  ;;  %v1106_v0 = vld [vmem:[#allocation5 + $0x7a8] sm:$0xff]  ;;  %v1108_v39 = vld [vmem:[#allocation5 + $0x7b8] sm:$0xff] }
 0x273   : > { %v5773_v3 = vpack.c.bf16 %v1108_v39, %v1106_v0 }
 0x274   : > { %7070 = vst [vmem:[#allocation83_spill] sm:$0xff] %v5758_v38 }
 0x275   : > { %4010 = vmatpush1.bf16.msra.mxu0 %v5746_v16  ;;  %v1099_v16 = vld [vmem:[#allocation5 + $0x770] sm:$0xff]  ;;  %7075 = vst [vmem:[#allocation88_spill] sm:$0xff] %v5773_v3 }
 0x276   : > { %4012 = vmatprep.subr.bf16.mxu0 %v5749_v2  ;;  %v5764_v52 = vpack.c.bf16 %v1099_v16, %v1097_v1  ;;  %v1101_v2 = vld [vmem:[#allocation5 + $0x780] sm:$0xff]  ;;  %v1110_v1 = vld [vmem:[#allocation5 + $0x7c8] sm:$0xff]  ;;  %v1112_v16 = vld [vmem:[#allocation5 + $0x7d8] sm:$0xff] }
 0x277   : > { %v5779_v62 = vpack.c.bf16 %v1112_v16, %v1110_v1  ;;  %v5793_v16 = vld [vmem:[%s5360_s16 + $0x8] sm:$0xff] }
 0x278   : > { %7072 = vst [vmem:[#allocation85_spill] sm:$0xff] %v5764_v52 }
 0x279   : > { %4014 = vmatpush1.bf16.msra.mxu0 %v5752_v47  ;;  %v1103_v47 = vld [vmem:[#allocation5 + $0x790] sm:$0xff]  ;;  %7077 = vst [vmem:[#allocation90_spill] sm:$0xff] %v5779_v62 }
 0x27a   : > { %4016 = vmatprep.subr.bf16.mxu0 %v5755_v53  ;;  %v5770_v8 = vpack.c.bf16 %v1103_v47, %v1101_v2  ;;  %v1105_v53 = vld [vmem:[#allocation5 + $0x7a0] sm:$0xff]  ;;  %v1111_v2 = vld [vmem:[#allocation5 + $0x7d0] sm:$0xff]  ;;  %v1114_v47 = vld [vmem:[#allocation5 + $0x7e8] sm:$0xff] }
 0x27c   : > { %7074 = vst [vmem:[#allocation87_spill] sm:$0xff] %v5770_v8 }
 0x27d   : > { %4018 = vmatpush1.bf16.msra.mxu0 %v5758_v38  ;;  %v1107_v38 = vld [vmem:[#allocation5 + $0x7b0] sm:$0xff] }
 0x27e   : > { %4020 = vmatprep.subr.bf16.mxu0 %v5761_v20  ;;  %v5776_v26 = vpack.c.bf16 %v1107_v38, %v1105_v53  ;;  %v1116_v20 = vld [vmem:[#allocation5 + $0x7f8] sm:$0xff]  ;;  %v1113_v53 = vld [vmem:[#allocation5 + $0x7e0] sm:$0xff]  ;;  %v1115_v38 = vld [vmem:[#allocation5 + $0x7f0] sm:$0xff] }
 0x27f   : > { %v5785_v39 = vpack.c.bf16 %v1116_v20, %v1114_v47  ;;  %v5789_v1 = vpack.c.bf16 %v1115_v38, %v1113_v53  ;;  %v5799_v53 = vld [vmem:[%s5360_s16] sm:$0xff] }
 0x280   : > { %7076 = vst [vmem:[#allocation89_spill] sm:$0xff] %v5776_v26  ;;  %v3749_v38 = vld [vmem:[%s6733_s2 + $0x20] sm:$0xff] }
 0x281   : > { %4022 = vmatpush1.bf16.msra.mxu0 %v5764_v52  ;;  %v1109_v52 = vld [vmem:[#allocation5 + $0x7c0] sm:$0xff]  ;;  %7079 = vst [vmem:[#allocation92_spill] sm:$0xff] %v5785_v39  ;;  %7080 = vst [vmem:[#allocation93_spill] sm:$0xff] %v5789_v1 }
 0x282   : > { %4024 = vmatprep.subr.bf16.mxu0 %v5767_v4  ;;  %v5782_v0 = vpack.c.bf16 %v1111_v2, %v1109_v52  ;;  %v1268_v52 = vld [vmem:[#allocation5 + $0x808] sm:$0xff]  ;;  %v1270_v2 = vld [vmem:[#allocation5 + $0x818] sm:$0xff] }
 0x283   : > { %v5796_v47 = vpack.c.bf16 %v1270_v2, %v1268_v52  ;;  %v1271_v2 = vld [vmem:[#allocation5 + $0x820] sm:$0xff] }
 0x284   : > { %7078 = vst [vmem:[#allocation91_spill] sm:$0xff] %v5782_v0 }
 0x285   : > { %4026 = vmatpush1.bf16.msra.mxu0 %v5770_v8  ;;  %7081 = vst [vmem:[#allocation94_spill] sm:$0xff] %v5796_v47  ;;  %v1276_v8 = vld [vmem:[#allocation5 + $0x848] sm:$0xff] }
 0x286   : > { %4028 = vmatprep.subr.bf16.mxu0 %v5773_v3  ;;  %v1274_v3 = vld [vmem:[#allocation5 + $0x838] sm:$0xff] }
 0x289   : > { %4030 = vmatpush1.bf16.msra.mxu0 %v5776_v26  ;;  %v1269_v26 = vld [vmem:[#allocation5 + $0x810] sm:$0xff] }
 0x28a   : > { %4032 = vmatprep.subr.bf16.mxu0 %v5779_v62 }
 0x28d   : > { %4034 = vmatpush1.bf16.msra.mxu0 %v5782_v0  ;;  %v1267_v0 = vld [vmem:[#allocation5 + $0x800] sm:$0xff] }
 0x28e   : > { %4036 = vmatprep.subr.bf16.mxu0 %v5785_v39  ;;  %v1272_v39 = vld [vmem:[#allocation5 + $0x828] sm:$0xff] }
 0x28f   : > { %v5809_v52 = vpack.c.bf16 %v1274_v3, %v1272_v39 }
 0x291   : > { %4038 = vmatpush1.bf16.msra.mxu0 %v5789_v1  ;;  %v5806_v1 = vpack.c.bf16 %v1269_v26, %v1267_v0  ;;  %7083 = vst [vmem:[#allocation96_spill] sm:$0xff] %v5809_v52  ;;  %v1275_v26 = vld [vmem:[#allocation5 + $0x840] sm:$0xff]  ;;  %v1277_v0 = vld [vmem:[#allocation5 + $0x850] sm:$0xff] }
 0x292   : > { %1195 = vmatprep.subr.mxu0 %v5793_v16  ;;  %v5819_v3 = vpack.c.bf16 %v1277_v0, %v1275_v26  ;;  %v1288_v26 = vld [vmem:[#allocation5 + $0x8a8] sm:$0xff]  ;;  %v1290_v0 = vld [vmem:[#allocation5 + $0x8b8] sm:$0xff] }
 0x293   : > { %7082 = vst [vmem:[#allocation95_spill] sm:$0xff] %v5806_v1 }
 0x294   : > { %7086 = vst [vmem:[#allocation99_spill] sm:$0xff] %v5819_v3 }
 0x327   : > { %v1047_v62 = vpop.f32.mrb[8].mxu0 }
 0x328   : > { %v1049_v20 = vpop.f32.mrb[9].mxu0 }
 0x329   : > { %1181 = vmatprep.mubr.f32.mxu0 %v1049_v20  ;;  %v1273_v20 = vld [vmem:[#allocation5 + $0x830] sm:$0xff] }
 0x32a   : > { %1182 = vmatmul.mubr.f32.vlgmr.msra.gmra.mrb[4].mxu0 %v1047_v62  ;;  %v1278_v62 = vld [vmem:[#allocation5 + $0x858] sm:$0xff]  ;;  %v5813_v4 = vpack.c.bf16 %v1273_v20, %v1271_v2  ;;  %v1284_v2 = vld [vmem:[#allocation5 + $0x888] sm:$0xff] }
 0x32b   : > { %1196 = vmatpush1.msra.mxu0 %v5799_v53  ;;  %1259 = vmatprep.mubr.f32.mxu0 %v7017_v63  ;;  %v5816_v35 = vpack.c.bf16 %v1278_v62, %v1276_v8  ;;  %v1286_v20 = vld [vmem:[#allocation5 + $0x898] sm:$0xff] }
 0x32c   : > { %4040 = vmatprep.subr.bf16.mxu0 %v5796_v47  ;;  %7084 = vst [vmem:[#allocation97_spill] sm:$0xff] %v5813_v4  ;;  %v1282_v47 = vld [vmem:[#allocation5 + $0x878] sm:$0xff]  ;;  %v5828_v62 = vpack.c.bf16 %v1286_v20, %v1284_v2 }
 0x32d   : > { %7085 = vst [vmem:[#allocation98_spill] sm:$0xff] %v5816_v35  ;;  %v5822_v39 = vpack.c.bf16 %v1282_v47, %v1280_v21  ;;  %v5834_v47 = vpack.c.bf16 %v1290_v0, %v1288_v26 }
 0x32e   : > { %3750 = vmatmul.mubr.msk.f32.vlgmr.msra.gmra.mrb[10].mxu0 %vm340_vm0, %v3749_v38  ;;  %v1279_v38 = vld [vmem:[#allocation5 + $0x860] sm:$0xff]  ;;  %7089 = vst [vmem:[#allocation102_spill] sm:$0xff] %v5828_v62 }
 0x32f   : > { %4042 = vmatpush1.bf16.msra.mxu0 %v5806_v1  ;;  %7087 = vst [vmem:[#allocation100_spill] sm:$0xff] %v5822_v39  ;;  %v1281_v1 = vld [vmem:[#allocation5 + $0x870] sm:$0xff]  ;;  %7091 = vst [vmem:[#allocation104_spill] sm:$0xff] %v5834_v47 }
 0x330   : > { %4044 = vmatprep.subr.bf16.mxu0 %v5809_v52  ;;  %v5825_v8 = vpack.c.bf16 %v1281_v1, %v1279_v38  ;;  %v1283_v52 = vld [vmem:[#allocation5 + $0x880] sm:$0xff]  ;;  %v1292_v1 = vld [vmem:[#allocation5 + $0x8c8] sm:$0xff]  ;;  %v1294_v38 = vld [vmem:[#allocation5 + $0x8d8] sm:$0xff] }
 0x331   : > { %v5840_v20 = vpack.c.bf16 %v1294_v38, %v1292_v1 }
 0x332   : > { %7088 = vst [vmem:[#allocation101_spill] sm:$0xff] %v5825_v8 }
 0x333   : > { %4046 = vmatpush1.bf16.msra.mxu0 %v5813_v4  ;;  %v1285_v4 = vld [vmem:[#allocation5 + $0x890] sm:$0xff]  ;;  %7093 = vst [vmem:[#allocation106_spill] sm:$0xff] %v5840_v20 }
 0x334   : > { %4048 = vmatprep.subr.bf16.mxu0 %v5816_v35  ;;  %v5831_v21 = vpack.c.bf16 %v1285_v4, %v1283_v52  ;;  %v1287_v35 = vld [vmem:[#allocation5 + $0x8a0] sm:$0xff]  ;;  %v1296_v4 = vld [vmem:[#allocation5 + $0x8e8] sm:$0xff]  ;;  %v1298_v52 = vld [vmem:[#allocation5 + $0x8f8] sm:$0xff] }
 0x335   : > { %v5846_v0 = vpack.c.bf16 %v1298_v52, %v1296_v4 }
 0x336   : > { %7090 = vst [vmem:[#allocation103_spill] sm:$0xff] %v5831_v21 }
 0x337   : > { %4050 = vmatpush1.bf16.msra.mxu0 %v5819_v3  ;;  %v1289_v3 = vld [vmem:[#allocation5 + $0x8b0] sm:$0xff]  ;;  %7095 = vst [vmem:[#allocation108_spill] sm:$0xff] %v5846_v0 }
 0x338   : > { %4052 = vmatprep.subr.bf16.mxu0 %v5822_v39  ;;  %v5837_v2 = vpack.c.bf16 %v1289_v3, %v1287_v35  ;;  %v1291_v39 = vld [vmem:[#allocation5 + $0x8c0] sm:$0xff]  ;;  %v1300_v35 = vld [vmem:[#allocation5 + $0x908] sm:$0xff]  ;;  %v1302_v3 = vld [vmem:[#allocation5 + $0x918] sm:$0xff] }
 0x339   : > { %v5852_v38 = vpack.c.bf16 %v1302_v3, %v1300_v35 }
 0x33a   : > { %7092 = vst [vmem:[#allocation105_spill] sm:$0xff] %v5837_v2 }
 0x33b   : > { %4054 = vmatpush1.bf16.msra.mxu0 %v5825_v8  ;;  %v1293_v8 = vld [vmem:[#allocation5 + $0x8d0] sm:$0xff]  ;;  %7097 = vst [vmem:[#allocation110_spill] sm:$0xff] %v5852_v38 }
 0x33c   : > { %4056 = vmatprep.subr.bf16.mxu0 %v5828_v62  ;;  %v5843_v26 = vpack.c.bf16 %v1293_v8, %v1291_v39  ;;  %v1295_v62 = vld [vmem:[#allocation5 + $0x8e0] sm:$0xff]  ;;  %v1304_v39 = vld [vmem:[#allocation5 + $0x928] sm:$0xff]  ;;  %v1306_v8 = vld [vmem:[#allocation5 + $0x938] sm:$0xff] }
 0x33d   : > { %v5858_v52 = vpack.c.bf16 %v1306_v8, %v1304_v39 }
 0x33e   : > { %7094 = vst [vmem:[#allocation107_spill] sm:$0xff] %v5843_v26 }
 0x33f   : > { %4058 = vmatpush1.bf16.msra.mxu0 %v5831_v21  ;;  %v1297_v21 = vld [vmem:[#allocation5 + $0x8f0] sm:$0xff]  ;;  %7099 = vst [vmem:[#allocation112_spill] sm:$0xff] %v5858_v52 }
 0x340   : > { %4060 = vmatprep.subr.bf16.mxu0 %v5834_v47  ;;  %v5849_v1 = vpack.c.bf16 %v1297_v21, %v1295_v62  ;;  %v1299_v47 = vld [vmem:[#allocation5 + $0x900] sm:$0xff]  ;;  %v1308_v62 = vld [vmem:[#allocation5 + $0x948] sm:$0xff]  ;;  %v1310_v21 = vld [vmem:[#allocation5 + $0x958] sm:$0xff] }
 0x341   : > { %v5864_v3 = vpack.c.bf16 %v1310_v21, %v1308_v62 }
 0x342   : > { %7096 = vst [vmem:[#allocation109_spill] sm:$0xff] %v5849_v1 }
 0x343   : > { %4062 = vmatpush1.bf16.msra.mxu0 %v5837_v2  ;;  %v1301_v2 = vld [vmem:[#allocation5 + $0x910] sm:$0xff]  ;;  %7101 = vst [vmem:[#allocation114_spill] sm:$0xff] %v5864_v3 }
 0x344   : > { %4064 = vmatprep.subr.bf16.mxu0 %v5840_v20  ;;  %v5855_v4 = vpack.c.bf16 %v1301_v2, %v1299_v47  ;;  %v1303_v20 = vld [vmem:[#allocation5 + $0x920] sm:$0xff]  ;;  %v1312_v47 = vld [vmem:[#allocation5 + $0x968] sm:$0xff]  ;;  %v1314_v2 = vld [vmem:[#allocation5 + $0x978] sm:$0xff] }
 0x345   : > { %v5870_v8 = vpack.c.bf16 %v1314_v2, %v1312_v47 }
 0x346   : > { %7098 = vst [vmem:[#allocation111_spill] sm:$0xff] %v5855_v4 }
 0x347   : > { %4066 = vmatpush1.bf16.msra.mxu0 %v5843_v26  ;;  %v1305_v26 = vld [vmem:[#allocation5 + $0x930] sm:$0xff]  ;;  %7103 = vst [vmem:[#allocation116_spill] sm:$0xff] %v5870_v8 }
 0x348   : > { %4068 = vmatprep.subr.bf16.mxu0 %v5846_v0  ;;  %v5861_v35 = vpack.c.bf16 %v1305_v26, %v1303_v20  ;;  %v1307_v0 = vld [vmem:[#allocation5 + $0x940] sm:$0xff]  ;;  %v1316_v20 = vld [vmem:[#allocation5 + $0x988] sm:$0xff]  ;;  %v1318_v26 = vld [vmem:[#allocation5 + $0x998] sm:$0xff] }
 0x349   : > { %v5876_v21 = vpack.c.bf16 %v1318_v26, %v1316_v20 }
 0x34a   : > { %7100 = vst [vmem:[#allocation113_spill] sm:$0xff] %v5861_v35 }
 0x34b   : > { %4070 = vmatpush1.bf16.msra.mxu0 %v5849_v1  ;;  %v1309_v1 = vld [vmem:[#allocation5 + $0x950] sm:$0xff]  ;;  %7105 = vst [vmem:[#allocation118_spill] sm:$0xff] %v5876_v21 }
 0x34c   : > { %4072 = vmatprep.subr.bf16.mxu0 %v5852_v38  ;;  %v5867_v39 = vpack.c.bf16 %v1309_v1, %v1307_v0  ;;  %v1311_v38 = vld [vmem:[#allocation5 + $0x960] sm:$0xff]  ;;  %v1320_v0 = vld [vmem:[#allocation5 + $0x9a8] sm:$0xff]  ;;  %v1322_v1 = vld [vmem:[#allocation5 + $0x9b8] sm:$0xff] }
 0x34d   : > { %v5882_v2 = vpack.c.bf16 %v1322_v1, %v1320_v0 }
 0x34e   : > { %7102 = vst [vmem:[#allocation115_spill] sm:$0xff] %v5867_v39 }
 0x34f   : > { %4074 = vmatpush1.bf16.msra.mxu0 %v5855_v4  ;;  %v1313_v4 = vld [vmem:[#allocation5 + $0x970] sm:$0xff]  ;;  %7107 = vst [vmem:[#allocation120_spill] sm:$0xff] %v5882_v2 }
 0x350   : > { %4076 = vmatprep.subr.bf16.mxu0 %v5858_v52  ;;  %v5873_v62 = vpack.c.bf16 %v1313_v4, %v1311_v38  ;;  %v1315_v52 = vld [vmem:[#allocation5 + $0x980] sm:$0xff]  ;;  %v1324_v38 = vld [vmem:[#allocation5 + $0x9c8] sm:$0xff]  ;;  %v1326_v4 = vld [vmem:[#allocation5 + $0x9d8] sm:$0xff] }
 0x351   : > { %v5888_v26 = vpack.c.bf16 %v1326_v4, %v1324_v38  ;;  %v1482_v4 = vld [vmem:[#allocation5 + $0xa08] sm:$0xff] }
 0x352   : > { %7104 = vst [vmem:[#allocation117_spill] sm:$0xff] %v5873_v62 }
 0x353   : > { %4078 = vmatpush1.bf16.msra.mxu0 %v5861_v35  ;;  %v1317_v35 = vld [vmem:[#allocation5 + $0x990] sm:$0xff]  ;;  %7109 = vst [vmem:[#allocation122_spill] sm:$0xff] %v5888_v26 }
 0x354   : > { %4080 = vmatprep.subr.bf16.mxu0 %v5864_v3  ;;  %v5879_v47 = vpack.c.bf16 %v1317_v35, %v1315_v52  ;;  %v1319_v3 = vld [vmem:[#allocation5 + $0x9a0] sm:$0xff]  ;;  %v1328_v52 = vld [vmem:[#allocation5 + $0x9e8] sm:$0xff]  ;;  %v1330_v35 = vld [vmem:[#allocation5 + $0x9f8] sm:$0xff] }
 0x355   : > { %v5894_v1 = vpack.c.bf16 %v1330_v35, %v1328_v52  ;;  %v1481_v52 = vld [vmem:[#allocation5 + $0xa00] sm:$0xff]  ;;  %v1483_v35 = vld [vmem:[#allocation5 + $0xa10] sm:$0xff] }
 0x356   : > { %7106 = vst [vmem:[#allocation119_spill] sm:$0xff] %v5879_v47 }
 0x357   : > { %4082 = vmatpush1.bf16.msra.mxu0 %v5867_v39  ;;  %v1321_v39 = vld [vmem:[#allocation5 + $0x9b0] sm:$0xff]  ;;  %7111 = vst [vmem:[#allocation124_spill] sm:$0xff] %v5894_v1 }
 0x358   : > { %4084 = vmatprep.subr.bf16.mxu0 %v5870_v8  ;;  %v5885_v20 = vpack.c.bf16 %v1321_v39, %v1319_v3  ;;  %v1323_v8 = vld [vmem:[#allocation5 + $0x9c0] sm:$0xff]  ;;  %v1329_v39 = vld [vmem:[#allocation5 + $0x9f0] sm:$0xff] }
 0x359   : > { %v1327_v3 = vld [vmem:[#allocation5 + $0x9e0] sm:$0xff] }
 0x35a   : > { %7108 = vst [vmem:[#allocation121_spill] sm:$0xff] %v5885_v20  ;;  %v5898_v38 = vpack.c.bf16 %v1329_v39, %v1327_v3  ;;  %v3751_v3 = vld [vmem:[%s6733_s2 + $0x28] sm:$0xff]  ;;  %v5909_v39 = vpack.c.bf16 %v1483_v35, %v1481_v52  ;;  %v1489_v52 = vld [vmem:[#allocation5 + $0xa40] sm:$0xff]  ;;  %v1491_v35 = vld [vmem:[#allocation5 + $0xa50] sm:$0xff] }
 0x35b   : > { %4086 = vmatpush1.bf16.msra.mxu0 %v5873_v62  ;;  %v1325_v62 = vld [vmem:[#allocation5 + $0x9d0] sm:$0xff] }
 0x35c   : > { %4088 = vmatprep.subr.bf16.mxu0 %v5876_v21  ;;  %v5891_v0 = vpack.c.bf16 %v1325_v62, %v1323_v8  ;;  %7112 = vst [vmem:[#allocation125_spill] sm:$0xff] %v5898_v38  ;;  %7114 = vst [vmem:[#allocation127_spill] sm:$0xff] %v5909_v39  ;;  %v1494_v21 = vld [vmem:[#allocation5 + $0xa68] sm:$0xff] }
 0x35e   : > { %7110 = vst [vmem:[#allocation123_spill] sm:$0xff] %v5891_v0 }
 0x35f   : > { %4090 = vmatpush1.bf16.msra.mxu0 %v5879_v47 }
 0x360   : > { %4092 = vmatprep.subr.bf16.mxu0 %v5882_v2 }
 0x363   : > { %4094 = vmatpush1.bf16.msra.mxu0 %v5885_v20  ;;  %v1484_v20 = vld [vmem:[#allocation5 + $0xa18] sm:$0xff] }
 0x364   : > { %4096 = vmatprep.subr.bf16.mxu0 %v5888_v26  ;;  %v5902_v2 = vpack.c.bf16 %v1484_v20, %v1482_v4  ;;  %v1488_v26 = vld [vmem:[#allocation5 + $0xa38] sm:$0xff]  ;;  %v1485_v4 = vld [vmem:[#allocation5 + $0xa20] sm:$0xff] }
 0x366   : > { %7113 = vst [vmem:[#allocation126_spill] sm:$0xff] %v5902_v2 }
 0x367   : > { %4098 = vmatpush1.bf16.msra.mxu0 %v5891_v0  ;;  %v1486_v0 = vld [vmem:[#allocation5 + $0xa28] sm:$0xff] }
 0x368   : > { %4100 = vmatprep.subr.bf16.mxu0 %v5894_v1  ;;  %v5912_v20 = vpack.c.bf16 %v1488_v26, %v1486_v0  ;;  %v1492_v1 = vld [vmem:[#allocation5 + $0xa58] sm:$0xff]  ;;  %v5922_v26 = vpack.c.bf16 %v1491_v35, %v1489_v52  ;;  %v1502_v52 = vld [vmem:[#allocation5 + $0xaa8] sm:$0xff] }
 0x369   : > { %v1504_v35 = vld [vmem:[#allocation5 + $0xab8] sm:$0xff] }
 0x36a   : > { %7115 = vst [vmem:[#allocation128_spill] sm:$0xff] %v5912_v20  ;;  %7118 = vst [vmem:[#allocation131_spill] sm:$0xff] %v5922_v26 }
 0x36b   : > { %4102 = vmatpush1.bf16.msra.mxu0 %v5898_v38  ;;  %v1487_v38 = vld [vmem:[#allocation5 + $0xa30] sm:$0xff] }
 0x36c   : > { %1409 = vmatprep.subr.mxu0 %v5793_v16 }
 0x401   : > { %v1261_v8 = vpop.f32.mrb[10].mxu0 }
 0x402   : > { %v1263_v62 = vpop.f32.mrb[11].mxu0 }
 0x403   : > { %1395 = vmatprep.mubr.f32.mxu0 %v1263_v62  ;;  %v1490_v62 = vld [vmem:[#allocation5 + $0xa48] sm:$0xff] }
 0x404   : > { %1396 = vmatmul.mubr.f32.vlgmr.msra.gmra.mrb[4].mxu0 %v1261_v8  ;;  %v5916_v8 = vpack.c.bf16 %v1487_v38, %v1485_v4  ;;  %v5919_v47 = vpack.c.bf16 %v1492_v1, %v1490_v62  ;;  %v1498_v38 = vld [vmem:[#allocation5 + $0xa88] sm:$0xff]  ;;  %v1500_v4 = vld [vmem:[#allocation5 + $0xa98] sm:$0xff] }
 0x405   : > { %1410 = vmatpush1.msra.mxu0 %v5799_v53  ;;  %1473 = vmatprep.mubr.f32.mxu0 %v7017_v63  ;;  %v5931_v62 = vpack.c.bf16 %v1500_v4, %v1498_v38 }
 0x406   : > { %4104 = vmatprep.subr.bf16.mxu0 %v5902_v2  ;;  %7116 = vst [vmem:[#allocation129_spill] sm:$0xff] %v5916_v8  ;;  %7117 = vst [vmem:[#allocation130_spill] sm:$0xff] %v5919_v47  ;;  %v1496_v2 = vld [vmem:[#allocation5 + $0xa78] sm:$0xff] }
 0x407   : > { %v5925_v0 = vpack.c.bf16 %v1496_v2, %v1494_v21  ;;  %7121 = vst [vmem:[#allocation134_spill] sm:$0xff] %v5931_v62  ;;  %v5937_v2 = vpack.c.bf16 %v1504_v35, %v1502_v52 }
 0x408   : > { %3752 = vmatmul.mubr.msk.f32.vlgmr.msra.gmra.mrb[12].mxu0 %vm340_vm0, %v3751_v3  ;;  %v1493_v3 = vld [vmem:[#allocation5 + $0xa60] sm:$0xff] }
 0x409   : > { %4106 = vmatpush1.bf16.msra.mxu0 %v5909_v39  ;;  %7119 = vst [vmem:[#allocation132_spill] sm:$0xff] %v5925_v0  ;;  %v1495_v39 = vld [vmem:[#allocation5 + $0xa70] sm:$0xff]  ;;  %7123 = vst [vmem:[#allocation136_spill] sm:$0xff] %v5937_v2 }
 0x40a   : > { %4108 = vmatprep.subr.bf16.mxu0 %v5912_v20  ;;  %v5928_v1 = vpack.c.bf16 %v1495_v39, %v1493_v3  ;;  %v1497_v20 = vld [vmem:[#allocation5 + $0xa80] sm:$0xff]  ;;  %v1506_v39 = vld [vmem:[#allocation5 + $0xac8] sm:$0xff]  ;;  %v1508_v3 = vld [vmem:[#allocation5 + $0xad8] sm:$0xff] }
 0x40b   : > { %v5943_v4 = vpack.c.bf16 %v1508_v3, %v1506_v39 }
 0x40c   : > { %7120 = vst [vmem:[#allocation133_spill] sm:$0xff] %v5928_v1 }
 0x40d   : > { %4110 = vmatpush1.bf16.msra.mxu0 %v5916_v8  ;;  %v1499_v8 = vld [vmem:[#allocation5 + $0xa90] sm:$0xff]  ;;  %7125 = vst [vmem:[#allocation138_spill] sm:$0xff] %v5943_v4 }
 0x40e   : > { %4112 = vmatprep.subr.bf16.mxu0 %v5919_v47  ;;  %v5934_v21 = vpack.c.bf16 %v1499_v8, %v1497_v20  ;;  %v1501_v47 = vld [vmem:[#allocation5 + $0xaa0] sm:$0xff]  ;;  %v1510_v20 = vld [vmem:[#allocation5 + $0xae8] sm:$0xff]  ;;  %v1512_v8 = vld [vmem:[#allocation5 + $0xaf8] sm:$0xff] }
 0x40f   : > { %v5949_v35 = vpack.c.bf16 %v1512_v8, %v1510_v20 }
 0x410   : > { %7122 = vst [vmem:[#allocation135_spill] sm:$0xff] %v5934_v21 }
 0x411   : > { %4114 = vmatpush1.bf16.msra.mxu0 %v5922_v26  ;;  %v1503_v26 = vld [vmem:[#allocation5 + $0xab0] sm:$0xff]  ;;  %7127 = vst [vmem:[#allocation140_spill] sm:$0xff] %v5949_v35 }
 0x412   : > { %4116 = vmatprep.subr.bf16.mxu0 %v5925_v0  ;;  %v5940_v38 = vpack.c.bf16 %v1503_v26, %v1501_v47  ;;  %v1505_v0 = vld [vmem:[#allocation5 + $0xac0] sm:$0xff]  ;;  %v1514_v47 = vld [vmem:[#allocation5 + $0xb08] sm:$0xff]  ;;  %v1516_v26 = vld [vmem:[#allocation5 + $0xb18] sm:$0xff] }
 0x413   : > { %v5955_v3 = vpack.c.bf16 %v1516_v26, %v1514_v47 }
 0x414   : > { %7124 = vst [vmem:[#allocation137_spill] sm:$0xff] %v5940_v38 }
 0x415   : > { %4118 = vmatpush1.bf16.msra.mxu0 %v5928_v1  ;;  %v1507_v1 = vld [vmem:[#allocation5 + $0xad0] sm:$0xff]  ;;  %7129 = vst [vmem:[#allocation142_spill] sm:$0xff] %v5955_v3 }
 0x416   : > { %4120 = vmatprep.subr.bf16.mxu0 %v5931_v62  ;;  %v5946_v52 = vpack.c.bf16 %v1507_v1, %v1505_v0  ;;  %v1509_v62 = vld [vmem:[#allocation5 + $0xae0] sm:$0xff]  ;;  %v1518_v0 = vld [vmem:[#allocation5 + $0xb28] sm:$0xff]  ;;  %v1520_v1 = vld [vmem:[#allocation5 + $0xb38] sm:$0xff] }
 0x417   : > { %v5961_v8 = vpack.c.bf16 %v1520_v1, %v1518_v0 }
 0x418   : > { %7126 = vst [vmem:[#allocation139_spill] sm:$0xff] %v5946_v52 }
 0x419   : > { %4122 = vmatpush1.bf16.msra.mxu0 %v5934_v21  ;;  %v1511_v21 = vld [vmem:[#allocation5 + $0xaf0] sm:$0xff]  ;;  %7131 = vst [vmem:[#allocation144_spill] sm:$0xff] %v5961_v8 }
 0x41a   : > { %4124 = vmatprep.subr.bf16.mxu0 %v5937_v2  ;;  %v5952_v39 = vpack.c.bf16 %v1511_v21, %v1509_v62  ;;  %v1513_v2 = vld [vmem:[#allocation5 + $0xb00] sm:$0xff]  ;;  %v1522_v62 = vld [vmem:[#allocation5 + $0xb48] sm:$0xff]  ;;  %v1524_v21 = vld [vmem:[#allocation5 + $0xb58] sm:$0xff] }
 0x41b   : > { %v5967_v26 = vpack.c.bf16 %v1524_v21, %v1522_v62 }
 0x41c   : > { %7128 = vst [vmem:[#allocation141_spill] sm:$0xff] %v5952_v39 }
 0x41d   : > { %4126 = vmatpush1.bf16.msra.mxu0 %v5940_v38  ;;  %v1515_v38 = vld [vmem:[#allocation5 + $0xb10] sm:$0xff]  ;;  %7133 = vst [vmem:[#allocation146_spill] sm:$0xff] %v5967_v26 }
 0x41e   : > { %4128 = vmatprep.subr.bf16.mxu0 %v5943_v4  ;;  %v5958_v20 = vpack.c.bf16 %v1515_v38, %v1513_v2  ;;  %v1517_v4 = vld [vmem:[#allocation5 + $0xb20] sm:$0xff]  ;;  %v1526_v2 = vld [vmem:[#allocation5 + $0xb68] sm:$0xff]  ;;  %v1528_v38 = vld [vmem:[#allocation5 + $0xb78] sm:$0xff] }
 0x41f   : > { %v5973_v1 = vpack.c.bf16 %v1528_v38, %v1526_v2 }
 0x420   : > { %7130 = vst [vmem:[#allocation143_spill] sm:$0xff] %v5958_v20 }
 0x421   : > { %4130 = vmatpush1.bf16.msra.mxu0 %v5946_v52  ;;  %v1519_v52 = vld [vmem:[#allocation5 + $0xb30] sm:$0xff]  ;;  %7135 = vst [vmem:[#allocation148_spill] sm:$0xff] %v5973_v1 }
 0x422   : > { %4132 = vmatprep.subr.bf16.mxu0 %v5949_v35  ;;  %v5964_v47 = vpack.c.bf16 %v1519_v52, %v1517_v4  ;;  %v1521_v35 = vld [vmem:[#allocation5 + $0xb40] sm:$0xff]  ;;  %v1530_v4 = vld [vmem:[#allocation5 + $0xb88] sm:$0xff]  ;;  %v1532_v52 = vld [vmem:[#allocation5 + $0xb98] sm:$0xff] }
 0x423   : > { %v5979_v21 = vpack.c.bf16 %v1532_v52, %v1530_v4 }
 0x424   : > { %7132 = vst [vmem:[#allocation145_spill] sm:$0xff] %v5964_v47 }
 0x425   : > { %4134 = vmatpush1.bf16.msra.mxu0 %v5952_v39  ;;  %v1523_v39 = vld [vmem:[#allocation5 + $0xb50] sm:$0xff]  ;;  %7137 = vst [vmem:[#allocation150_spill] sm:$0xff] %v5979_v21 }
 0x426   : > { %4136 = vmatprep.subr.bf16.mxu0 %v5955_v3  ;;  %v5970_v0 = vpack.c.bf16 %v1523_v39, %v1521_v35  ;;  %v1525_v3 = vld [vmem:[#allocation5 + $0xb60] sm:$0xff]  ;;  %v1534_v35 = vld [vmem:[#allocation5 + $0xba8] sm:$0xff]  ;;  %v1536_v39 = vld [vmem:[#allocation5 + $0xbb8] sm:$0xff] }
 0x427   : > { %v5985_v38 = vpack.c.bf16 %v1536_v39, %v1534_v35 }
 0x428   : > { %7134 = vst [vmem:[#allocation147_spill] sm:$0xff] %v5970_v0 }
 0x429   : > { %4138 = vmatpush1.bf16.msra.mxu0 %v5958_v20  ;;  %v1527_v20 = vld [vmem:[#allocation5 + $0xb70] sm:$0xff]  ;;  %7139 = vst [vmem:[#allocation152_spill] sm:$0xff] %v5985_v38 }
 0x42a   : > { %4140 = vmatprep.subr.bf16.mxu0 %v5961_v8  ;;  %v5976_v62 = vpack.c.bf16 %v1527_v20, %v1525_v3  ;;  %v1529_v8 = vld [vmem:[#allocation5 + $0xb80] sm:$0xff]  ;;  %v1538_v3 = vld [vmem:[#allocation5 + $0xbc8] sm:$0xff]  ;;  %v1540_v20 = vld [vmem:[#allocation5 + $0xbd8] sm:$0xff] }
 0x42b   : > { %v5991_v52 = vpack.c.bf16 %v1540_v20, %v1538_v3  ;;  %v1696_v20 = vld [vmem:[#allocation5 + $0xc08] sm:$0xff] }
 0x42c   : > { %7136 = vst [vmem:[#allocation149_spill] sm:$0xff] %v5976_v62 }
 0x42d   : > { %4142 = vmatpush1.bf16.msra.mxu0 %v5964_v47  ;;  %v1531_v47 = vld [vmem:[#allocation5 + $0xb90] sm:$0xff]  ;;  %7141 = vst [vmem:[#allocation154_spill] sm:$0xff] %v5991_v52 }
 0x42e   : > { %4144 = vmatprep.subr.bf16.mxu0 %v5967_v26  ;;  %v5982_v2 = vpack.c.bf16 %v1531_v47, %v1529_v8  ;;  %v1533_v26 = vld [vmem:[#allocation5 + $0xba0] sm:$0xff]  ;;  %v1542_v8 = vld [vmem:[#allocation5 + $0xbe8] sm:$0xff]  ;;  %v1544_v47 = vld [vmem:[#allocation5 + $0xbf8] sm:$0xff] }
 0x42f   : > { %v5997_v39 = vpack.c.bf16 %v1544_v47, %v1542_v8  ;;  %v1695_v8 = vld [vmem:[#allocation5 + $0xc00] sm:$0xff]  ;;  %v1697_v47 = vld [vmem:[#allocation5 + $0xc10] sm:$0xff] }
 0x430   : > { %7138 = vst [vmem:[#allocation151_spill] sm:$0xff] %v5982_v2 }
 0x431   : > { %4146 = vmatpush1.bf16.msra.mxu0 %v5970_v0  ;;  %v1535_v0 = vld [vmem:[#allocation5 + $0xbb0] sm:$0xff]  ;;  %7143 = vst [vmem:[#allocation156_spill] sm:$0xff] %v5997_v39 }
 0x432   : > { %4148 = vmatprep.subr.bf16.mxu0 %v5973_v1  ;;  %v5988_v4 = vpack.c.bf16 %v1535_v0, %v1533_v26  ;;  %v1537_v1 = vld [vmem:[#allocation5 + $0xbc0] sm:$0xff]  ;;  %v1543_v0 = vld [vmem:[#allocation5 + $0xbf0] sm:$0xff] }
 0x433   : > { %v1541_v26 = vld [vmem:[#allocation5 + $0xbe0] sm:$0xff] }
 0x434   : > { %7140 = vst [vmem:[#allocation153_spill] sm:$0xff] %v5988_v4  ;;  %v6001_v3 = vpack.c.bf16 %v1543_v0, %v1541_v26  ;;  %v3753_v26 = vld [vmem:[%s6733_s2 + $0x30] sm:$0xff]  ;;  %v6012_v0 = vpack.c.bf16 %v1697_v47, %v1695_v8  ;;  %v1703_v8 = vld [vmem:[#allocation5 + $0xc40] sm:$0xff] }
 0x435   : > { %4150 = vmatpush1.bf16.msra.mxu0 %v5976_v62  ;;  %v1539_v62 = vld [vmem:[#allocation5 + $0xbd0] sm:$0xff] }
 0x436   : > { %4152 = vmatprep.subr.bf16.mxu0 %v5979_v21  ;;  %v5994_v35 = vpack.c.bf16 %v1539_v62, %v1537_v1  ;;  %7144 = vst [vmem:[#allocation157_spill] sm:$0xff] %v6001_v3  ;;  %7146 = vst [vmem:[#allocation159_spill] sm:$0xff] %v6012_v0  ;;  %v1705_v47 = vld [vmem:[#allocation5 + $0xc50] sm:$0xff]  ;;  %v1708_v21 = vld [vmem:[#allocation5 + $0xc68] sm:$0xff] }
 0x438   : > { %7142 = vst [vmem:[#allocation155_spill] sm:$0xff] %v5994_v35 }
 0x439   : > { %4154 = vmatpush1.bf16.msra.mxu0 %v5982_v2 }
 0x43a   : > { %4156 = vmatprep.subr.bf16.mxu0 %v5985_v38 }
 0x43d   : > { %4158 = vmatpush1.bf16.msra.mxu0 %v5988_v4  ;;  %v1698_v4 = vld [vmem:[#allocation5 + $0xc18] sm:$0xff] }
 0x43e   : > { %4160 = vmatprep.subr.bf16.mxu0 %v5991_v52  ;;  %v6005_v38 = vpack.c.bf16 %v1698_v4, %v1696_v20  ;;  %v1702_v52 = vld [vmem:[#allocation5 + $0xc38] sm:$0xff]  ;;  %v1699_v20 = vld [vmem:[#allocation5 + $0xc20] sm:$0xff] }
 0x440   : > { %7145 = vst [vmem:[#allocation158_spill] sm:$0xff] %v6005_v38 }
 0x441   : > { %4162 = vmatpush1.bf16.msra.mxu0 %v5994_v35  ;;  %v1700_v35 = vld [vmem:[#allocation5 + $0xc28] sm:$0xff] }
 0x442   : > { %4164 = vmatprep.subr.bf16.mxu0 %v5997_v39  ;;  %v6015_v4 = vpack.c.bf16 %v1702_v52, %v1700_v35  ;;  %v1706_v39 = vld [vmem:[#allocation5 + $0xc58] sm:$0xff]  ;;  %v6025_v52 = vpack.c.bf16 %v1705_v47, %v1703_v8  ;;  %v1716_v8 = vld [vmem:[#allocation5 + $0xca8] sm:$0xff] }
 0x443   : > { %v1718_v47 = vld [vmem:[#allocation5 + $0xcb8] sm:$0xff] }
 0x444   : > { %7147 = vst [vmem:[#allocation160_spill] sm:$0xff] %v6015_v4  ;;  %7150 = vst [vmem:[#allocation163_spill] sm:$0xff] %v6025_v52 }
 0x445   : > { %4166 = vmatpush1.bf16.msra.mxu0 %v6001_v3  ;;  %v1701_v3 = vld [vmem:[#allocation5 + $0xc30] sm:$0xff] }
 0x446   : > { %1623 = vmatprep.subr.mxu0 %v5793_v16 }
 0x4db   : > { %v1475_v1 = vpop.f32.mrb[12].mxu0 }
 0x4dc   : > { %v1477_v62 = vpop.f32.mrb[13].mxu0 }
 0x4dd   : > { %1609 = vmatprep.mubr.f32.mxu0 %v1477_v62  ;;  %v1704_v62 = vld [vmem:[#allocation5 + $0xc48] sm:$0xff] }
 0x4de   : > { %1610 = vmatmul.mubr.f32.vlgmr.msra.gmra.mrb[4].mxu0 %v1475_v1  ;;  %v6019_v1 = vpack.c.bf16 %v1701_v3, %v1699_v20  ;;  %v6022_v2 = vpack.c.bf16 %v1706_v39, %v1704_v62  ;;  %v1712_v3 = vld [vmem:[#allocation5 + $0xc88] sm:$0xff]  ;;  %v1714_v20 = vld [vmem:[#allocation5 + $0xc98] sm:$0xff] }
 0x4df   : > { %1624 = vmatpush1.msra.mxu0 %v5799_v53  ;;  %1687 = vmatprep.mubr.f32.mxu0 %v7017_v63  ;;  %v6034_v62 = vpack.c.bf16 %v1714_v20, %v1712_v3 }
 0x4e0   : > { %4168 = vmatprep.subr.bf16.mxu0 %v6005_v38  ;;  %7148 = vst [vmem:[#allocation161_spill] sm:$0xff] %v6019_v1  ;;  %7149 = vst [vmem:[#allocation162_spill] sm:$0xff] %v6022_v2  ;;  %v1710_v38 = vld [vmem:[#allocation5 + $0xc78] sm:$0xff] }
 0x4e1   : > { %v6028_v35 = vpack.c.bf16 %v1710_v38, %v1708_v21  ;;  %7153 = vst [vmem:[#allocation166_spill] sm:$0xff] %v6034_v62  ;;  %v6040_v38 = vpack.c.bf16 %v1718_v47, %v1716_v8 }
 0x4e2   : > { %3754 = vmatmul.mubr.msk.f32.vlgmr.msra.gmra.mrb[14].mxu0 %vm340_vm0, %v3753_v26  ;;  %v1707_v26 = vld [vmem:[#allocation5 + $0xc60] sm:$0xff] }
 0x4e3   : > { %4170 = vmatpush1.bf16.msra.mxu0 %v6012_v0  ;;  %7151 = vst [vmem:[#allocation164_spill] sm:$0xff] %v6028_v35  ;;  %v1709_v0 = vld [vmem:[#allocation5 + $0xc70] sm:$0xff]  ;;  %7155 = vst [vmem:[#allocation168_spill] sm:$0xff] %v6040_v38 }
 0x4e4   : > { %4172 = vmatprep.subr.bf16.mxu0 %v6015_v4  ;;  %v6031_v39 = vpack.c.bf16 %v1709_v0, %v1707_v26  ;;  %v1711_v4 = vld [vmem:[#allocation5 + $0xc80] sm:$0xff]  ;;  %v1720_v0 = vld [vmem:[#allocation5 + $0xcc8] sm:$0xff]  ;;  %v1722_v26 = vld [vmem:[#allocation5 + $0xcd8] sm:$0xff] }
 0x4e5   : > { %v6046_v20 = vpack.c.bf16 %v1722_v26, %v1720_v0 }
 0x4e6   : > { %7152 = vst [vmem:[#allocation165_spill] sm:$0xff] %v6031_v39 }
 0x4e7   : > { %4174 = vmatpush1.bf16.msra.mxu0 %v6019_v1  ;;  %v1713_v1 = vld [vmem:[#allocation5 + $0xc90] sm:$0xff]  ;;  %7157 = vst [vmem:[#allocation170_spill] sm:$0xff] %v6046_v20 }
 0x4e8   : > { %4176 = vmatprep.subr.bf16.mxu0 %v6022_v2  ;;  %v6037_v21 = vpack.c.bf16 %v1713_v1, %v1711_v4  ;;  %v1715_v2 = vld [vmem:[#allocation5 + $0xca0] sm:$0xff]  ;;  %v1724_v4 = vld [vmem:[#allocation5 + $0xce8] sm:$0xff]  ;;  %v1726_v1 = vld [vmem:[#allocation5 + $0xcf8] sm:$0xff] }
 0x4e9   : > { %v6052_v47 = vpack.c.bf16 %v1726_v1, %v1724_v4 }
 0x4ea   : > { %7154 = vst [vmem:[#allocation167_spill] sm:$0xff] %v6037_v21 }
 0x4eb   : > { %4178 = vmatpush1.bf16.msra.mxu0 %v6025_v52  ;;  %v1717_v52 = vld [vmem:[#allocation5 + $0xcb0] sm:$0xff]  ;;  %7159 = vst [vmem:[#allocation172_spill] sm:$0xff] %v6052_v47 }
 0x4ec   : > { %4180 = vmatprep.subr.bf16.mxu0 %v6028_v35  ;;  %v6043_v3 = vpack.c.bf16 %v1717_v52, %v1715_v2  ;;  %v1719_v35 = vld [vmem:[#allocation5 + $0xcc0] sm:$0xff]  ;;  %v1728_v2 = vld [vmem:[#allocation5 + $0xd08] sm:$0xff]  ;;  %v1730_v52 = vld [vmem:[#allocation5 + $0xd18] sm:$0xff] }
 0x4ed   : > { %v6058_v26 = vpack.c.bf16 %v1730_v52, %v1728_v2 }
 0x4ee   : > { %7156 = vst [vmem:[#allocation169_spill] sm:$0xff] %v6043_v3 }
 0x4ef   : > { %4182 = vmatpush1.bf16.msra.mxu0 %v6031_v39  ;;  %v1721_v39 = vld [vmem:[#allocation5 + $0xcd0] sm:$0xff]  ;;  %7161 = vst [vmem:[#allocation174_spill] sm:$0xff] %v6058_v26 }
 0x4f0   : > { %4184 = vmatprep.subr.bf16.mxu0 %v6034_v62  ;;  %v6049_v8 = vpack.c.bf16 %v1721_v39, %v1719_v35  ;;  %v1723_v62 = vld [vmem:[#allocation5 + $0xce0] sm:$0xff]  ;;  %v1732_v35 = vld [vmem:[#allocation5 + $0xd28] sm:$0xff]  ;;  %v1734_v39 = vld [vmem:[#allocation5 + $0xd38] sm:$0xff] }
 0x4f1   : > { %v6064_v1 = vpack.c.bf16 %v1734_v39, %v1732_v35 }
 0x4f2   : > { %7158 = vst [vmem:[#allocation171_spill] sm:$0xff] %v6049_v8 }
 0x4f3   : > { %4186 = vmatpush1.bf16.msra.mxu0 %v6037_v21  ;;  %v1725_v21 = vld [vmem:[#allocation5 + $0xcf0] sm:$0xff]  ;;  %7163 = vst [vmem:[#allocation176_spill] sm:$0xff] %v6064_v1 }
 0x4f4   : > { %4188 = vmatprep.subr.bf16.mxu0 %v6040_v38  ;;  %v6055_v0 = vpack.c.bf16 %v1725_v21, %v1723_v62  ;;  %v1727_v38 = vld [vmem:[#allocation5 + $0xd00] sm:$0xff]  ;;  %v1736_v62 = vld [vmem:[#allocation5 + $0xd48] sm:$0xff]  ;;  %v1738_v21 = vld [vmem:[#allocation5 + $0xd58] sm:$0xff] }
 0x4f5   : > { %v6070_v52 = vpack.c.bf16 %v1738_v21, %v1736_v62 }
 0x4f6   : > { %7160 = vst [vmem:[#allocation173_spill] sm:$0xff] %v6055_v0 }
 0x4f7   : > { %4190 = vmatpush1.bf16.msra.mxu0 %v6043_v3  ;;  %v1729_v3 = vld [vmem:[#allocation5 + $0xd10] sm:$0xff]  ;;  %7165 = vst [vmem:[#allocation178_spill] sm:$0xff] %v6070_v52 }
 0x4f8   : > { %4192 = vmatprep.subr.bf16.mxu0 %v6046_v20  ;;  %v6061_v4 = vpack.c.bf16 %v1729_v3, %v1727_v38  ;;  %v1731_v20 = vld [vmem:[#allocation5 + $0xd20] sm:$0xff]  ;;  %v1740_v38 = vld [vmem:[#allocation5 + $0xd68] sm:$0xff]  ;;  %v1742_v3 = vld [vmem:[#allocation5 + $0xd78] sm:$0xff] }
 0x4f9   : > { %v6076_v39 = vpack.c.bf16 %v1742_v3, %v1740_v38 }
 0x4fa   : > { %7162 = vst [vmem:[#allocation175_spill] sm:$0xff] %v6061_v4 }
 0x4fb   : > { %4194 = vmatpush1.bf16.msra.mxu0 %v6049_v8  ;;  %v1733_v8 = vld [vmem:[#allocation5 + $0xd30] sm:$0xff]  ;;  %7167 = vst [vmem:[#allocation180_spill] sm:$0xff] %v6076_v39 }
 0x4fc   : > { %4196 = vmatprep.subr.bf16.mxu0 %v6052_v47  ;;  %v6067_v2 = vpack.c.bf16 %v1733_v8, %v1731_v20  ;;  %v1735_v47 = vld [vmem:[#allocation5 + $0xd40] sm:$0xff]  ;;  %v1744_v20 = vld [vmem:[#allocation5 + $0xd88] sm:$0xff]  ;;  %v1746_v8 = vld [vmem:[#allocation5 + $0xd98] sm:$0xff] }
 0x4fd   : > { %v6082_v21 = vpack.c.bf16 %v1746_v8, %v1744_v20 }
 0x4fe   : > { %7164 = vst [vmem:[#allocation177_spill] sm:$0xff] %v6067_v2 }
 0x4ff   : > { %4198 = vmatpush1.bf16.msra.mxu0 %v6055_v0  ;;  %v1737_v0 = vld [vmem:[#allocation5 + $0xd50] sm:$0xff] }
 0x500   : > { %4200 = vmatprep.subr.bf16.mxu0 %v6058_v26  ;;  %v6073_v35 = vpack.c.bf16 %v1737_v0, %v1735_v47  ;;  %v1739_v26 = vld [vmem:[#allocation5 + $0xd60] sm:$0xff]  ;;  %v1748_v47 = vld [vmem:[#allocation5 + $0xda8] sm:$0xff]  ;;  %v1750_v0 = vld [vmem:[#allocation5 + $0xdb8] sm:$0xff] }
 0x501   : > { %v6088_v3 = vpack.c.bf16 %v1750_v0, %v1748_v47 }
 0x502   : > { %7166 = vst [vmem:[#allocation179_spill] sm:$0xff] %v6073_v35 }
 0x503   : > { %4202 = vmatpush1.bf16.msra.mxu0 %v6061_v4  ;;  %v1741_v4 = vld [vmem:[#allocation5 + $0xd70] sm:$0xff]  ;;  %7169 = vst [vmem:[#allocation182_spill] sm:$0xff] %v6088_v3 }
 0x504   : > { %4204 = vmatprep.subr.bf16.mxu0 %v6064_v1  ;;  %v6079_v62 = vpack.c.bf16 %v1741_v4, %v1739_v26  ;;  %v1743_v1 = vld [vmem:[#allocation5 + $0xd80] sm:$0xff]  ;;  %v1752_v26 = vld [vmem:[#allocation5 + $0xdc8] sm:$0xff]  ;;  %v1754_v4 = vld [vmem:[#allocation5 + $0xdd8] sm:$0xff] }
 0x505   : > { %v6094_v8 = vpack.c.bf16 %v1754_v4, %v1752_v26  ;;  %v1910_v4 = vld [vmem:[#allocation5 + $0xe08] sm:$0xff] }
 0x506   : > { %7168 = vst [vmem:[#allocation181_spill] sm:$0xff] %v6079_v62 }
 0x507   : > { %4206 = vmatpush1.bf16.msra.mxu0 %v6067_v2  ;;  %v1745_v2 = vld [vmem:[#allocation5 + $0xd90] sm:$0xff]  ;;  %7171 = vst [vmem:[#allocation184_spill] sm:$0xff] %v6094_v8 }
 0x508   : > { %4208 = vmatprep.subr.bf16.mxu0 %v6070_v52  ;;  %v6085_v38 = vpack.c.bf16 %v1745_v2, %v1743_v1  ;;  %v1747_v52 = vld [vmem:[#allocation5 + $0xda0] sm:$0xff]  ;;  %v1756_v1 = vld [vmem:[#allocation5 + $0xde8] sm:$0xff]  ;;  %v1758_v2 = vld [vmem:[#allocation5 + $0xdf8] sm:$0xff] }
 0x509   : > { %v6100_v0 = vpack.c.bf16 %v1758_v2, %v1756_v1  ;;  %v1909_v1 = vld [vmem:[#allocation5 + $0xe00] sm:$0xff]  ;;  %v1911_v2 = vld [vmem:[#allocation5 + $0xe10] sm:$0xff] }
 0x50b   : > { %4210 = vmatpush1.bf16.msra.mxu0 %v6073_v35  ;;  %v1749_v35 = vld [vmem:[#allocation5 + $0xdb0] sm:$0xff]  ;;  %7173 = vst [vmem:[#allocation186_spill] sm:$0xff] %v6100_v0 }
 0x50c   : > { %4212 = vmatprep.subr.bf16.mxu0 %v6076_v39  ;;  %v6091_v20 = vpack.c.bf16 %v1749_v35, %v1747_v52  ;;  %v1751_v39 = vld [vmem:[#allocation5 + $0xdc0] sm:$0xff]  ;;  %v1757_v35 = vld [vmem:[#allocation5 + $0xdf0] sm:$0xff] }
 0x50d   : > { %v1755_v52 = vld [vmem:[#allocation5 + $0xde0] sm:$0xff] }
 0x50e   : > { %7170 = vst [vmem:[#allocation183_spill] sm:$0xff] %v6091_v20  ;;  %v6104_v26 = vpack.c.bf16 %v1757_v35, %v1755_v52  ;;  %v6115_v52 = vpack.c.bf16 %v1911_v2, %v1909_v1  ;;  %v1913_v35 = vld [vmem:[#allocation5 + $0xe20] sm:$0xff]  ;;  %v1919_v2 = vld [vmem:[#allocation5 + $0xe50] sm:$0xff] }
 0x50f   : > { %4214 = vmatpush1.bf16.msra.mxu0 %v6079_v62  ;;  %v1753_v62 = vld [vmem:[#allocation5 + $0xdd0] sm:$0xff]  ;;  %v1917_v1 = vld [vmem:[#allocation5 + $0xe40] sm:$0xff] }
 0x510   : > { %4216 = vmatprep.subr.bf16.mxu0 %v6082_v21  ;;  %v6097_v47 = vpack.c.bf16 %v1753_v62, %v1751_v39  ;;  %7174 = vst [vmem:[#allocation187_spill] sm:$0xff] %v6104_v26  ;;  %7176 = vst [vmem:[#allocation189_spill] sm:$0xff] %v6115_v52 }
 0x512   : > { %7172 = vst [vmem:[#allocation185_spill] sm:$0xff] %v6097_v47 }
 0x513   : > { %4218 = vmatpush1.bf16.msra.mxu0 %v6085_v38 }
 0x514   : > { %4220 = vmatprep.subr.bf16.mxu0 %v6088_v3 }
 0x517   : > { %4222 = vmatpush1.bf16.msra.mxu0 %v6091_v20  ;;  %v1912_v20 = vld [vmem:[#allocation5 + $0xe18] sm:$0xff] }
 0x518   : > { %4224 = vmatprep.subr.bf16.mxu0 %v6094_v8  ;;  %v6108_v3 = vpack.c.bf16 %v1912_v20, %v1910_v4  ;;  %v1916_v8 = vld [vmem:[#allocation5 + $0xe38] sm:$0xff]  ;;  %v1915_v4 = vld [vmem:[#allocation5 + $0xe30] sm:$0xff] }
 0x51a   : > { %7175 = vst [vmem:[#allocation188_spill] sm:$0xff] %v6108_v3 }
 0x51b   : > { %4226 = vmatpush1.bf16.msra.mxu0 %v6097_v47  ;;  %v1914_v47 = vld [vmem:[#allocation5 + $0xe28] sm:$0xff] }
 0x51c   : > { %4228 = vmatprep.subr.bf16.mxu0 %v6100_v0  ;;  %v6118_v20 = vpack.c.bf16 %v1916_v8, %v1914_v47  ;;  %v1922_v0 = vld [vmem:[#allocation5 + $0xe68] sm:$0xff]  ;;  %v6128_v8 = vpack.c.bf16 %v1919_v2, %v1917_v1  ;;  %v1932_v2 = vld [vmem:[#allocation5 + $0xeb8] sm:$0xff] }
 0x51d   : > { %v1930_v1 = vld [vmem:[#allocation5 + $0xea8] sm:$0xff] }
 0x51e   : > { %7177 = vst [vmem:[#allocation190_spill] sm:$0xff] %v6118_v20  ;;  %7180 = vst [vmem:[#allocation193_spill] sm:$0xff] %v6128_v8 }
 0x51f   : > { %4230 = vmatpush1.bf16.msra.mxu0 %v6104_v26  ;;  %v1920_v26 = vld [vmem:[#allocation5 + $0xe58] sm:$0xff] }
 0x520   : > { %1837 = vmatprep.subr.mxu0 %v5793_v16  ;;  %v3755_v16 = vld [vmem:[%s6733_s2 + $0x38] sm:$0xff] }
 0x5b5   : > { %v1689_v39 = vpop.f32.mrb[14].mxu0 }
 0x5b6   : > { %v1691_v62 = vpop.f32.mrb[15].mxu0 }
 0x5b7   : > { %1823 = vmatprep.mubr.f32.mxu0 %v1691_v62  ;;  %v1918_v62 = vld [vmem:[#allocation5 + $0xe48] sm:$0xff] }
 0x5b8   : > { %1824 = vmatmul.mubr.f32.vlgmr.msra.gmra.mrb[4].mxu0 %v1689_v39  ;;  %v6125_v39 = vpack.c.bf16 %v1920_v26, %v1918_v62 }
 0x5b9   : > { %1838 = vmatpush1.msra.mxu0 %v5799_v53  ;;  %1901 = vmatprep.mubr.f32.mxu0 %v7017_v63  ;;  %v6122_v53 = vpack.c.bf16 %v1915_v4, %v1913_v35  ;;  %v1926_v35 = vld [vmem:[#allocation5 + $0xe88] sm:$0xff]  ;;  %v1928_v4 = vld [vmem:[#allocation5 + $0xe98] sm:$0xff] }
 0x5ba   : > { %4232 = vmatprep.subr.bf16.mxu0 %v6108_v3  ;;  %7179 = vst [vmem:[#allocation192_spill] sm:$0xff] %v6125_v39  ;;  %v1924_v3 = vld [vmem:[#allocation5 + $0xe78] sm:$0xff]  ;;  %v6137_v62 = vpack.c.bf16 %v1928_v4, %v1926_v35 }
 0x5bb   : > { %7178 = vst [vmem:[#allocation191_spill] sm:$0xff] %v6122_v53  ;;  %v6131_v47 = vpack.c.bf16 %v1924_v3, %v1922_v0  ;;  %v6143_v0 = vpack.c.bf16 %v1932_v2, %v1930_v1 }
 0x5bc   : > { %3756 = vmatmul.mubr.msk.f32.vlgmr.msra.gmra.mrb[16].mxu0 %vm340_vm0, %v3755_v16  ;;  %v1921_v16 = vld [vmem:[#allocation5 + $0xe60] sm:$0xff]  ;;  %7183 = vst [vmem:[#allocation196_spill] sm:$0xff] %v6137_v62 }
 0x5bd   : > { %4234 = vmatpush1.bf16.msra.mxu0 %v6115_v52  ;;  %7181 = vst [vmem:[#allocation194_spill] sm:$0xff] %v6131_v47  ;;  %v1923_v52 = vld [vmem:[#allocation5 + $0xe70] sm:$0xff]  ;;  %7185 = vst [vmem:[#allocation198_spill] sm:$0xff] %v6143_v0 }
 0x5be   : > { %4236 = vmatprep.subr.bf16.mxu0 %v6118_v20  ;;  %v6134_v26 = vpack.c.bf16 %v1923_v52, %v1921_v16  ;;  %v1925_v20 = vld [vmem:[#allocation5 + $0xe80] sm:$0xff]  ;;  %v1934_v52 = vld [vmem:[#allocation5 + $0xec8] sm:$0xff]  ;;  %v1936_v16 = vld [vmem:[#allocation5 + $0xed8] sm:$0xff] }
 0x5bf   : > { %v6149_v4 = vpack.c.bf16 %v1936_v16, %v1934_v52 }
 0x5c0   : > { %7182 = vst [vmem:[#allocation195_spill] sm:$0xff] %v6134_v26 }
 0x5c1   : > { %4238 = vmatpush1.bf16.msra.mxu0 %v6122_v53  ;;  %v1927_v53 = vld [vmem:[#allocation5 + $0xe90] sm:$0xff]  ;;  %7187 = vst [vmem:[#allocation200_spill] sm:$0xff] %v6149_v4 }
 0x5c2   : > { %4240 = vmatprep.subr.bf16.mxu0 %v6125_v39  ;;  %v6140_v3 = vpack.c.bf16 %v1927_v53, %v1925_v20  ;;  %v1929_v39 = vld [vmem:[#allocation5 + $0xea0] sm:$0xff]  ;;  %v1938_v20 = vld [vmem:[#allocation5 + $0xee8] sm:$0xff]  ;;  %v1940_v53 = vld [vmem:[#allocation5 + $0xef8] sm:$0xff] }
 0x5c3   : > { %v6155_v2 = vpack.c.bf16 %v1940_v53, %v1938_v20 }
 0x5c4   : > { %7184 = vst [vmem:[#allocation197_spill] sm:$0xff] %v6140_v3 }
 0x5c5   : > { %4242 = vmatpush1.bf16.msra.mxu0 %v6128_v8  ;;  %v1931_v8 = vld [vmem:[#allocation5 + $0xeb0] sm:$0xff]  ;;  %7189 = vst [vmem:[#allocation202_spill] sm:$0xff] %v6155_v2 }
 0x5c6   : > { %4244 = vmatprep.subr.bf16.mxu0 %v6131_v47  ;;  %v6146_v35 = vpack.c.bf16 %v1931_v8, %v1929_v39  ;;  %v1933_v47 = vld [vmem:[#allocation5 + $0xec0] sm:$0xff]  ;;  %v1942_v39 = vld [vmem:[#allocation5 + $0xf08] sm:$0xff]  ;;  %v1944_v8 = vld [vmem:[#allocation5 + $0xf18] sm:$0xff] }
 0x5c7   : > { %v6161_v16 = vpack.c.bf16 %v1944_v8, %v1942_v39 }
 0x5c8   : > { %7186 = vst [vmem:[#allocation199_spill] sm:$0xff] %v6146_v35 }
 0x5c9   : > { %4246 = vmatpush1.bf16.msra.mxu0 %v6134_v26  ;;  %v1935_v26 = vld [vmem:[#allocation5 + $0xed0] sm:$0xff]  ;;  %7191 = vst [vmem:[#allocation204_spill] sm:$0xff] %v6161_v16 }
 0x5ca   : > { %4248 = vmatprep.subr.bf16.mxu0 %v6137_v62  ;;  %v6152_v1 = vpack.c.bf16 %v1935_v26, %v1933_v47  ;;  %v1937_v62 = vld [vmem:[#allocation5 + $0xee0] sm:$0xff]  ;;  %v1946_v47 = vld [vmem:[#allocation5 + $0xf28] sm:$0xff]  ;;  %v1948_v26 = vld [vmem:[#allocation5 + $0xf38] sm:$0xff] }
 0x5cb   : > { %v6167_v53 = vpack.c.bf16 %v1948_v26, %v1946_v47 }
 0x5cc   : > { %7188 = vst [vmem:[#allocation201_spill] sm:$0xff] %v6152_v1 }
 0x5cd   : > { %4250 = vmatpush1.bf16.msra.mxu0 %v6140_v3  ;;  %v1939_v3 = vld [vmem:[#allocation5 + $0xef0] sm:$0xff]  ;;  %7193 = vst [vmem:[#allocation206_spill] sm:$0xff] %v6167_v53 }
 0x5ce   : > { %4252 = vmatprep.subr.bf16.mxu0 %v6143_v0  ;;  %v6158_v52 = vpack.c.bf16 %v1939_v3, %v1937_v62  ;;  %v1941_v0 = vld [vmem:[#allocation5 + $0xf00] sm:$0xff]  ;;  %v1950_v62 = vld [vmem:[#allocation5 + $0xf48] sm:$0xff]  ;;  %v1952_v3 = vld [vmem:[#allocation5 + $0xf58] sm:$0xff] }
 0x5cf   : > { %v6173_v8 = vpack.c.bf16 %v1952_v3, %v1950_v62 }
 0x5d0   : > { %7190 = vst [vmem:[#allocation203_spill] sm:$0xff] %v6158_v52 }
 0x5d1   : > { %4254 = vmatpush1.bf16.msra.mxu0 %v6146_v35  ;;  %v1943_v35 = vld [vmem:[#allocation5 + $0xf10] sm:$0xff]  ;;  %7195 = vst [vmem:[#allocation208_spill] sm:$0xff] %v6173_v8 }
 0x5d2   : > { %4256 = vmatprep.subr.bf16.mxu0 %v6149_v4  ;;  %v6164_v20 = vpack.c.bf16 %v1943_v35, %v1941_v0  ;;  %v1945_v4 = vld [vmem:[#allocation5 + $0xf20] sm:$0xff]  ;;  %v1954_v0 = vld [vmem:[#allocation5 + $0xf68] sm:$0xff]  ;;  %v1956_v35 = vld [vmem:[#allocation5 + $0xf78] sm:$0xff] }
 0x5d3   : > { %v6179_v26 = vpack.c.bf16 %v1956_v35, %v1954_v0 }
 0x5d4   : > { %7192 = vst [vmem:[#allocation205_spill] sm:$0xff] %v6164_v20 }
 0x5d5   : > { %4258 = vmatpush1.bf16.msra.mxu0 %v6152_v1  ;;  %v1947_v1 = vld [vmem:[#allocation5 + $0xf30] sm:$0xff]  ;;  %7197 = vst [vmem:[#allocation210_spill] sm:$0xff] %v6179_v26 }
 0x5d6   : > { %4260 = vmatprep.subr.bf16.mxu0 %v6155_v2  ;;  %v6170_v39 = vpack.c.bf16 %v1947_v1, %v1945_v4  ;;  %v1949_v2 = vld [vmem:[#allocation5 + $0xf40] sm:$0xff]  ;;  %v1958_v4 = vld [vmem:[#allocation5 + $0xf88] sm:$0xff]  ;;  %v1960_v1 = vld [vmem:[#allocation5 + $0xf98] sm:$0xff] }
 0x5d7   : > { %v6185_v3 = vpack.c.bf16 %v1960_v1, %v1958_v4 }
 0x5d8   : > { %7194 = vst [vmem:[#allocation207_spill] sm:$0xff] %v6170_v39 }
 0x5d9   : > { %4262 = vmatpush1.bf16.msra.mxu0 %v6158_v52  ;;  %v1951_v52 = vld [vmem:[#allocation5 + $0xf50] sm:$0xff]  ;;  %7199 = vst [vmem:[#allocation212_spill] sm:$0xff] %v6185_v3 }
 0x5da   : > { %4264 = vmatprep.subr.bf16.mxu0 %v6161_v16  ;;  %v6176_v47 = vpack.c.bf16 %v1951_v52, %v1949_v2  ;;  %v1953_v16 = vld [vmem:[#allocation5 + $0xf60] sm:$0xff]  ;;  %v1962_v2 = vld [vmem:[#allocation5 + $0xfa8] sm:$0xff]  ;;  %v1964_v52 = vld [vmem:[#allocation5 + $0xfb8] sm:$0xff] }
 0x5db   : > { %v6191_v35 = vpack.c.bf16 %v1964_v52, %v1962_v2 }
 0x5dc   : > { %7196 = vst [vmem:[#allocation209_spill] sm:$0xff] %v6176_v47 }
 0x5dd   : > { %4266 = vmatpush1.bf16.msra.mxu0 %v6164_v20  ;;  %v1955_v20 = vld [vmem:[#allocation5 + $0xf70] sm:$0xff]  ;;  %7201 = vst [vmem:[#allocation214_spill] sm:$0xff] %v6191_v35 }
 0x5de   : > { %4268 = vmatprep.subr.bf16.mxu0 %v6167_v53  ;;  %v6182_v62 = vpack.c.bf16 %v1955_v20, %v1953_v16  ;;  %v1957_v53 = vld [vmem:[#allocation5 + $0xf80] sm:$0xff]  ;;  %v1966_v16 = vld [vmem:[#allocation5 + $0xfc8] sm:$0xff]  ;;  %v1968_v20 = vld [vmem:[#allocation5 + $0xfd8] sm:$0xff] }
 0x5df   : > { %v6197_v1 = vpack.c.bf16 %v1968_v20, %v1966_v16  ;;  %v5032_v20 = vld [vmem:[%s5360_s16 + $0x8] sm:$0xff] }
 0x5e0   : > { %7198 = vst [vmem:[#allocation211_spill] sm:$0xff] %v6182_v62 }
 0x5e1   : > { %4270 = vmatpush1.bf16.msra.mxu0 %v6170_v39  ;;  %v1959_v39 = vld [vmem:[#allocation5 + $0xf90] sm:$0xff]  ;;  %7203 = vst [vmem:[#allocation216_spill] sm:$0xff] %v6197_v1 }
 0x5e2   : > { %4272 = vmatprep.subr.bf16.mxu0 %v6173_v8  ;;  %v6188_v0 = vpack.c.bf16 %v1959_v39, %v1957_v53  ;;  %v1961_v8 = vld [vmem:[#allocation5 + $0xfa0] sm:$0xff]  ;;  %v1967_v53 = vld [vmem:[#allocation5 + $0xfd0] sm:$0xff]  ;;  %v1970_v39 = vld [vmem:[#allocation5 + $0xfe8] sm:$0xff] }
 0x5e4   : > { %7200 = vst [vmem:[#allocation213_spill] sm:$0xff] %v6188_v0 }
 0x5e5   : > { %4274 = vmatpush1.bf16.msra.mxu0 %v6176_v47  ;;  %v1963_v47 = vld [vmem:[#allocation5 + $0xfb0] sm:$0xff] }
 0x5e6   : > { %4276 = vmatprep.subr.bf16.mxu0 %v6179_v26  ;;  %v6194_v4 = vpack.c.bf16 %v1963_v47, %v1961_v8  ;;  %v1972_v26 = vld [vmem:[#allocation5 + $0xff8] sm:$0xff]  ;;  %v1969_v8 = vld [vmem:[#allocation5 + $0xfe0] sm:$0xff]  ;;  %v1971_v47 = vld [vmem:[#allocation5 + $0xff0] sm:$0xff] }
 0x5e7   : > { %v6203_v52 = vpack.c.bf16 %v1972_v26, %v1970_v39  ;;  %v6207_v16 = vpack.c.bf16 %v1971_v47, %v1969_v8  ;;  %v2123_v26 = vld [vmem:[#allocation5 + $0x1000] sm:$0xff]  ;;  %v2125_v39 = vld [vmem:[#allocation5 + $0x1010] sm:$0xff] }
 0x5e8   : > { %7202 = vst [vmem:[#allocation215_spill] sm:$0xff] %v6194_v4  ;;  %v3757_v8 = vld [vmem:[%s6733_s2 + $0x40] sm:$0xff]  ;;  %v6218_v47 = vpack.c.bf16 %v2125_v39, %v2123_v26  ;;  %v2133_v39 = vld [vmem:[#allocation5 + $0x1050] sm:$0xff] }
 0x5e9   : > { %4278 = vmatpush1.bf16.msra.mxu0 %v6182_v62  ;;  %v1965_v62 = vld [vmem:[#allocation5 + $0xfc0] sm:$0xff]  ;;  %7205 = vst [vmem:[#allocation218_spill] sm:$0xff] %v6203_v52  ;;  %7206 = vst [vmem:[#allocation219_spill] sm:$0xff] %v6207_v16 }
 0x5ea   : > { %4280 = vmatprep.subr.bf16.mxu0 %v6185_v3  ;;  %v6200_v2 = vpack.c.bf16 %v1967_v53, %v1965_v62  ;;  %v2126_v62 = vld [vmem:[#allocation5 + $0x1018] sm:$0xff]  ;;  %7208 = vst [vmem:[#allocation221_spill] sm:$0xff] %v6218_v47  ;;  %v2131_v26 = vld [vmem:[#allocation5 + $0x1040] sm:$0xff]  ;;  %v2136_v3 = vld [vmem:[#allocation5 + $0x1068] sm:$0xff] }
 0x5ec   : > { %7204 = vst [vmem:[#allocation217_spill] sm:$0xff] %v6200_v2 }
 0x5ed   : > { %4282 = vmatpush1.bf16.msra.mxu0 %v6188_v0  ;;  %v5033_v0 = vld [vmem:[%s5360_s16] sm:$0xff] }
 0x5ee   : > { %4284 = vmatprep.subr.bf16.mxu0 %v6191_v35 }
 0x5f1   : > { %4286 = vmatpush1.bf16.msra.mxu0 %v6194_v4  ;;  %v2124_v4 = vld [vmem:[#allocation5 + $0x1008] sm:$0xff] }
 0x5f2   : > { %4288 = vmatprep.subr.bf16.mxu0 %v6197_v1  ;;  %v6211_v1 = vpack.c.bf16 %v2126_v62, %v2124_v4  ;;  %v2129_v62 = vld [vmem:[#allocation5 + $0x1030] sm:$0xff] }
 0x5f4   : > { %7207 = vst [vmem:[#allocation220_spill] sm:$0xff] %v6211_v1 }
 0x5f5   : > { %4290 = vmatpush1.bf16.msra.mxu0 %v6200_v2  ;;  %v2128_v2 = vld [vmem:[#allocation5 + $0x1028] sm:$0xff] }
 0x5f6   : > { %4292 = vmatprep.subr.bf16.mxu0 %v6203_v52  ;;  %v2130_v52 = vld [vmem:[#allocation5 + $0x1038] sm:$0xff] }
 0x5f7   : > { %v6221_v4 = vpack.c.bf16 %v2130_v52, %v2128_v2  ;;  %v6231_v2 = vpack.c.bf16 %v2133_v39, %v2131_v26  ;;  %v2144_v26 = vld [vmem:[#allocation5 + $0x10a8] sm:$0xff]  ;;  %v2146_v39 = vld [vmem:[#allocation5 + $0x10b8] sm:$0xff] }
 0x5f9   : > { %4294 = vmatpush1.bf16.msra.mxu0 %v6207_v16  ;;  %7209 = vst [vmem:[#allocation222_spill] sm:$0xff] %v6221_v4  ;;  %v2134_v16 = vld [vmem:[#allocation5 + $0x1058] sm:$0xff]  ;;  %7212 = vst [vmem:[#allocation225_spill] sm:$0xff] %v6231_v2 }
 0x5fa   : > { %2051 = vmatprep.subr.mxu0 %v5032_v20  ;;  %v2127_v20 = vld [vmem:[#allocation5 + $0x1020] sm:$0xff] }
 0x68f   : > { %v1903_v53 = vpop.f32.mrb[16].mxu0 }
 0x690   : > { %v1905_v35 = vpop.f32.mrb[17].mxu0 }
 0x691   : > { %2037 = vmatprep.mubr.f32.mxu0 %v1905_v35  ;;  %v2132_v35 = vld [vmem:[#allocation5 + $0x1048] sm:$0xff] }
 0x692   : > { %2038 = vmatmul.mubr.f32.vlgmr.msra.gmra.mrb[4].mxu0 %v1903_v53  ;;  %v6228_v53 = vpack.c.bf16 %v2134_v16, %v2132_v35 }
 0x693   : > { %2052 = vmatpush1.msra.mxu0 %v5033_v0  ;;  %2115 = vmatprep.mubr.f32.mxu0 %v7017_v63  ;;  %v6225_v0 = vpack.c.bf16 %v2129_v62, %v2127_v20  ;;  %v2140_v20 = vld [vmem:[#allocation5 + $0x1088] sm:$0xff]  ;;  %v2142_v62 = vld [vmem:[#allocation5 + $0x1098] sm:$0xff] }
 0x694   : > { %4296 = vmatprep.subr.bf16.mxu0 %v6211_v1  ;;  %7211 = vst [vmem:[#allocation224_spill] sm:$0xff] %v6228_v53  ;;  %v2138_v1 = vld [vmem:[#allocation5 + $0x1078] sm:$0xff]  ;;  %v6240_v35 = vpack.c.bf16 %v2142_v62, %v2140_v20 }
 0x695   : > { %7210 = vst [vmem:[#allocation223_spill] sm:$0xff] %v6225_v0  ;;  %v6234_v52 = vpack.c.bf16 %v2138_v1, %v2136_v3  ;;  %v6246_v1 = vpack.c.bf16 %v2146_v39, %v2144_v26 }
 0x696   : > { %3758 = vmatmul.mubr.msk.f32.vlgmr.msra.gmra.mrb[18].mxu0 %vm340_vm0, %v3757_v8  ;;  %v2135_v8 = vld [vmem:[#allocation5 + $0x1060] sm:$0xff]  ;;  %7215 = vst [vmem:[#allocation228_spill] sm:$0xff] %v6240_v35 }
 0x697   : > { %4298 = vmatpush1.bf16.msra.mxu0 %v6218_v47  ;;  %7213 = vst [vmem:[#allocation226_spill] sm:$0xff] %v6234_v52  ;;  %v2137_v47 = vld [vmem:[#allocation5 + $0x1070] sm:$0xff]  ;;  %7217 = vst [vmem:[#allocation230_spill] sm:$0xff] %v6246_v1 }
 0x698   : > { %4300 = vmatprep.subr.bf16.mxu0 %v6221_v4  ;;  %v6237_v16 = vpack.c.bf16 %v2137_v47, %v2135_v8  ;;  %v2139_v4 = vld [vmem:[#allocation5 + $0x1080] sm:$0xff]  ;;  %v2148_v47 = vld [vmem:[#allocation5 + $0x10c8] sm:$0xff]  ;;  %v2150_v8 = vld [vmem:[#allocation5 + $0x10d8] sm:$0xff] }
 0x699   : > { %v6252_v62 = vpack.c.bf16 %v2150_v8, %v2148_v47 }
 0x69a   : > { %7214 = vst [vmem:[#allocation227_spill] sm:$0xff] %v6237_v16 }
 0x69b   : > { %4302 = vmatpush1.bf16.msra.mxu0 %v6225_v0  ;;  %v2141_v0 = vld [vmem:[#allocation5 + $0x1090] sm:$0xff]  ;;  %7219 = vst [vmem:[#allocation232_spill] sm:$0xff] %v6252_v62 }
 0x69c   : > { %4304 = vmatprep.subr.bf16.mxu0 %v6228_v53  ;;  %v6243_v3 = vpack.c.bf16 %v2141_v0, %v2139_v4  ;;  %v2143_v53 = vld [vmem:[#allocation5 + $0x10a0] sm:$0xff]  ;;  %v2152_v4 = vld [vmem:[#allocation5 + $0x10e8] sm:$0xff]  ;;  %v2154_v0 = vld [vmem:[#allocation5 + $0x10f8] sm:$0xff] }
 0x69d   : > { %v6258_v39 = vpack.c.bf16 %v2154_v0, %v2152_v4 }
 0x69e   : > { %7216 = vst [vmem:[#allocation229_spill] sm:$0xff] %v6243_v3 }
 0x69f   : > { %4306 = vmatpush1.bf16.msra.mxu0 %v6231_v2  ;;  %v2145_v2 = vld [vmem:[#allocation5 + $0x10b0] sm:$0xff]  ;;  %7221 = vst [vmem:[#allocation234_spill] sm:$0xff] %v6258_v39 }
 0x6a0   : > { %4308 = vmatprep.subr.bf16.mxu0 %v6234_v52  ;;  %v6249_v20 = vpack.c.bf16 %v2145_v2, %v2143_v53  ;;  %v2147_v52 = vld [vmem:[#allocation5 + $0x10c0] sm:$0xff]  ;;  %v2156_v53 = vld [vmem:[#allocation5 + $0x1108] sm:$0xff]  ;;  %v2158_v2 = vld [vmem:[#allocation5 + $0x1118] sm:$0xff] }
 0x6a1   : > { %v6264_v8 = vpack.c.bf16 %v2158_v2, %v2156_v53 }
 0x6a2   : > { %7218 = vst [vmem:[#allocation231_spill] sm:$0xff] %v6249_v20 }
 0x6a3   : > { %4310 = vmatpush1.bf16.msra.mxu0 %v6237_v16  ;;  %v2149_v16 = vld [vmem:[#allocation5 + $0x10d0] sm:$0xff]  ;;  %7223 = vst [vmem:[#allocation236_spill] sm:$0xff] %v6264_v8 }
 0x6a4   : > { %4312 = vmatprep.subr.bf16.mxu0 %v6240_v35  ;;  %v6255_v26 = vpack.c.bf16 %v2149_v16, %v2147_v52  ;;  %v2151_v35 = vld [vmem:[#allocation5 + $0x10e0] sm:$0xff]  ;;  %v2160_v52 = vld [vmem:[#allocation5 + $0x1128] sm:$0xff]  ;;  %v2162_v16 = vld [vmem:[#allocation5 + $0x1138] sm:$0xff] }
 0x6a5   : > { %v6270_v0 = vpack.c.bf16 %v2162_v16, %v2160_v52 }
 0x6a6   : > { %7220 = vst [vmem:[#allocation233_spill] sm:$0xff] %v6255_v26 }
 0x6a7   : > { %4314 = vmatpush1.bf16.msra.mxu0 %v6243_v3  ;;  %v2153_v3 = vld [vmem:[#allocation5 + $0x10f0] sm:$0xff]  ;;  %7225 = vst [vmem:[#allocation238_spill] sm:$0xff] %v6270_v0 }
 0x6a8   : > { %4316 = vmatprep.subr.bf16.mxu0 %v6246_v1  ;;  %v6261_v47 = vpack.c.bf16 %v2153_v3, %v2151_v35  ;;  %v2155_v1 = vld [vmem:[#allocation5 + $0x1100] sm:$0xff]  ;;  %v2164_v35 = vld [vmem:[#allocation5 + $0x1148] sm:$0xff]  ;;  %v2166_v3 = vld [vmem:[#allocation5 + $0x1158] sm:$0xff] }
 0x6a9   : > { %v6276_v2 = vpack.c.bf16 %v2166_v3, %v2164_v35 }
 0x6aa   : > { %7222 = vst [vmem:[#allocation235_spill] sm:$0xff] %v6261_v47 }
 0x6ab   : > { %4318 = vmatpush1.bf16.msra.mxu0 %v6249_v20  ;;  %v2157_v20 = vld [vmem:[#allocation5 + $0x1110] sm:$0xff]  ;;  %7227 = vst [vmem:[#allocation240_spill] sm:$0xff] %v6276_v2 }
 0x6ac   : > { %4320 = vmatprep.subr.bf16.mxu0 %v6252_v62  ;;  %v6267_v4 = vpack.c.bf16 %v2157_v20, %v2155_v1  ;;  %v2159_v62 = vld [vmem:[#allocation5 + $0x1120] sm:$0xff]  ;;  %v2168_v1 = vld [vmem:[#allocation5 + $0x1168] sm:$0xff]  ;;  %v2170_v20 = vld [vmem:[#allocation5 + $0x1178] sm:$0xff] }
 0x6ad   : > { %v6282_v16 = vpack.c.bf16 %v2170_v20, %v2168_v1 }
 0x6ae   : > { %7224 = vst [vmem:[#allocation237_spill] sm:$0xff] %v6267_v4 }
 0x6af   : > { %4322 = vmatpush1.bf16.msra.mxu0 %v6255_v26  ;;  %v2161_v26 = vld [vmem:[#allocation5 + $0x1130] sm:$0xff]  ;;  %7229 = vst [vmem:[#allocation242_spill] sm:$0xff] %v6282_v16 }
 0x6b0   : > { %4324 = vmatprep.subr.bf16.mxu0 %v6258_v39  ;;  %v6273_v53 = vpack.c.bf16 %v2161_v26, %v2159_v62  ;;  %v2163_v39 = vld [vmem:[#allocation5 + $0x1140] sm:$0xff]  ;;  %v2172_v62 = vld [vmem:[#allocation5 + $0x1188] sm:$0xff]  ;;  %v2174_v26 = vld [vmem:[#allocation5 + $0x1198] sm:$0xff] }
 0x6b1   : > { %v6288_v3 = vpack.c.bf16 %v2174_v26, %v2172_v62 }
 0x6b2   : > { %7226 = vst [vmem:[#allocation239_spill] sm:$0xff] %v6273_v53 }
 0x6b3   : > { %4326 = vmatpush1.bf16.msra.mxu0 %v6261_v47  ;;  %v2165_v47 = vld [vmem:[#allocation5 + $0x1150] sm:$0xff] }
 0x6b4   : > { %4328 = vmatprep.subr.bf16.mxu0 %v6264_v8  ;;  %v6279_v52 = vpack.c.bf16 %v2165_v47, %v2163_v39  ;;  %v2167_v8 = vld [vmem:[#allocation5 + $0x1160] sm:$0xff]  ;;  %v2176_v39 = vld [vmem:[#allocation5 + $0x11a8] sm:$0xff]  ;;  %v2178_v47 = vld [vmem:[#allocation5 + $0x11b8] sm:$0xff] }
 0x6b5   : > { %v6294_v20 = vpack.c.bf16 %v2178_v47, %v2176_v39 }
 0x6b6   : > { %7228 = vst [vmem:[#allocation241_spill] sm:$0xff] %v6279_v52 }
 0x6b7   : > { %4330 = vmatpush1.bf16.msra.mxu0 %v6267_v4  ;;  %v2169_v4 = vld [vmem:[#allocation5 + $0x1170] sm:$0xff]  ;;  %7232 = vst [vmem:[#allocation245_spill] sm:$0xff] %v6294_v20 }
 0x6b8   : > { %4332 = vmatprep.subr.bf16.mxu0 %v6270_v0  ;;  %v6285_v35 = vpack.c.bf16 %v2169_v4, %v2167_v8  ;;  %v2171_v0 = vld [vmem:[#allocation5 + $0x1180] sm:$0xff]  ;;  %v2180_v8 = vld [vmem:[#allocation5 + $0x11c8] sm:$0xff]  ;;  %v2182_v4 = vld [vmem:[#allocation5 + $0x11d8] sm:$0xff] }
 0x6b9   : > { %v6300_v26 = vpack.c.bf16 %v2182_v4, %v2180_v8  ;;  %v2260_v4 = vld [vmem:[%s6734_s3] sm:$0xff] }
 0x6ba   : > { %7230 = vst [vmem:[#allocation243_spill] sm:$0xff] %v6285_v35 }
 0x6bb   : > { %4334 = vmatpush1.bf16.msra.mxu0 %v6273_v53  ;;  %v2173_v53 = vld [vmem:[#allocation5 + $0x1190] sm:$0xff]  ;;  %7234 = vst [vmem:[#allocation247_spill] sm:$0xff] %v6300_v26 }
 0x6bc   : > { %4336 = vmatprep.subr.bf16.mxu0 %v6276_v2  ;;  %v6291_v1 = vpack.c.bf16 %v2173_v53, %v2171_v0  ;;  %v2175_v2 = vld [vmem:[#allocation5 + $0x11a0] sm:$0xff]  ;;  %v2184_v0 = vld [vmem:[#allocation5 + $0x11e8] sm:$0xff]  ;;  %v2186_v53 = vld [vmem:[#allocation5 + $0x11f8] sm:$0xff] }
 0x6bd   : > { %v6306_v47 = vpack.c.bf16 %v2186_v53, %v2184_v0 }
 0x6be   : > { %7231 = vst [vmem:[#allocation244_spill] sm:$0xff] %v6291_v1 }
 0x6bf   : > { %4338 = vmatpush1.bf16.msra.mxu0 %v6279_v52  ;;  %v2177_v52 = vld [vmem:[#allocation5 + $0x11b0] sm:$0xff]  ;;  %7236 = vst [vmem:[#allocation249_spill] sm:$0xff] %v6306_v47 }
 0x6c0   : > { %4340 = vmatprep.subr.bf16.mxu0 %v6282_v16  ;;  %v6297_v62 = vpack.c.bf16 %v2177_v52, %v2175_v2  ;;  %v2179_v16 = vld [vmem:[#allocation5 + $0x11c0] sm:$0xff]  ;;  %v2185_v52 = vld [vmem:[#allocation5 + $0x11f0] sm:$0xff] }
 0x6c1   : > { %v2183_v2 = vld [vmem:[#allocation5 + $0x11e0] sm:$0xff] }
 0x6c2   : > { %7233 = vst [vmem:[#allocation246_spill] sm:$0xff] %v6297_v62  ;;  %v6310_v8 = vpack.c.bf16 %v2185_v52, %v2183_v2 }
 0x6c3   : > { %4342 = vmatpush1.bf16.msra.mxu0 %v6285_v35  ;;  %v2181_v35 = vld [vmem:[#allocation5 + $0x11d0] sm:$0xff] }
 0x6c4   : > { %4344 = vmatprep.subr.bf16.mxu0 %v6288_v3  ;;  %v6303_v39 = vpack.c.bf16 %v2181_v35, %v2179_v16  ;;  %7237 = vst [vmem:[#allocation250_spill] sm:$0xff] %v6310_v8  ;;  %v5171_v16 = vmov 0   ;;  %v2268_v35 = vld [vmem:[%s6735_s4] sm:$0xff] }
 0x6c5   : > { %5028 = vset.pattern.permute.xlu0 %v5171_v16  ;;  %5029 = vset.pattern.permute.xlu1 %v5171_v16  ;;  %v2278_v16 = vld [vmem:[%s6736_s5] sm:$0xff] }
 0x6c6   : > { %7235 = vst [vmem:[#allocation248_spill] sm:$0xff] %v6303_v39  ;;  %2263 = vperm.xlu0 %5028, %v2260_v4  }
 0x6c7   : > { %4346 = vmatpush1.bf16.msra.mxu0 %v6291_v1 }
 0x6c8   : > { %4348 = vmatprep.subr.bf16.mxu0 %v6294_v20 }
 0x6ca   : > { %2271 = vperm.xlu0 %5028, %v2268_v35   ;;  %v7284_v35 = vld [vmem:[#allocation58_spill] sm:$0xff] }
 0x6cb   : > { %4350 = vmatpush1.bf16.msra.mxu0 %v6297_v62 }
 0x6cc   : > { %4352 = vmatprep.subr.bf16.mxu0 %v6300_v26 }
 0x6cf   : > { %4354 = vmatpush1.bf16.msra.mxu0 %v6303_v39 }
 0x6d0   : > { %4356 = vmatprep.subr.bf16.mxu0 %v6306_v47 }
 0x6d3   : > { %4358 = vmatpush1.bf16.msra.mxu0 %v6310_v8 }
 0x745   : > { %v2264_v2 = vpop.permute.xlu0 %2263 }
 0x749   : > { %v2272_v39 = vpop.permute.xlu0 %2271 }
 0x769   : > { %v2117_v0 = vpop.f32.mrb[18].mxu0 }
 0x76a   : > { %v2119_v53 = vpop.f32.mrb[19].mxu0 }
 0x76b   : > { %2251 = vmatprep.mubr.f32.mxu0 %v2119_v53  ;;  %v7286_v53 = vld [vmem:[#allocation60_spill] sm:$0xff] }
 0x76c   : > { %2252 = vmatmul.mubr.f32.vlgmr.msra.gmra.mrb[4].mxu0 %v2117_v0  ;;  %v7285_v0 = vld [vmem:[#allocation59_spill] sm:$0xff] }
 0x83f   : > { %v2253_v52 = vpop.f32.mrb[4].mxu0 }
 0x840   : > { %v2266_v8 = vmul.f32 %v2264_v2, %v2253_v52  ;;  %v2255_v47 = vpop.f32.mrb[5].mxu0 }
 0x841   : > { %v2267_v26 = vmul.f32 %v2264_v2, %v2255_v47  ;;  %v7282_v47 = vld [vmem:[#allocation56_spill] sm:$0xff]  ;;  %v7287_v2 = vld [vmem:[#allocation61_spill] sm:$0xff] }
 0x842   : > { %v2274_v62 = vadd.f32 %v2272_v39, %v2266_v8  ;;  %v7283_v8 = vld [vmem:[#allocation57_spill] sm:$0xff] }
 0x843   : > { %v2275_v20 = vadd.f32 %v2272_v39, %v2267_v26  ;;  %v7280_v26 = vld [vmem:[#allocation54_spill] sm:$0xff]  ;;  %v7281_v39 = vld [vmem:[#allocation55_spill] sm:$0xff] }
 0x844   : > { %v6321_v4 = vmax.f32 %v2274_v62, 0.0  ;;  %v7279_v62 = vld [vmem:[#allocation53_spill] sm:$0xff] }
 0x845   : > { %v6319_v1 = vmax.f32 %v2275_v20, 0.0  ;;  %v3760_v20 = vld [vmem:[%s6736_s5 + $0x8] sm:$0xff] }
 0x847   : > { %2282 = vmatprep.subr.mxu1 %v6319_v1 }
 0x848   : > { %2283 = vmatpush1.msra.mxu1 %v6321_v4 }
 0x849   : > { %3759 = vmatmul.mubr.msk.f32.vlgmr.msra.gmra.mrb[0].mxu1 %vm340_vm0, %v2278_v16  ;;  %2358 = vmatprep.subr.mxu1 %v6319_v1 }
 0x84a   : > { %2359 = vmatpush1.msra.mxu1 %v6321_v4  ;;  %2422 = vmatprep.mubr.f32.mxu1 %v7017_v63 }
 0x84b   : > { %4360 = vmatprep.subr.bf16.mxu1 %v5383_v6 }
 0x84d   : > { %3761 = vmatmul.mubr.msk.f32.vlgmr.msra.gmra.mrb[2].mxu1 %vm340_vm0, %v3760_v20  ;;  %v3764_v20 = vld [vmem:[%s6736_s5 + $0x18] sm:$0xff] }
 0x84e   : > { %4362 = vmatpush1.bf16.msra.mxu1 %v5392_v12 }
 0x84f   : > { %4364 = vmatprep.subr.bf16.mxu1 %v5395_v13 }
 0x852   : > { %4366 = vmatpush1.bf16.msra.mxu1 %v5399_v18 }
 0x853   : > { %4368 = vmatprep.subr.bf16.mxu1 %v5402_v19  ;;  %v7238_v19 = vld [vmem:[#allocation12_spill] sm:$0xff] }
 0x856   : > { %4370 = vmatpush1.bf16.msra.mxu1 %v5405_v24  ;;  %v7239_v24 = vld [vmem:[#allocation13_spill] sm:$0xff] }
 0x857   : > { %4372 = vmatprep.subr.bf16.mxu1 %v5408_v25  ;;  %v7240_v25 = vld [vmem:[#allocation14_spill] sm:$0xff] }
 0x85a   : > { %4374 = vmatpush1.bf16.msra.mxu1 %v5411_v30  ;;  %v7241_v30 = vld [vmem:[#allocation15_spill] sm:$0xff] }
 0x85b   : > { %4376 = vmatprep.subr.bf16.mxu1 %v5414_v31  ;;  %v7242_v31 = vld [vmem:[#allocation16_spill] sm:$0xff] }
 0x85e   : > { %4378 = vmatpush1.bf16.msra.mxu1 %v5417_v36  ;;  %v7243_v36 = vld [vmem:[#allocation17_spill] sm:$0xff] }
 0x85f   : > { %4380 = vmatprep.subr.bf16.mxu1 %v5420_v37  ;;  %v7244_v37 = vld [vmem:[#allocation18_spill] sm:$0xff] }
 0x862   : > { %4382 = vmatpush1.bf16.msra.mxu1 %v5423_v42  ;;  %v7245_v42 = vld [vmem:[#allocation19_spill] sm:$0xff] }
 0x863   : > { %4384 = vmatprep.subr.bf16.mxu1 %v5426_v43  ;;  %v7246_v43 = vld [vmem:[#allocation20_spill] sm:$0xff] }
 0x866   : > { %4386 = vmatpush1.bf16.msra.mxu1 %v5429_v48  ;;  %v7247_v48 = vld [vmem:[#allocation21_spill] sm:$0xff] }
 0x867   : > { %4388 = vmatprep.subr.bf16.mxu1 %v5432_v49  ;;  %v7248_v49 = vld [vmem:[#allocation22_spill] sm:$0xff] }
 0x86a   : > { %4390 = vmatpush1.bf16.msra.mxu1 %v5435_v54  ;;  %v7249_v54 = vld [vmem:[#allocation23_spill] sm:$0xff] }
 0x86b   : > { %4392 = vmatprep.subr.bf16.mxu1 %v5438_v55  ;;  %v7250_v55 = vld [vmem:[#allocation24_spill] sm:$0xff] }
 0x86e   : > { %4394 = vmatpush1.bf16.msra.mxu1 %v5441_v60  ;;  %v7251_v60 = vld [vmem:[#allocation25_spill] sm:$0xff] }
 0x86f   : > { %4396 = vmatprep.subr.bf16.mxu1 %v5444_v61  ;;  %v7252_v61 = vld [vmem:[#allocation26_spill] sm:$0xff] }
 0x872   : > { %4398 = vmatpush1.bf16.msra.mxu1 %v5447_v5  ;;  %v7253_v5 = vld [vmem:[#allocation27_spill] sm:$0xff] }
 0x873   : > { %4400 = vmatprep.subr.bf16.mxu1 %v5450_v7  ;;  %v7254_v7 = vld [vmem:[#allocation28_spill] sm:$0xff] }
 0x876   : > { %4402 = vmatpush1.bf16.msra.mxu1 %v5453_v14  ;;  %v7255_v14 = vld [vmem:[#allocation29_spill] sm:$0xff] }
 0x877   : > { %4404 = vmatprep.subr.bf16.mxu1 %v5456_v15  ;;  %v3762_v15 = vld [vmem:[%s6736_s5 + $0x10] sm:$0xff] }
 0x87a   : > { %4406 = vmatpush1.bf16.msra.mxu1 %v5459_v22  ;;  %v7256_v22 = vld [vmem:[#allocation30_spill] sm:$0xff] }
 0x87b   : > { %4408 = vmatprep.subr.bf16.mxu1 %v5462_v23  ;;  %v7257_v23 = vld [vmem:[#allocation31_spill] sm:$0xff] }
 0x87e   : > { %4410 = vmatpush1.bf16.msra.mxu1 %v5465_v32  ;;  %v7258_v32 = vld [vmem:[#allocation32_spill] sm:$0xff] }
 0x87f   : > { %4412 = vmatprep.subr.bf16.mxu1 %v5468_v33  ;;  %v7259_v33 = vld [vmem:[#allocation33_spill] sm:$0xff] }
 0x882   : > { %4414 = vmatpush1.bf16.msra.mxu1 %v5471_v40  ;;  %v7260_v40 = vld [vmem:[#allocation34_spill] sm:$0xff] }
 0x883   : > { %4416 = vmatprep.subr.bf16.mxu1 %v5474_v41  ;;  %v7261_v41 = vld [vmem:[#allocation35_spill] sm:$0xff] }
 0x886   : > { %4418 = vmatpush1.bf16.msra.mxu1 %v5477_v46  ;;  %v7262_v46 = vld [vmem:[#allocation36_spill] sm:$0xff] }
 0x887   : > { %4420 = vmatprep.subr.bf16.mxu1 %v5481_v51  ;;  %v7263_v51 = vld [vmem:[#allocation37_spill] sm:$0xff] }
 0x88a   : > { %4422 = vmatpush1.bf16.msra.mxu1 %v5483_v56  ;;  %v7264_v56 = vld [vmem:[#allocation38_spill] sm:$0xff] }
 0x88b   : > { %4424 = vmatprep.subr.bf16.mxu1 %v5487_v59  ;;  %v7265_v59 = vld [vmem:[#allocation39_spill] sm:$0xff] }
 0x91c   : > { %v2348_v6 = vpop.f32.mrb[0].mxu1 }
 0x91d   : > { %v2350_v12 = vpop.f32.mrb[1].mxu1 }
 0x920   : > { %v2424_v13 = vpop.f32.mrb[2].mxu1 }
 0x921   : > { %v2426_v18 = vpop.f32.mrb[3].mxu1 }
 0x922   : > { %2493 = vmatprep.mubr.f32.mxu1 %v2426_v18  ;;  %v7291_v18 = vld [vmem:[#allocation65_spill] sm:$0xff] }
 0x923   : > { %2494 = vmatmul.mubr.f32.vlgmr.msra.gmra.mrb[4].mxu1 %v2424_v13  ;;  %v7290_v13 = vld [vmem:[#allocation64_spill] sm:$0xff] }
 0x924   : > { %4426 = vmatpush1.bf16.msra.mxu1 %v5492_v11  ;;  %2564 = vmatprep.mubr.f32.mxu1 %v2350_v12  ;;  %v7266_v11 = vld [vmem:[#allocation40_spill] sm:$0xff]  ;;  %v7289_v12 = vld [vmem:[#allocation63_spill] sm:$0xff] }
 0x925   : > { %4428 = vmatprep.subr.bf16.mxu1 %v5494_v17  ;;  %v7267_v17 = vld [vmem:[#allocation41_spill] sm:$0xff] }
 0x928   : > { %4430 = vmatpush1.bf16.msra.mxu1 %v5497_v28  ;;  %v7268_v28 = vld [vmem:[#allocation42_spill] sm:$0xff] }
 0x929   : > { %4432 = vmatprep.subr.bf16.mxu1 %v5500_v29  ;;  %v7269_v29 = vld [vmem:[#allocation43_spill] sm:$0xff] }
 0x92c   : > { %4434 = vmatpush1.bf16.msra.mxu1 %v5503_v44  ;;  %v7270_v44 = vld [vmem:[#allocation44_spill] sm:$0xff] }
 0x92d   : > { %4436 = vmatprep.subr.bf16.mxu1 %v5506_v45  ;;  %v7271_v45 = vld [vmem:[#allocation45_spill] sm:$0xff] }
 0x930   : > { %4438 = vmatpush1.bf16.msra.mxu1 %v5509_v57  ;;  %v7272_v57 = vld [vmem:[#allocation46_spill] sm:$0xff] }
 0x931   : > { %4440 = vmatprep.subr.bf16.mxu1 %v5512_v58  ;;  %v7273_v58 = vld [vmem:[#allocation47_spill] sm:$0xff] }
 0x934   : > { %4442 = vmatpush1.bf16.msra.mxu1 %v5515_v9  ;;  %v7274_v9 = vld [vmem:[#allocation48_spill] sm:$0xff] }
 0x935   : > { %4444 = vmatprep.subr.bf16.mxu1 %v5518_v10  ;;  %v7275_v10 = vld [vmem:[#allocation49_spill] sm:$0xff] }
 0x938   : > { %4446 = vmatpush1.bf16.msra.mxu1 %v5521_v27  ;;  %v7276_v27 = vld [vmem:[#allocation50_spill] sm:$0xff] }
 0x939   : > { %4448 = vmatprep.subr.bf16.mxu1 %v5524_v34  ;;  %v7277_v34 = vld [vmem:[#allocation51_spill] sm:$0xff] }
 0x93c   : > { %4450 = vmatpush1.bf16.msra.mxu1 %v5527_v50  ;;  %v7278_v50 = vld [vmem:[#allocation52_spill] sm:$0xff] }
 0x93d   : > { %4452 = vmatprep.subr.bf16.mxu1 %v7238_v19  ;;  %v7292_v19 = vld [vmem:[#allocation66_spill] sm:$0xff] }
 0x940   : > { %4454 = vmatpush1.bf16.msra.mxu1 %v7239_v24  ;;  %v7293_v24 = vld [vmem:[#allocation67_spill] sm:$0xff] }
 0x941   : > { %4456 = vmatprep.subr.bf16.mxu1 %v7240_v25  ;;  %v7294_v25 = vld [vmem:[#allocation68_spill] sm:$0xff] }
 0x944   : > { %4458 = vmatpush1.bf16.msra.mxu1 %v7241_v30  ;;  %v7295_v30 = vld [vmem:[#allocation69_spill] sm:$0xff] }
 0x945   : > { %4460 = vmatprep.subr.bf16.mxu1 %v7242_v31  ;;  %v7296_v31 = vld [vmem:[#allocation70_spill] sm:$0xff] }
 0x948   : > { %4462 = vmatpush1.bf16.msra.mxu1 %v7243_v36  ;;  %v7297_v36 = vld [vmem:[#allocation71_spill] sm:$0xff] }
 0x949   : > { %4464 = vmatprep.subr.bf16.mxu1 %v7244_v37  ;;  %v7298_v37 = vld [vmem:[#allocation72_spill] sm:$0xff] }
 0x94c   : > { %4466 = vmatpush1.bf16.msra.mxu1 %v7245_v42  ;;  %v7299_v42 = vld [vmem:[#allocation73_spill] sm:$0xff] }
 0x94d   : > { %4468 = vmatprep.subr.bf16.mxu1 %v7246_v43  ;;  %v7300_v43 = vld [vmem:[#allocation74_spill] sm:$0xff] }
 0x950   : > { %4470 = vmatpush1.bf16.msra.mxu1 %v7247_v48  ;;  %v7301_v48 = vld [vmem:[#allocation75_spill] sm:$0xff] }
 0x951   : > { %4472 = vmatprep.subr.bf16.mxu1 %v7248_v49  ;;  %v7302_v49 = vld [vmem:[#allocation76_spill] sm:$0xff] }
 0x954   : > { %4474 = vmatpush1.bf16.msra.mxu1 %v7249_v54  ;;  %v7303_v54 = vld [vmem:[#allocation77_spill] sm:$0xff] }
 0x955   : > { %4476 = vmatprep.subr.bf16.mxu1 %v7250_v55  ;;  %v7304_v55 = vld [vmem:[#allocation78_spill] sm:$0xff] }
 0x958   : > { %4478 = vmatpush1.bf16.msra.mxu1 %v7251_v60  ;;  %v7305_v60 = vld [vmem:[#allocation79_spill] sm:$0xff] }
 0x959   : > { %4480 = vmatprep.subr.bf16.mxu1 %v7252_v61  ;;  %v7306_v61 = vld [vmem:[#allocation80_spill] sm:$0xff] }
 0x95c   : > { %4482 = vmatpush1.bf16.msra.mxu1 %v7253_v5  ;;  %v7307_v5 = vld [vmem:[#allocation81_spill] sm:$0xff] }
 0x95d   : > { %4484 = vmatprep.subr.bf16.mxu1 %v7254_v7  ;;  %v7308_v7 = vld [vmem:[#allocation82_spill] sm:$0xff] }
 0x960   : > { %4486 = vmatpush1.bf16.msra.mxu1 %v7255_v14  ;;  %v7309_v14 = vld [vmem:[#allocation83_spill] sm:$0xff] }
 0x961   : > { %2576 = vmatprep.subr.mxu1 %v6319_v1 }
 0x963   : > { %2565 = vmatmul.mubr.f32.vlgmr.msra.gmra.mrb[4].mxu1 %v2348_v6  ;;  %v7288_v6 = vld [vmem:[#allocation62_spill] sm:$0xff] }
 0x964   : > { %2577 = vmatpush1.msra.mxu1 %v6321_v4  ;;  %2640 = vmatprep.mubr.f32.mxu1 %v7017_v63 }
 0x965   : > { %4488 = vmatprep.subr.bf16.mxu1 %v7256_v22  ;;  %v7311_v22 = vld [vmem:[#allocation85_spill] sm:$0xff] }
 0x967   : > { %3763 = vmatmul.mubr.msk.f32.vlgmr.msra.gmra.mrb[6].mxu1 %vm340_vm0, %v3762_v15  ;;  %v7310_v15 = vld [vmem:[#allocation84_spill] sm:$0xff] }
 0x968   : > { %4490 = vmatpush1.bf16.msra.mxu1 %v7257_v23  ;;  %v7312_v23 = vld [vmem:[#allocation86_spill] sm:$0xff] }
 0x969   : > { %4492 = vmatprep.subr.bf16.mxu1 %v7258_v32  ;;  %v7313_v32 = vld [vmem:[#allocation87_spill] sm:$0xff] }
 0x96c   : > { %4494 = vmatpush1.bf16.msra.mxu1 %v7259_v33  ;;  %v7314_v33 = vld [vmem:[#allocation88_spill] sm:$0xff] }
 0x96d   : > { %4496 = vmatprep.subr.bf16.mxu1 %v7260_v40  ;;  %v7315_v40 = vld [vmem:[#allocation89_spill] sm:$0xff] }
 0x970   : > { %4498 = vmatpush1.bf16.msra.mxu1 %v7261_v41  ;;  %v7316_v41 = vld [vmem:[#allocation90_spill] sm:$0xff] }
 0x971   : > { %4500 = vmatprep.subr.bf16.mxu1 %v7262_v46  ;;  %v7317_v46 = vld [vmem:[#allocation91_spill] sm:$0xff] }
 0x974   : > { %4502 = vmatpush1.bf16.msra.mxu1 %v7263_v51  ;;  %v7318_v51 = vld [vmem:[#allocation92_spill] sm:$0xff] }
 0x975   : > { %4504 = vmatprep.subr.bf16.mxu1 %v7264_v56  ;;  %v7319_v56 = vld [vmem:[#allocation93_spill] sm:$0xff] }
 0x978   : > { %4506 = vmatpush1.bf16.msra.mxu1 %v7265_v59 }
 0x979   : > { %4508 = vmatprep.subr.bf16.mxu1 %v7266_v11 }
 0x97c   : > { %4510 = vmatpush1.bf16.msra.mxu1 %v7267_v17  ;;  %v3766_v17 = vld [vmem:[%s6736_s5 + $0x20] sm:$0xff] }
 0x97d   : > { %4512 = vmatprep.subr.bf16.mxu1 %v7268_v28  ;;  %v7320_v28 = vld [vmem:[#allocation94_spill] sm:$0xff] }
 0x980   : > { %4514 = vmatpush1.bf16.msra.mxu1 %v7269_v29  ;;  %v7321_v29 = vld [vmem:[#allocation95_spill] sm:$0xff] }
 0x981   : > { %4516 = vmatprep.subr.bf16.mxu1 %v7270_v44  ;;  %v7322_v44 = vld [vmem:[#allocation96_spill] sm:$0xff] }
 0x984   : > { %4518 = vmatpush1.bf16.msra.mxu1 %v7271_v45  ;;  %v7323_v45 = vld [vmem:[#allocation97_spill] sm:$0xff] }
 0x985   : > { %4520 = vmatprep.subr.bf16.mxu1 %v7272_v57  ;;  %v7324_v57 = vld [vmem:[#allocation98_spill] sm:$0xff] }
 0x988   : > { %4522 = vmatpush1.bf16.msra.mxu1 %v7273_v58  ;;  %v7325_v58 = vld [vmem:[#allocation99_spill] sm:$0xff] }
 0x989   : > { %4524 = vmatprep.subr.bf16.mxu1 %v7274_v9  ;;  %v7326_v9 = vld [vmem:[#allocation100_spill] sm:$0xff] }
 0x98c   : > { %4526 = vmatpush1.bf16.msra.mxu1 %v7275_v10  ;;  %v7327_v10 = vld [vmem:[#allocation101_spill] sm:$0xff] }
 0x98d   : > { %4528 = vmatprep.subr.bf16.mxu1 %v7276_v27  ;;  %v7328_v27 = vld [vmem:[#allocation102_spill] sm:$0xff] }
 0x990   : > { %4530 = vmatpush1.bf16.msra.mxu1 %v7277_v34  ;;  %v7329_v34 = vld [vmem:[#allocation103_spill] sm:$0xff] }
 0x991   : > { %4532 = vmatprep.subr.bf16.mxu1 %v7278_v50  ;;  %v7330_v50 = vld [vmem:[#allocation104_spill] sm:$0xff] }
 0x994   : > { %4534 = vmatpush1.bf16.msra.mxu1 %v7279_v62  ;;  %v7331_v62 = vld [vmem:[#allocation105_spill] sm:$0xff] }
 0x995   : > { %4536 = vmatprep.subr.bf16.mxu1 %v7280_v26  ;;  %v7332_v26 = vld [vmem:[#allocation106_spill] sm:$0xff] }
 0x998   : > { %4538 = vmatpush1.bf16.msra.mxu1 %v7281_v39  ;;  %v7333_v39 = vld [vmem:[#allocation107_spill] sm:$0xff] }
 0x999   : > { %4540 = vmatprep.subr.bf16.mxu1 %v7282_v47  ;;  %v7334_v47 = vld [vmem:[#allocation108_spill] sm:$0xff] }
 0x99c   : > { %4542 = vmatpush1.bf16.msra.mxu1 %v7283_v8  ;;  %v7335_v8 = vld [vmem:[#allocation109_spill] sm:$0xff] }
 0x99d   : > { %4544 = vmatprep.subr.bf16.mxu1 %v7284_v35  ;;  %v7336_v35 = vld [vmem:[#allocation110_spill] sm:$0xff] }
 0x9a0   : > { %4546 = vmatpush1.bf16.msra.mxu1 %v7285_v0  ;;  %v7337_v0 = vld [vmem:[#allocation111_spill] sm:$0xff] }
 0x9a1   : > { %4548 = vmatprep.subr.bf16.mxu1 %v7286_v53  ;;  %v7338_v53 = vld [vmem:[#allocation112_spill] sm:$0xff] }
 0x9a4   : > { %4550 = vmatpush1.bf16.msra.mxu1 %v7287_v2  ;;  %v7339_v2 = vld [vmem:[#allocation113_spill] sm:$0xff] }
 0x9a5   : > { %2725 = vmatprep.subr.mxu1 %v6319_v1 }
 0xa3a   : > { %v2642_v52 = vpop.f32.mrb[6].mxu1 }
 0xa3b   : > { %v2644_v16 = vpop.f32.mrb[7].mxu1 }
 0xa3c   : > { %2711 = vmatprep.mubr.f32.mxu1 %v2644_v16  ;;  %v7341_v16 = vld [vmem:[#allocation115_spill] sm:$0xff] }
 0xa3d   : > { %2712 = vmatmul.mubr.f32.vlgmr.msra.gmra.mrb[4].mxu1 %v2642_v52  ;;  %v7340_v52 = vld [vmem:[#allocation114_spill] sm:$0xff] }
 0xa3e   : > { %2726 = vmatpush1.msra.mxu1 %v6321_v4  ;;  %2789 = vmatprep.mubr.f32.mxu1 %v7017_v63 }
 0xa3f   : > { %4552 = vmatprep.subr.bf16.mxu1 %v7288_v6  ;;  %v7343_v6 = vld [vmem:[#allocation117_spill] sm:$0xff] }
 0xa41   : > { %3765 = vmatmul.mubr.msk.f32.vlgmr.msra.gmra.mrb[8].mxu1 %vm340_vm0, %v3764_v20  ;;  %v7342_v20 = vld [vmem:[#allocation116_spill] sm:$0xff] }
 0xa42   : > { %4554 = vmatpush1.bf16.msra.mxu1 %v7289_v12  ;;  %v7344_v12 = vld [vmem:[#allocation118_spill] sm:$0xff] }
 0xa43   : > { %4556 = vmatprep.subr.bf16.mxu1 %v7290_v13  ;;  %v7345_v13 = vld [vmem:[#allocation119_spill] sm:$0xff] }
 0xa46   : > { %4558 = vmatpush1.bf16.msra.mxu1 %v7291_v18  ;;  %v7346_v18 = vld [vmem:[#allocation120_spill] sm:$0xff] }
 0xa47   : > { %4560 = vmatprep.subr.bf16.mxu1 %v7292_v19  ;;  %v7347_v19 = vld [vmem:[#allocation121_spill] sm:$0xff] }
 0xa4a   : > { %4562 = vmatpush1.bf16.msra.mxu1 %v7293_v24  ;;  %v7348_v24 = vld [vmem:[#allocation122_spill] sm:$0xff] }
 0xa4b   : > { %4564 = vmatprep.subr.bf16.mxu1 %v7294_v25  ;;  %v7349_v25 = vld [vmem:[#allocation123_spill] sm:$0xff] }
 0xa4e   : > { %4566 = vmatpush1.bf16.msra.mxu1 %v7295_v30  ;;  %v7350_v30 = vld [vmem:[#allocation124_spill] sm:$0xff] }
 0xa4f   : > { %4568 = vmatprep.subr.bf16.mxu1 %v7296_v31  ;;  %v7351_v31 = vld [vmem:[#allocation125_spill] sm:$0xff] }
 0xa52   : > { %4570 = vmatpush1.bf16.msra.mxu1 %v7297_v36 }
 0xa53   : > { %4572 = vmatprep.subr.bf16.mxu1 %v7298_v37 }
 0xa56   : > { %4574 = vmatpush1.bf16.msra.mxu1 %v7299_v42  ;;  %v3768_v42 = vld [vmem:[%s6736_s5 + $0x28] sm:$0xff] }
 0xa57   : > { %4576 = vmatprep.subr.bf16.mxu1 %v7300_v43  ;;  %v7352_v43 = vld [vmem:[#allocation126_spill] sm:$0xff] }
 0xa5a   : > { %4578 = vmatpush1.bf16.msra.mxu1 %v7301_v48  ;;  %v7353_v48 = vld [vmem:[#allocation127_spill] sm:$0xff] }
 0xa5b   : > { %4580 = vmatprep.subr.bf16.mxu1 %v7302_v49  ;;  %v7354_v49 = vld [vmem:[#allocation128_spill] sm:$0xff] }
 0xa5e   : > { %4582 = vmatpush1.bf16.msra.mxu1 %v7303_v54  ;;  %v7355_v54 = vld [vmem:[#allocation129_spill] sm:$0xff] }
 0xa5f   : > { %4584 = vmatprep.subr.bf16.mxu1 %v7304_v55  ;;  %v7356_v55 = vld [vmem:[#allocation130_spill] sm:$0xff] }
 0xa62   : > { %4586 = vmatpush1.bf16.msra.mxu1 %v7305_v60  ;;  %v7357_v60 = vld [vmem:[#allocation131_spill] sm:$0xff] }
 0xa63   : > { %4588 = vmatprep.subr.bf16.mxu1 %v7306_v61  ;;  %v7358_v61 = vld [vmem:[#allocation132_spill] sm:$0xff] }
 0xa66   : > { %4590 = vmatpush1.bf16.msra.mxu1 %v7307_v5  ;;  %v7359_v5 = vld [vmem:[#allocation133_spill] sm:$0xff] }
 0xa67   : > { %4592 = vmatprep.subr.bf16.mxu1 %v7308_v7  ;;  %v7360_v7 = vld [vmem:[#allocation134_spill] sm:$0xff] }
 0xa6a   : > { %4594 = vmatpush1.bf16.msra.mxu1 %v7309_v14  ;;  %v7361_v14 = vld [vmem:[#allocation135_spill] sm:$0xff] }
 0xa6b   : > { %4596 = vmatprep.subr.bf16.mxu1 %v7310_v15  ;;  %v7362_v15 = vld [vmem:[#allocation136_spill] sm:$0xff] }
 0xa6e   : > { %4598 = vmatpush1.bf16.msra.mxu1 %v7311_v22  ;;  %v7363_v22 = vld [vmem:[#allocation137_spill] sm:$0xff] }
 0xa6f   : > { %4600 = vmatprep.subr.bf16.mxu1 %v7312_v23  ;;  %v7364_v23 = vld [vmem:[#allocation138_spill] sm:$0xff] }
 0xa72   : > { %4602 = vmatpush1.bf16.msra.mxu1 %v7313_v32  ;;  %v7365_v32 = vld [vmem:[#allocation139_spill] sm:$0xff] }
 0xa73   : > { %4604 = vmatprep.subr.bf16.mxu1 %v7314_v33  ;;  %v7366_v33 = vld [vmem:[#allocation140_spill] sm:$0xff] }
 0xa76   : > { %4606 = vmatpush1.bf16.msra.mxu1 %v7315_v40  ;;  %v7367_v40 = vld [vmem:[#allocation141_spill] sm:$0xff] }
 0xa77   : > { %4608 = vmatprep.subr.bf16.mxu1 %v7316_v41  ;;  %v7368_v41 = vld [vmem:[#allocation142_spill] sm:$0xff] }
 0xa7a   : > { %4610 = vmatpush1.bf16.msra.mxu1 %v7317_v46  ;;  %v7369_v46 = vld [vmem:[#allocation143_spill] sm:$0xff] }
 0xa7b   : > { %4612 = vmatprep.subr.bf16.mxu1 %v7318_v51  ;;  %v7370_v51 = vld [vmem:[#allocation144_spill] sm:$0xff] }
 0xa7e   : > { %4614 = vmatpush1.bf16.msra.mxu1 %v7319_v56  ;;  %v7371_v56 = vld [vmem:[#allocation145_spill] sm:$0xff] }
 0xa7f   : > { %2874 = vmatprep.subr.mxu1 %v6319_v1 }
 0xb14   : > { %v2791_v59 = vpop.f32.mrb[8].mxu1 }
 0xb15   : > { %v2793_v11 = vpop.f32.mrb[9].mxu1 }
 0xb16   : > { %2860 = vmatprep.mubr.f32.mxu1 %v2793_v11  ;;  %v7373_v11 = vld [vmem:[#allocation147_spill] sm:$0xff] }
 0xb17   : > { %2861 = vmatmul.mubr.f32.vlgmr.msra.gmra.mrb[4].mxu1 %v2791_v59  ;;  %v7372_v59 = vld [vmem:[#allocation146_spill] sm:$0xff] }
 0xb18   : > { %2875 = vmatpush1.msra.mxu1 %v6321_v4  ;;  %2938 = vmatprep.mubr.f32.mxu1 %v7017_v63 }
 0xb19   : > { %4616 = vmatprep.subr.bf16.mxu1 %v7320_v28  ;;  %v7375_v28 = vld [vmem:[#allocation149_spill] sm:$0xff] }
 0xb1b   : > { %3767 = vmatmul.mubr.msk.f32.vlgmr.msra.gmra.mrb[10].mxu1 %vm340_vm0, %v3766_v17  ;;  %v7374_v17 = vld [vmem:[#allocation148_spill] sm:$0xff] }
 0xb1c   : > { %4618 = vmatpush1.bf16.msra.mxu1 %v7321_v29  ;;  %v7376_v29 = vld [vmem:[#allocation150_spill] sm:$0xff] }
 0xb1d   : > { %4620 = vmatprep.subr.bf16.mxu1 %v7322_v44  ;;  %v7377_v44 = vld [vmem:[#allocation151_spill] sm:$0xff] }
 0xb20   : > { %4622 = vmatpush1.bf16.msra.mxu1 %v7323_v45  ;;  %v7378_v45 = vld [vmem:[#allocation152_spill] sm:$0xff] }
 0xb21   : > { %4624 = vmatprep.subr.bf16.mxu1 %v7324_v57  ;;  %v7379_v57 = vld [vmem:[#allocation153_spill] sm:$0xff] }
 0xb24   : > { %4626 = vmatpush1.bf16.msra.mxu1 %v7325_v58  ;;  %v7380_v58 = vld [vmem:[#allocation154_spill] sm:$0xff] }
 0xb25   : > { %4628 = vmatprep.subr.bf16.mxu1 %v7326_v9  ;;  %v7381_v9 = vld [vmem:[#allocation155_spill] sm:$0xff] }
 0xb28   : > { %4630 = vmatpush1.bf16.msra.mxu1 %v7327_v10  ;;  %v7382_v10 = vld [vmem:[#allocation156_spill] sm:$0xff] }
 0xb29   : > { %4632 = vmatprep.subr.bf16.mxu1 %v7328_v27  ;;  %v7383_v27 = vld [vmem:[#allocation157_spill] sm:$0xff] }
 0xb2c   : > { %4634 = vmatpush1.bf16.msra.mxu1 %v7329_v34 }
 0xb2d   : > { %4636 = vmatprep.subr.bf16.mxu1 %v7330_v50 }
 0xb30   : > { %4638 = vmatpush1.bf16.msra.mxu1 %v7331_v62  ;;  %v3770_v62 = vld [vmem:[%s6736_s5 + $0x30] sm:$0xff] }
 0xb31   : > { %4640 = vmatprep.subr.bf16.mxu1 %v7332_v26  ;;  %v7384_v26 = vld [vmem:[#allocation158_spill] sm:$0xff] }
 0xb34   : > { %4642 = vmatpush1.bf16.msra.mxu1 %v7333_v39  ;;  %v7385_v39 = vld [vmem:[#allocation159_spill] sm:$0xff] }
 0xb35   : > { %4644 = vmatprep.subr.bf16.mxu1 %v7334_v47  ;;  %v7386_v47 = vld [vmem:[#allocation160_spill] sm:$0xff] }
 0xb38   : > { %4646 = vmatpush1.bf16.msra.mxu1 %v7335_v8  ;;  %v7387_v8 = vld [vmem:[#allocation161_spill] sm:$0xff] }
 0xb39   : > { %4648 = vmatprep.subr.bf16.mxu1 %v7336_v35  ;;  %v7388_v35 = vld [vmem:[#allocation162_spill] sm:$0xff] }
 0xb3c   : > { %4650 = vmatpush1.bf16.msra.mxu1 %v7337_v0  ;;  %v7389_v0 = vld [vmem:[#allocation163_spill] sm:$0xff] }
 0xb3d   : > { %4652 = vmatprep.subr.bf16.mxu1 %v7338_v53  ;;  %v7390_v53 = vld [vmem:[#allocation164_spill] sm:$0xff] }
 0xb40   : > { %4654 = vmatpush1.bf16.msra.mxu1 %v7339_v2  ;;  %v7391_v2 = vld [vmem:[#allocation165_spill] sm:$0xff] }
 0xb41   : > { %4656 = vmatprep.subr.bf16.mxu1 %v7340_v52  ;;  %v7392_v52 = vld [vmem:[#allocation166_spill] sm:$0xff] }
 0xb44   : > { %4658 = vmatpush1.bf16.msra.mxu1 %v7341_v16  ;;  %v7393_v16 = vld [vmem:[#allocation167_spill] sm:$0xff] }
 0xb45   : > { %4660 = vmatprep.subr.bf16.mxu1 %v7342_v20  ;;  %v7394_v20 = vld [vmem:[#allocation168_spill] sm:$0xff] }
 0xb48   : > { %4662 = vmatpush1.bf16.msra.mxu1 %v7343_v6  ;;  %v7395_v6 = vld [vmem:[#allocation169_spill] sm:$0xff] }
 0xb49   : > { %4664 = vmatprep.subr.bf16.mxu1 %v7344_v12  ;;  %v7396_v12 = vld [vmem:[#allocation170_spill] sm:$0xff] }
 0xb4c   : > { %4666 = vmatpush1.bf16.msra.mxu1 %v7345_v13  ;;  %v7397_v13 = vld [vmem:[#allocation171_spill] sm:$0xff] }
 0xb4d   : > { %4668 = vmatprep.subr.bf16.mxu1 %v7346_v18  ;;  %v7398_v18 = vld [vmem:[#allocation172_spill] sm:$0xff] }
 0xb50   : > { %4670 = vmatpush1.bf16.msra.mxu1 %v7347_v19  ;;  %v7399_v19 = vld [vmem:[#allocation173_spill] sm:$0xff] }
 0xb51   : > { %4672 = vmatprep.subr.bf16.mxu1 %v7348_v24  ;;  %v7400_v24 = vld [vmem:[#allocation174_spill] sm:$0xff] }
 0xb54   : > { %4674 = vmatpush1.bf16.msra.mxu1 %v7349_v25  ;;  %v7401_v25 = vld [vmem:[#allocation175_spill] sm:$0xff] }
 0xb55   : > { %4676 = vmatprep.subr.bf16.mxu1 %v7350_v30  ;;  %v7402_v30 = vld [vmem:[#allocation176_spill] sm:$0xff] }
 0xb58   : > { %4678 = vmatpush1.bf16.msra.mxu1 %v7351_v31  ;;  %v7403_v31 = vld [vmem:[#allocation177_spill] sm:$0xff] }
 0xb59   : > { %3023 = vmatprep.subr.mxu1 %v6319_v1 }
 0xbee   : > { %v2940_v36 = vpop.f32.mrb[10].mxu1 }
 0xbef   : > { %v2942_v37 = vpop.f32.mrb[11].mxu1 }
 0xbf0   : > { %3009 = vmatprep.mubr.f32.mxu1 %v2942_v37  ;;  %v7405_v37 = vld [vmem:[#allocation179_spill] sm:$0xff] }
 0xbf1   : > { %3010 = vmatmul.mubr.f32.vlgmr.msra.gmra.mrb[4].mxu1 %v2940_v36  ;;  %v7404_v36 = vld [vmem:[#allocation178_spill] sm:$0xff] }
 0xbf2   : > { %3024 = vmatpush1.msra.mxu1 %v6321_v4  ;;  %3087 = vmatprep.mubr.f32.mxu1 %v7017_v63 }
 0xbf3   : > { %4680 = vmatprep.subr.bf16.mxu1 %v7352_v43  ;;  %v7407_v43 = vld [vmem:[#allocation181_spill] sm:$0xff] }
 0xbf5   : > { %3769 = vmatmul.mubr.msk.f32.vlgmr.msra.gmra.mrb[12].mxu1 %vm340_vm0, %v3768_v42  ;;  %v7406_v42 = vld [vmem:[#allocation180_spill] sm:$0xff] }
 0xbf6   : > { %4682 = vmatpush1.bf16.msra.mxu1 %v7353_v48  ;;  %v7408_v48 = vld [vmem:[#allocation182_spill] sm:$0xff] }
 0xbf7   : > { %4684 = vmatprep.subr.bf16.mxu1 %v7354_v49  ;;  %v7409_v49 = vld [vmem:[#allocation183_spill] sm:$0xff] }
 0xbfa   : > { %4686 = vmatpush1.bf16.msra.mxu1 %v7355_v54  ;;  %v7410_v54 = vld [vmem:[#allocation184_spill] sm:$0xff] }
 0xbfb   : > { %4688 = vmatprep.subr.bf16.mxu1 %v7356_v55  ;;  %v7411_v55 = vld [vmem:[#allocation185_spill] sm:$0xff] }
 0xbfe   : > { %4690 = vmatpush1.bf16.msra.mxu1 %v7357_v60  ;;  %v7412_v60 = vld [vmem:[#allocation186_spill] sm:$0xff] }
 0xbff   : > { %4692 = vmatprep.subr.bf16.mxu1 %v7358_v61  ;;  %v7413_v61 = vld [vmem:[#allocation187_spill] sm:$0xff] }
 0xc02   : > { %4694 = vmatpush1.bf16.msra.mxu1 %v7359_v5 }
 0xc03   : > { %4696 = vmatprep.subr.bf16.mxu1 %v7360_v7 }
 0xc06   : > { %4698 = vmatpush1.bf16.msra.mxu1 %v7361_v14  ;;  %v7415_v14 = vld [vmem:[#allocation189_spill] sm:$0xff] }
 0xc07   : > { %4700 = vmatprep.subr.bf16.mxu1 %v7362_v15  ;;  %v7416_v15 = vld [vmem:[#allocation190_spill] sm:$0xff] }
 0xc0a   : > { %4702 = vmatpush1.bf16.msra.mxu1 %v7363_v22  ;;  %v7417_v22 = vld [vmem:[#allocation191_spill] sm:$0xff] }
 0xc0b   : > { %4704 = vmatprep.subr.bf16.mxu1 %v7364_v23  ;;  %v7418_v23 = vld [vmem:[#allocation192_spill] sm:$0xff] }
 0xc0e   : > { %4706 = vmatpush1.bf16.msra.mxu1 %v7365_v32  ;;  %v7419_v32 = vld [vmem:[#allocation193_spill] sm:$0xff] }
 0xc0f   : > { %4708 = vmatprep.subr.bf16.mxu1 %v7366_v33  ;;  %v7420_v33 = vld [vmem:[#allocation194_spill] sm:$0xff] }
 0xc12   : > { %4710 = vmatpush1.bf16.msra.mxu1 %v7367_v40  ;;  %v7421_v40 = vld [vmem:[#allocation195_spill] sm:$0xff] }
 0xc13   : > { %4712 = vmatprep.subr.bf16.mxu1 %v7368_v41  ;;  %v7422_v41 = vld [vmem:[#allocation196_spill] sm:$0xff] }
 0xc16   : > { %4714 = vmatpush1.bf16.msra.mxu1 %v7369_v46  ;;  %v7423_v46 = vld [vmem:[#allocation197_spill] sm:$0xff] }
 0xc17   : > { %4716 = vmatprep.subr.bf16.mxu1 %v7370_v51  ;;  %v7424_v51 = vld [vmem:[#allocation198_spill] sm:$0xff] }
 0xc1a   : > { %4718 = vmatpush1.bf16.msra.mxu1 %v7371_v56  ;;  %v7425_v56 = vld [vmem:[#allocation199_spill] sm:$0xff] }
 0xc1b   : > { %4720 = vmatprep.subr.bf16.mxu1 %v7372_v59  ;;  %v7426_v59 = vld [vmem:[#allocation200_spill] sm:$0xff] }
 0xc1e   : > { %4722 = vmatpush1.bf16.msra.mxu1 %v7373_v11  ;;  %v7427_v11 = vld [vmem:[#allocation201_spill] sm:$0xff] }
 0xc1f   : > { %4724 = vmatprep.subr.bf16.mxu1 %v7374_v17  ;;  %v7428_v17 = vld [vmem:[#allocation202_spill] sm:$0xff] }
 0xc22   : > { %4726 = vmatpush1.bf16.msra.mxu1 %v7375_v28  ;;  %v7429_v28 = vld [vmem:[#allocation203_spill] sm:$0xff] }
 0xc23   : > { %4728 = vmatprep.subr.bf16.mxu1 %v7376_v29  ;;  %v7430_v29 = vld [vmem:[#allocation204_spill] sm:$0xff] }
 0xc26   : > { %4730 = vmatpush1.bf16.msra.mxu1 %v7377_v44  ;;  %v7431_v44 = vld [vmem:[#allocation205_spill] sm:$0xff] }
 0xc27   : > { %4732 = vmatprep.subr.bf16.mxu1 %v7378_v45  ;;  %v7432_v45 = vld [vmem:[#allocation206_spill] sm:$0xff] }
 0xc2a   : > { %4734 = vmatpush1.bf16.msra.mxu1 %v7379_v57  ;;  %v7433_v57 = vld [vmem:[#allocation207_spill] sm:$0xff] }
 0xc2b   : > { %4736 = vmatprep.subr.bf16.mxu1 %v7380_v58  ;;  %v7434_v58 = vld [vmem:[#allocation208_spill] sm:$0xff] }
 0xc2e   : > { %4738 = vmatpush1.bf16.msra.mxu1 %v7381_v9  ;;  %v7435_v9 = vld [vmem:[#allocation209_spill] sm:$0xff] }
 0xc2f   : > { %4740 = vmatprep.subr.bf16.mxu1 %v7382_v10  ;;  %v7436_v10 = vld [vmem:[#allocation210_spill] sm:$0xff] }
 0xc32   : > { %4742 = vmatpush1.bf16.msra.mxu1 %v7383_v27  ;;  %v7437_v27 = vld [vmem:[#allocation211_spill] sm:$0xff] }
 0xc33   : > { %3172 = vmatprep.subr.mxu1 %v6319_v1 }
 0xcc8   : > { %v3089_v34 = vpop.f32.mrb[12].mxu1 }
 0xcc9   : > { %v3091_v50 = vpop.f32.mrb[13].mxu1 }
 0xcca   : > { %3158 = vmatprep.mubr.f32.mxu1 %v3091_v50  ;;  %v7439_v50 = vld [vmem:[#allocation213_spill] sm:$0xff] }
 0xccb   : > { %3159 = vmatmul.mubr.f32.vlgmr.msra.gmra.mrb[4].mxu1 %v3089_v34  ;;  %v7438_v34 = vld [vmem:[#allocation212_spill] sm:$0xff] }
 0xccc   : > { %3173 = vmatpush1.msra.mxu1 %v6321_v4  ;;  %3236 = vmatprep.mubr.f32.mxu1 %v7017_v63 }
 0xccd   : > { %4744 = vmatprep.subr.bf16.mxu1 %v7384_v26  ;;  %v7441_v26 = vld [vmem:[#allocation215_spill] sm:$0xff] }
 0xccf   : > { %3771 = vmatmul.mubr.msk.f32.vlgmr.msra.gmra.mrb[14].mxu1 %vm340_vm0, %v3770_v62  ;;  %v7440_v62 = vld [vmem:[#allocation214_spill] sm:$0xff] }
 0xcd0   : > { %4746 = vmatpush1.bf16.msra.mxu1 %v7385_v39  ;;  %v7442_v39 = vld [vmem:[#allocation216_spill] sm:$0xff] }
 0xcd1   : > { %4748 = vmatprep.subr.bf16.mxu1 %v7386_v47  ;;  %v7443_v47 = vld [vmem:[#allocation217_spill] sm:$0xff] }
 0xcd4   : > { %4750 = vmatpush1.bf16.msra.mxu1 %v7387_v8  ;;  %v7444_v8 = vld [vmem:[#allocation218_spill] sm:$0xff] }
 0xcd5   : > { %4752 = vmatprep.subr.bf16.mxu1 %v7388_v35  ;;  %v7445_v35 = vld [vmem:[#allocation219_spill] sm:$0xff] }
 0xcd8   : > { %4754 = vmatpush1.bf16.msra.mxu1 %v7389_v0 }
 0xcd9   : > { %4756 = vmatprep.subr.bf16.mxu1 %v7390_v53 }
 0xcdc   : > { %4758 = vmatpush1.bf16.msra.mxu1 %v7391_v2  ;;  %v3774_v2 = vld [vmem:[%s6736_s5 + $0x40] sm:$0xff] }
 0xcdd   : > { %4760 = vmatprep.subr.bf16.mxu1 %v7392_v52  ;;  %v7446_v52 = vld [vmem:[#allocation220_spill] sm:$0xff] }
 0xce0   : > { %4762 = vmatpush1.bf16.msra.mxu1 %v7393_v16  ;;  %v7447_v16 = vld [vmem:[#allocation221_spill] sm:$0xff] }
 0xce1   : > { %4764 = vmatprep.subr.bf16.mxu1 %v7394_v20  ;;  %v7448_v20 = vld [vmem:[#allocation222_spill] sm:$0xff] }
 0xce4   : > { %4766 = vmatpush1.bf16.msra.mxu1 %v7395_v6  ;;  %v7450_v6 = vld [vmem:[#allocation224_spill] sm:$0xff] }
 0xce5   : > { %4768 = vmatprep.subr.bf16.mxu1 %v7396_v12  ;;  %v7451_v12 = vld [vmem:[#allocation225_spill] sm:$0xff] }
 0xce8   : > { %4770 = vmatpush1.bf16.msra.mxu1 %v7397_v13  ;;  %v7454_v13 = vld [vmem:[#allocation228_spill] sm:$0xff] }
 0xce9   : > { %4772 = vmatprep.subr.bf16.mxu1 %v7398_v18  ;;  %v7455_v18 = vld [vmem:[#allocation229_spill] sm:$0xff] }
 0xcec   : > { %4774 = vmatpush1.bf16.msra.mxu1 %v7399_v19  ;;  %v7456_v19 = vld [vmem:[#allocation230_spill] sm:$0xff] }
 0xced   : > { %4776 = vmatprep.subr.bf16.mxu1 %v7400_v24  ;;  %v7457_v24 = vld [vmem:[#allocation231_spill] sm:$0xff] }
 0xcf0   : > { %4778 = vmatpush1.bf16.msra.mxu1 %v7401_v25  ;;  %v7458_v25 = vld [vmem:[#allocation232_spill] sm:$0xff] }
 0xcf1   : > { %4780 = vmatprep.subr.bf16.mxu1 %v7402_v30  ;;  %v7459_v30 = vld [vmem:[#allocation233_spill] sm:$0xff] }
 0xcf4   : > { %4782 = vmatpush1.bf16.msra.mxu1 %v7403_v31  ;;  %v7460_v31 = vld [vmem:[#allocation234_spill] sm:$0xff] }
 0xcf5   : > { %4784 = vmatprep.subr.bf16.mxu1 %v7404_v36  ;;  %v7461_v36 = vld [vmem:[#allocation235_spill] sm:$0xff] }
 0xcf8   : > { %4786 = vmatpush1.bf16.msra.mxu1 %v7405_v37  ;;  %v7462_v37 = vld [vmem:[#allocation236_spill] sm:$0xff] }
 0xcf9   : > { %4788 = vmatprep.subr.bf16.mxu1 %v7406_v42  ;;  %v7463_v42 = vld [vmem:[#allocation237_spill] sm:$0xff] }
 0xcfc   : > { %4790 = vmatpush1.bf16.msra.mxu1 %v7407_v43  ;;  %v7464_v43 = vld [vmem:[#allocation238_spill] sm:$0xff] }
 0xcfd   : > { %4792 = vmatprep.subr.bf16.mxu1 %v6082_v21  ;;  %v3772_v21 = vld [vmem:[%s6736_s5 + $0x38] sm:$0xff] }
 0xd00   : > { %4794 = vmatpush1.bf16.msra.mxu1 %v6085_v38  ;;  %v7414_v38 = vld [vmem:[#allocation188_spill] sm:$0xff] }
 0xd01   : > { %4796 = vmatprep.subr.bf16.mxu1 %v7408_v48  ;;  %v7465_v48 = vld [vmem:[#allocation239_spill] sm:$0xff] }
 0xd04   : > { %4798 = vmatpush1.bf16.msra.mxu1 %v7409_v49  ;;  %v7466_v49 = vld [vmem:[#allocation240_spill] sm:$0xff] }
 0xd05   : > { %4800 = vmatprep.subr.bf16.mxu1 %v7410_v54  ;;  %v7467_v54 = vld [vmem:[#allocation241_spill] sm:$0xff] }
 0xd08   : > { %4802 = vmatpush1.bf16.msra.mxu1 %v7411_v55  ;;  %v7468_v55 = vld [vmem:[#allocation242_spill] sm:$0xff] }
 0xd09   : > { %4804 = vmatprep.subr.bf16.mxu1 %v7412_v60  ;;  %v7469_v60 = vld [vmem:[#allocation243_spill] sm:$0xff] }
 0xd0c   : > { %4806 = vmatpush1.bf16.msra.mxu1 %v7413_v61  ;;  %v7470_v61 = vld [vmem:[#allocation244_spill] sm:$0xff] }
 0xd0d   : > { %3321 = vmatprep.subr.mxu1 %v6319_v1 }
 0xda2   : > { %v3238_v5 = vpop.f32.mrb[14].mxu1 }
 0xda3   : > { %v3240_v7 = vpop.f32.mrb[15].mxu1 }
 0xda4   : > { %3307 = vmatprep.mubr.f32.mxu1 %v3240_v7  ;;  %v7472_v7 = vld [vmem:[#allocation246_spill] sm:$0xff] }
 0xda5   : > { %3308 = vmatmul.mubr.f32.vlgmr.msra.gmra.mrb[4].mxu1 %v3238_v5  ;;  %v7471_v5 = vld [vmem:[#allocation245_spill] sm:$0xff] }
 0xda6   : > { %3322 = vmatpush1.msra.mxu1 %v6321_v4  ;;  %3385 = vmatprep.mubr.f32.mxu1 %v7017_v63 }
 0xda7   : > { %4808 = vmatprep.subr.bf16.mxu1 %v7414_v38  ;;  %v7474_v38 = vld [vmem:[#allocation248_spill] sm:$0xff] }
 0xda9   : > { %3773 = vmatmul.mubr.msk.f32.vlgmr.msra.gmra.mrb[16].mxu1 %vm340_vm0, %v3772_v21  ;;  %v7473_v21 = vld [vmem:[#allocation247_spill] sm:$0xff] }
 0xdaa   : > { %4810 = vmatpush1.bf16.msra.mxu1 %v7415_v14  ;;  %v7475_v14 = vld [vmem:[#allocation249_spill] sm:$0xff] }
 0xdab   : > { %4812 = vmatprep.subr.bf16.mxu1 %v7416_v15  ;;  %v7476_v15 = vld [vmem:[#allocation250_spill] sm:$0xff] }
 0xdae   : > { %4814 = vmatpush1.bf16.msra.mxu1 %v7417_v22  ;;  %v3614_v22 = vld [vmem:[%s6737_s6] sm:$0xff] }
 0xdaf   : > { %4816 = vmatprep.subr.bf16.mxu1 %v7418_v23  ;;  %3617 = vperm.xlu1 %5029, %v3614_v22  }
 0xdb2   : > { %4818 = vmatpush1.bf16.msra.mxu1 %v7419_v32 }
 0xdb3   : > { %4820 = vmatprep.subr.bf16.mxu1 %v7420_v33 }
 0xdb6   : > { %4822 = vmatpush1.bf16.msra.mxu1 %v7421_v40 }
 0xdb7   : > { %4824 = vmatprep.subr.bf16.mxu1 %v7422_v41 }
 0xdba   : > { %4826 = vmatpush1.bf16.msra.mxu1 %v7423_v46 }
 0xdbb   : > { %4828 = vmatprep.subr.bf16.mxu1 %v7424_v51 }
 0xdbe   : > { %4830 = vmatpush1.bf16.msra.mxu1 %v7425_v56 }
 0xdbf   : > { %4832 = vmatprep.subr.bf16.mxu1 %v7426_v59 }
 0xdc2   : > { %4834 = vmatpush1.bf16.msra.mxu1 %v7427_v11 }
 0xdc3   : > { %4836 = vmatprep.subr.bf16.mxu1 %v7428_v17  ;;  %v5034_v17 = vld [vmem:[%s5360_s16] sm:$0xff] }
 0xdc6   : > { %4838 = vmatpush1.bf16.msra.mxu1 %v7429_v28 }
 0xdc7   : > { %4840 = vmatprep.subr.bf16.mxu1 %v7430_v29  ;;  %v5035_v29 = vld [vmem:[%s5360_s16 + $0x8] sm:$0xff]  ;;  %s5098_s16 = sshll.u32 %s5172_s26, 4  ;;  %s5099_s16 = int_to_ptr.vmem [resolvable:$false] %s5098_s16 }
 0xdc8   : > { %s5100_s15 = scalar_lea.vmem %s5099_s16, 512  ;;  %p5101_p10 = scmp.lt.s32.totalorder %s6689_s21, %s5099_s16 }
 0xdc9   : > { %p5102_p13 = scmp.lt.s32.totalorder %s5100_s15, %s5094_s25 }
 0xdca   : > { %4842 = vmatpush1.bf16.msra.mxu1 %v7431_v44 }
 0xdcb   : > { %4844 = vmatprep.subr.bf16.mxu1 %v7432_v45  ;;  %p5103_p3 = por %p5102_p13, %p5101_p10 }
 0xdcd   : > { %p5104_p7 = pnand %p5103_p3, %p5097_p8 }
 0xdce   : > { %4846 = vmatpush1.bf16.msra.mxu1 %v7433_v57 }
 0xdcf   : > { %4848 = vmatprep.subr.bf16.mxu1 %v7434_v58 }
 0xdd2   : > { %4850 = vmatpush1.bf16.msra.mxu1 %v7435_v9 }
 0xdd3   : > { %4852 = vmatprep.subr.bf16.mxu1 %v7436_v10 }
 0xdd6   : > { %4854 = vmatpush1.bf16.msra.mxu1 %v7437_v27 }
 0xdd7   : > { %4856 = vmatprep.subr.bf16.mxu1 %v7438_v34 }
 0xdda   : > { %4858 = vmatpush1.bf16.msra.mxu1 %v7439_v50 }
 0xddb   : > { %4860 = vmatprep.subr.bf16.mxu1 %v7440_v62 }
 0xdde   : > { %4862 = vmatpush1.bf16.msra.mxu1 %v7441_v26 }
 0xddf   : > { %4864 = vmatprep.subr.bf16.mxu1 %v7442_v39 }
 0xde2   : > { %4866 = vmatpush1.bf16.msra.mxu1 %v7443_v47 }
 0xde3   : > { %4868 = vmatprep.subr.bf16.mxu1 %v7444_v8 }
 0xde6   : > { %4870 = vmatpush1.bf16.msra.mxu1 %v7445_v35 }
 0xde7   : > { %3470 = vmatprep.subr.mxu1 %v6319_v1  ;;  %v7449_v1 = vld [vmem:[#allocation223_spill] sm:$0xff] }
 0xe2e   : > { %v3618_v33 = vpop.permute.xlu1 %3617 }
 0xe7c   : > { %v3387_v0 = vpop.f32.mrb[16].mxu1 }
 0xe7d   : > { %v3389_v53 = vpop.f32.mrb[17].mxu1 }
 0xe7e   : > { %3456 = vmatprep.mubr.f32.mxu1 %v3389_v53 }
 0xe7f   : > { %3457 = vmatmul.mubr.f32.vlgmr.msra.gmra.mrb[4].mxu1 %v3387_v0 }
 0xe80   : > { %3471 = vmatpush1.msra.mxu1 %v6321_v4  ;;  %3534 = vmatprep.mubr.f32.mxu1 %v7017_v63  ;;  %v7452_v4 = vld [vmem:[#allocation226_spill] sm:$0xff]  ;;  %v7453_v63 = vld [vmem:[#allocation227_spill] sm:$0xff] }
 0xe81   : > { %4872 = vmatprep.subr.bf16.mxu1 %v7446_v52 }
 0xe83   : > { %3775 = vmatmul.mubr.msk.f32.vlgmr.msra.gmra.mrb[18].mxu1 %vm340_vm0, %v3774_v2 }
 0xe84   : > { %4874 = vmatpush1.bf16.msra.mxu1 %v7447_v16 }
 0xe85   : > { %4876 = vmatprep.subr.bf16.mxu1 %v7448_v20 }
 0xe88   : > { %4878 = vmatpush1.bf16.msra.mxu1 %v7449_v1 }
 0xe89   : > { %4880 = vmatprep.subr.bf16.mxu1 %v7450_v6 }
 0xe8c   : > { %4882 = vmatpush1.bf16.msra.mxu1 %v7451_v12 }
 0xe8d   : > { %4884 = vmatprep.subr.bf16.mxu1 %v7452_v4 }
 0xe90   : > { %4886 = vmatpush1.bf16.msra.mxu1 %v7453_v63 }
 0xe91   : > { %4888 = vmatprep.subr.bf16.mxu1 %v7454_v13 }
 0xe94   : > { %4890 = vmatpush1.bf16.msra.mxu1 %v7455_v18 }
 0xe95   : > { %4892 = vmatprep.subr.bf16.mxu1 %v7456_v19 }
 0xe98   : > { %4894 = vmatpush1.bf16.msra.mxu1 %v7457_v24 }
 0xe99   : > { %4896 = vmatprep.subr.bf16.mxu1 %v7458_v25 }
 0xe9c   : > { %4898 = vmatpush1.bf16.msra.mxu1 %v7459_v30 }
 0xe9d   : > { %4900 = vmatprep.subr.bf16.mxu1 %v7460_v31 }
 0xea0   : > { %4902 = vmatpush1.bf16.msra.mxu1 %v7461_v36 }
 0xea1   : > { %4904 = vmatprep.subr.bf16.mxu1 %v7462_v37 }
 0xea4   : > { %4906 = vmatpush1.bf16.msra.mxu1 %v7463_v42 }
 0xea5   : > { %4908 = vmatprep.subr.bf16.mxu1 %v7464_v43 }
 0xea8   : > { %4910 = vmatpush1.bf16.msra.mxu1 %v7465_v48 }
 0xea9   : > { %4912 = vmatprep.subr.bf16.mxu1 %v7466_v49 }
 0xeac   : > { %4914 = vmatpush1.bf16.msra.mxu1 %v7467_v54 }
 0xead   : > { %4916 = vmatprep.subr.bf16.mxu1 %v7468_v55 }
 0xeb0   : > { %4918 = vmatpush1.bf16.msra.mxu1 %v7469_v60 }
 0xeb1   : > { %4920 = vmatprep.subr.bf16.mxu1 %v6288_v3  ;;  %v3622_v3 = vld [vmem:[%s6738_s7] sm:$0xff] }
 0xeb2   : > { %3625 = vperm.xlu1 %5029, %v3622_v3  }
 0xeb4   : > { %4922 = vmatpush1.bf16.msra.mxu1 %v7470_v61 }
 0xeb5   : > { %4924 = vmatprep.subr.bf16.mxu1 %v7471_v5 }
 0xeb8   : > { %4926 = vmatpush1.bf16.msra.mxu1 %v7472_v7 }
 0xeb9   : > { %4928 = vmatprep.subr.bf16.mxu1 %v7473_v21 }
 0xebc   : > { %4930 = vmatpush1.bf16.msra.mxu1 %v7474_v38 }
 0xebd   : > { %4932 = vmatprep.subr.bf16.mxu1 %v7475_v14 }
 0xec0   : > { %4934 = vmatpush1.bf16.msra.mxu1 %v7476_v15 }
 0xf31   : > { %v3626_v51 = vpop.permute.xlu1 %3625 }
 0xf56   : > { %v3536_v23 = vpop.f32.mrb[18].mxu1 }
 0xf57   : > { %v3538_v32 = vpop.f32.mrb[19].mxu1 }
 0xf58   : > { %3605 = vmatprep.mubr.f32.mxu1 %v3538_v32 }
 0xf59   : > { %3606 = vmatmul.mubr.f32.vlgmr.msra.gmra.mrb[4].mxu1 %v3536_v23 }
0x102c   : > { %v3607_v40 = vpop.f32.mrb[4].mxu1 }
0x102d   : > { %v3620_v41 = vmul.f32 %v3618_v33, %v3607_v40  ;;  %v3609_v46 = vpop.f32.mrb[5].mxu1 }
0x102e   : > { %v3621_v56 = vmul.f32 %v3618_v33, %v3609_v46 }
0x102f   : > { %v3628_v59 = vadd.f32 %v3626_v51, %v3620_v41 }
0x1030   : > { %v3629_v11 = vadd.f32 %v3626_v51, %v3621_v56 }
0x1031   : > { %v3630_v28 = vadd.f32 %v5034_v17, %v3628_v59 }
0x1032   : > { %v3631_v44 = vadd.f32 %v5035_v29, %v3629_v11 }
0x1033   : > { %v3632_v45 = vmax.f32 %v3630_v28, 0.0 }
0x1034   : > { %v3633_v57 = vmax.f32 %v3631_v44, 0.0 }
0x1035   : > { %3634 = vst [vmem:[%s336_s11] sm:$0xff] %v3632_v45 }
0x1036   : > { %3635 = vst [vmem:[%s336_s11 + $0x8] sm:$0xff] %v3633_v57 }
0x1037   : > { %5107 = shalt.err (!%p5104_p7)
}
0x1038   : > { %s5108_s20 = scalar_lea.hbm %s6687_s14, 256  ;;  %s5112_s10 = scalar_lea.hbm %s6739_s8, 512 }
0x1039   : > { %p5109_p9 = scmp.ne.s32.totalorder %s6687_s14, %s5108_s20  ;;  %p5113_p0 = scmp.lt.u32.totalorder %s6687_s14, %s6739_s8 }
0x103a   : > { %p5114_p11 = scmp.lt.u32.totalorder %s5112_s10, %s5108_s20  ;;  %p5116_p4 = scmp.lt.u32.totalorder %s5108_s20, %s6687_s14 }
0x103b   : > { %p5110_p2 = pnand %p5109_p9, %p5309_p12 }
0x103c   : > { %p5115_p1 = por %p5114_p11, %p5113_p0 }
0x103d   : > { %p5111_p5 = pneg %p5110_p2 }
0x103e   : > { %p5117_p6 = por %p5116_p4, %p5115_p1 }
0x1040   : > { %p5118_p8 = pnand %p5117_p6, %p5111_p5 }
0x1042   : > { %5121 = shalt.err (!%p5118_p8)
}
0x1043   : > { %4973 = dma.vmem_to_hbm [thread:$0]  (%p5309_p12), %s6689_s21, 256, %s6687_s14, %s3637_s9  }
0x1044 PF: > { %s3663_s18 = sand.u32 1, %s5152_s27   ;;  %p7477_p10 = scmp.ne.s32.totalorder %s6987_s12, 0 }
0x1045   : > { %p7478_p13 = scmp.ge.s32.totalorder %s5164_s30, 2  ;;  %s3664_s19 = scalar_lea.sflag [#allocation4], %s3663_s18 }
0x1047   : > { %p4984_p3 = pnand %p7478_p13, %p7477_p10 }
0x1049   : > { %5147 = dma.done.wait (!%p4984_p3), %s3664_s19, 256  }
0x104a   : > { %5149 = vsyncadd (!%p4984_p3), %s3664_s19, 4294967040  ;;  %s7479_s30 = sld [smem:[#allocation11_spill]]  ;;  %s7480_s27 = smov %s5156_s28 }
0x104b   : > { %s7481_s28 = smov %s5160_s29  ;;  %s7482_s29 = smov %s5305_s23 }
0x1050   : > { %p22_p7 = scmp.ge.s32.totalorder %s7479_s30, 4  }
0x1052   :  { %24 = sbr.rel (!%p22_p7) target bundleno = 6 (0x6), region = 125 }
0x1059   :  { %3669 = vsyncpa [#allocation3], 1 }
0x105a   :  { %3671 = vsyncpa [#allocation3 + $0x1], 1 }
0x105b   :  { %3672 = vsyncpa [#allocation6], 1 }
0x105c   :  { %3673 = vsyncpa [#allocation4], 1 }
0x105d   :  { %3675 = vsyncpa [#allocation4 + $0x1], 1 }

</bundles_post_ra>
